<compile_context>
chip_gen: v6e
topology: v6e:2x2x1
jax: 0.10.0
libtpu: 0.0.40
codegen_flags: <defaults>
</compile_context>

<pallas_src>
import functools

import jax
import jax.numpy as jnp
from jax.experimental import pallas as pl
from jax.experimental.pallas import tpu as pltpu


# ------------------------------ fused kernel --------------------------------

def _fused_block_kernel(x_ref, w1_ref, w2_ref, fc1_wt_ref, fc1_b_ref,
                        fc2_w_ref, fc2_b_ref, mask_ref,
                        o_ref, slab_ref, y1pad_ref, *,
                        tap_offsets, out_len, ch, ident_off, inv_s):
    """One batch element: conv1+ReLU, conv2, SE, residual, ReLU.

    x_ref:      (C, Lp)       f32  zero-padded input, lane-padded plane layout
    w1_ref:     (O, 27*C)     bf16 conv1 weights, tap-major columns
    w2_ref:     (O, 27*O)     bf16 conv2 weights
    fc1_wt_ref: (O, R)        f32  fc1 weight, transposed
    fc1_b_ref:  (1, R)        f32
    fc2_w_ref:  (O, R)        f32
    fc2_b_ref:  (O, 1)        f32
    mask_ref:   (1, L)        f32  1.0 at valid spatial columns, 0.0 elsewhere
    o_ref:      (O, L)        f32  output (lane-dense, L multiple of 128)
    slab_ref:   (27*C, L)     f32  scratch: stacked shifted windows (reused)
    y1pad_ref:  (O, Lp)       f32  scratch: re-padded conv1 output
    """
    L = out_len

    # ---- conv1: 27 shifted windows -> (27*C, L) slab -> one deep-K GEMM ----
    for t, off in enumerate(tap_offsets):
        slab_ref[t * ch:(t + 1) * ch, :] = x_ref[:, off:off + L]
    y1 = jnp.dot(w1_ref[...], slab_ref[...].astype(jnp.bfloat16),
                 preferred_element_type=jnp.float32)            # (O, L) f32
    y1 = jnp.maximum(y1, 0.0)                                   # fused ReLU

    # In-VMEM re-pad for conv2: zero the padded buffer, then scatter the
    # *masked* conv1 output at the center-tap offset.  The mask zeroes the
    # garbage padded-plane columns (h >= H, w >= W, plane tail), which is
    # exactly the zero padding conv2's halo needs -- no HBM round trip.
    y1pad_ref[...] = jnp.zeros_like(y1pad_ref)
    y1pad_ref[:, ident_off:ident_off + L] = y1 * mask_ref[...]

    # ---- conv2 (no activation): same slab trick on the padded y1 ----------
    for t, off in enumerate(tap_offsets):
        slab_ref[t * ch:(t + 1) * ch, :] = y1pad_ref[:, off:off + L]
    y2 = jnp.dot(w2_ref[...], slab_ref[...].astype(jnp.bfloat16),
                 preferred_element_type=jnp.float32)            # (O, L) f32

    # ---- SE: masked global-average pool + tiny MLP (broadcast + reduce) ----
    pooled = jnp.sum(y2 * mask_ref[...], axis=-1, keepdims=True) * inv_s  # (O,1)
    hdn = jnp.sum(fc1_wt_ref[...] * pooled, axis=0, keepdims=True)        # (1,R)
    hdn = jnp.maximum(hdn + fc1_b_ref[...], 0.0)
    scale = jnp.sum(fc2_w_ref[...] * hdn, axis=-1, keepdims=True)         # (O,1)
    scale = jax.nn.sigmoid(scale + fc2_b_ref[...])

    # ---- scale * y2 + identity residual, final ReLU -------------------------
    ident = x_ref[:, ident_off:ident_off + L]                   # (O, L) f32
    o_ref[...] = jnp.maximum(y2 * scale + ident, 0.0)


# ----------------------------- forward wrapper ------------------------------

def basic_block_forward(x, params):
    """x: (N, C, D, H, W) float32 (PyTorch NCDHW); returns same shape."""
    w_conv1 = params["conv1_w"]   # (O, Cin, 3, 3, 3)
    w_conv2 = params["conv2_w"]   # (O, O, 3, 3, 3)
    fc1_w = params["fc1_w"]       # (R, O)
    fc1_b = params["fc1_b"]       # (R,)
    fc2_w = params["fc2_w"]       # (O, R)
    fc2_b = params["fc2_b"]       # (O,)

    N, Cin, D, H, W = x.shape
    O = w_conv1.shape[0]
    R = fc1_w.shape[0]
    assert Cin == O, "identity residual assumes in_channels == out_channels"

    S = D * H * W
    Hp, Wp = H + 2, W + 2
    HPWP = Hp * Wp
    HPWP_PAD = ((HPWP + 127) // 128) * 128     # lane-dense plane stride
    Dp = D + 3                                  # 1 front pad + 2 back pad
    L = D * HPWP_PAD                            # output length (mult. of 128)
    Lp = Dp * HPWP_PAD                          # padded input length
    tap_offsets = [kd * HPWP_PAD + kh * Wp + kw
                   for kd in range(3) for kh in range(3) for kw in range(3)]
    ident_off = HPWP_PAD + Wp + 1               # center tap == identity offset

    # --- single padded f32 copy of the input (no duplicate bf16 copy) -------
    x_pad = jnp.pad(x, ((0, 0), (0, 0), (1, 2), (1, 1), (1, 1)))
    x_pad = x_pad.reshape(N, Cin, Dp, HPWP)
    x_pad = jnp.pad(x_pad, ((0, 0), (0, 0), (0, 0), (0, HPWP_PAD - HPWP)))
    x_pad = x_pad.reshape(N, Cin, Lp)

    # --- weights flattened to (Cout, 27*Cin) bf16, tap-major columns --------
    w1 = jnp.transpose(w_conv1, (0, 2, 3, 4, 1)).reshape(O, 27 * Cin)
    w1 = w1.astype(jnp.bfloat16)
    w2 = jnp.transpose(w_conv2, (0, 2, 3, 4, 1)).reshape(O, 27 * O)
    w2 = w2.astype(jnp.bfloat16)
    fc1_wt = fc1_w.T.astype(jnp.float32)                  # (O, R)
    fc1_b_row = fc1_b.reshape(1, R).astype(jnp.float32)
    fc2_w_f = fc2_w.astype(jnp.float32)                   # (O, R)
    fc2_b_col = fc2_b.reshape(O, 1).astype(jnp.float32)

    # --- validity mask of the padded-plane output coordinates ---------------
    q = jnp.arange(L, dtype=jnp.int32)
    rem = q % HPWP_PAD
    valid = (rem < HPWP) & ((rem // Wp) < H) & ((rem % Wp) < W)
    mask = valid.astype(jnp.float32).reshape(1, L)

    kernel = functools.partial(
        _fused_block_kernel, tap_offsets=tap_offsets, out_len=L,
        ch=Cin, ident_off=ident_off, inv_s=1.0 / float(S))

    out_flat = pl.pallas_call(
        kernel,
        out_shape=jax.ShapeDtypeStruct((N, O, L), jnp.float32),
        grid=(N,),
        in_specs=[
            pl.BlockSpec((None, Cin, Lp), lambda n: (n, 0, 0)),
            pl.BlockSpec((O, 27 * Cin), lambda n: (0, 0)),
            pl.BlockSpec((O, 27 * O), lambda n: (0, 0)),
            pl.BlockSpec((O, R), lambda n: (0, 0)),
            pl.BlockSpec((1, R), lambda n: (0, 0)),
            pl.BlockSpec((O, R), lambda n: (0, 0)),
            pl.BlockSpec((O, 1), lambda n: (0, 0)),
            pl.BlockSpec((1, L), lambda n: (0, 0)),
        ],
        out_specs=pl.BlockSpec((None, O, L), lambda n: (n, 0, 0)),
        scratch_shapes=[
            pltpu.VMEM((27 * Cin, L), jnp.float32),   # shared conv1/conv2 slab
            pltpu.VMEM((O, Lp), jnp.float32),         # re-padded conv1 output
        ],
        compiler_params=pltpu.CompilerParams(
            dimension_semantics=("parallel",),
            vmem_limit_bytes=64 * 1024 * 1024),
    )(x_pad, w1, w2, fc1_wt, fc1_b_row, fc2_w_f, fc2_b_col, mask)

    # drop the lane/plane padding of the padded-plane layout -> NCDHW
    out = out_flat.reshape(N, O, D, HPWP_PAD)[:, :, :, :HPWP]
    out = out.reshape(N, O, D, Hp, Wp)[:, :, :, :H, :W]
    return out


# ----------------------------- pure-JAX reference ----------------------------

def reference_forward(x, params):
    dn = ("NCDHW", "OIDHW", "NCDHW")
    y = jax.lax.conv_general_dilated(
        x, params["conv1_w"], (1, 1, 1), [(1, 1)] * 3,
        dimension_numbers=dn, precision=jax.lax.Precision.HIGHEST)
    y = jnp.maximum(y, 0.0)
    y = jax.lax.conv_general_dilated(
        y, params["conv2_w"], (1, 1, 1), [(1, 1)] * 3,
        dimension_numbers=dn, precision=jax.lax.Precision.HIGHEST)
    pooled = jnp.mean(y, axis=(2, 3, 4))
    h = jnp.maximum(pooled @ params["fc1_w"].T + params["fc1_b"], 0.0)
    s = jax.nn.sigmoid(h @ params["fc2_w"].T + params["fc2_b"])
    y = y * s[:, :, None, None, None]
    y = y + x
    return jnp.maximum(y, 0.0)


# ----------------------------------- main ------------------------------------

if __name__ == "__main__":
    key = jax.random.PRNGKey(0)
    N, C, D, H, W = 2, 4, 8, 8, 8
    O = C               # in_channels == out_channels, stride == 1 -> Identity res
    R = max(O // 4, 1)  # SE reduction = 4

    ks = jax.random.split(key, 7)
    x = jax.random.normal(ks[0], (N, C, D, H, W), jnp.float32)
    params = {
        "conv1_w": 0.1 * jax.random.normal(ks[1], (O, C, 3, 3, 3), jnp.float32),
        "conv2_w": 0.1 * jax.random.normal(ks[2], (O, O, 3, 3, 3), jnp.float32),
        "fc1_w": 0.1 * jax.random.normal(ks[3], (R, O), jnp.float32),
        "fc1_b": 0.1 * jax.random.normal(ks[4], (R,), jnp.float32),
        "fc2_w": 0.1 * jax.random.normal(ks[5], (O, R), jnp.float32),
        "fc2_b": 0.1 * jax.random.normal(ks[6], (O,), jnp.float32),
    }

    out = jax.jit(basic_block_forward)(x, params)
    out = jax.block_until_ready(out)

    ref = reference_forward(x, params)
    assert out.shape == ref.shape == (N, O, D, H, W)
    if not bool(jnp.isfinite(out).all()):
        raise RuntimeError("non-finite output from Pallas kernel")
    max_err = float(jnp.max(jnp.abs(out - ref)))
    # Design decision: conv GEMMs use bf16 operands (f32 accumulation) for the
    # MXU; vs. the f32 HIGHEST-precision reference this bounds the absolute
    # error to a few 1e-3 on O(1) outputs -> 2.5e-2 tolerance.
    if max_err > 2.5e-2:
        raise RuntimeError(f"mismatch vs reference: max abs err {max_err}")
    print("KERNEL_OK")
</pallas_src>

<mosaic_0001>
module attributes {stable_mosaic.version = 11 : i64} {
  func.func @_fused_block_kernel(%arg0: i32, %arg1: memref<1x4x1408xf32, #tpu.memory_space<vmem>>, %arg2: memref<4x108xbf16, #tpu.memory_space<vmem>>, %arg3: memref<4x108xbf16, #tpu.memory_space<vmem>>, %arg4: memref<4x1xf32, #tpu.memory_space<vmem>>, %arg5: memref<1x1xf32, #tpu.memory_space<vmem>>, %arg6: memref<4x1xf32, #tpu.memory_space<vmem>>, %arg7: memref<4x1xf32, #tpu.memory_space<vmem>>, %arg8: memref<1x1024xf32, #tpu.memory_space<vmem>>, %arg9: memref<1x4x1024xf32, #tpu.memory_space<vmem>>, %arg10: memref<108x1024xf32, #tpu.memory_space<vmem>>, %arg11: memref<4x1408xf32, #tpu.memory_space<vmem>>) attributes {dimension_semantics = [#tpu.dimension_semantics<parallel>], iteration_bounds = array<i64: 2>, scalar_prefetch = 0 : i64, scratch_operands = 2 : i64, tpu.core_type = #tpu.core_type<tc>, window_params = [{transform_indices = @transform_0, window_bounds = array<i64: 1, 4, 1408>}, {pipeline_mode = #tpu.pipeline_mode<synchronous>, transform_indices = @transform_1, window_bounds = array<i64: 4, 108>}, {pipeline_mode = #tpu.pipeline_mode<synchronous>, transform_indices = @transform_2, window_bounds = array<i64: 4, 108>}, {pipeline_mode = #tpu.pipeline_mode<synchronous>, transform_indices = @transform_3, window_bounds = array<i64: 4, 1>}, {pipeline_mode = #tpu.pipeline_mode<synchronous>, transform_indices = @transform_4, window_bounds = array<i64: 1, 1>}, {pipeline_mode = #tpu.pipeline_mode<synchronous>, transform_indices = @transform_5, window_bounds = array<i64: 4, 1>}, {pipeline_mode = #tpu.pipeline_mode<synchronous>, transform_indices = @transform_6, window_bounds = array<i64: 4, 1>}, {pipeline_mode = #tpu.pipeline_mode<synchronous>, transform_indices = @transform_7, window_bounds = array<i64: 1, 1024>}, {transform_indices = @transform_8, window_bounds = array<i64: 1, 4, 1024>}]} {
    %c0 = arith.constant 0 : index
    %c0_0 = arith.constant 0 : index
    %c0_1 = arith.constant 0 : index
    %0 = vector.load %arg1[%c0, %c0_0, %c0_1] : memref<1x4x1408xf32, #tpu.memory_space<vmem>>, vector<1x4x1024xf32>
    %1 = vector.shape_cast %0 : vector<1x4x1024xf32> to vector<4x1024xf32>
    %c0_2 = arith.constant 0 : index
    %c0_3 = arith.constant 0 : index
    %2 = vector.load %arg10[%c0_2, %c0_3] : memref<108x1024xf32, #tpu.memory_space<vmem>>, vector<4x1024xf32>
    tpu.vector_store %arg10[%c0_2, %c0_3], %1 {strides = array<i32>} : memref<108x1024xf32, #tpu.memory_space<vmem>>, vector<4x1024xf32>,
    %c0_4 = arith.constant 0 : index
    %c0_5 = arith.constant 0 : index
    %c1 = arith.constant 1 : index
    %3 = vector.load %arg1[%c0_4, %c0_5, %c1] : memref<1x4x1408xf32, #tpu.memory_space<vmem>>, vector<1x4x1024xf32>
    %4 = vector.shape_cast %3 : vector<1x4x1024xf32> to vector<4x1024xf32>
    %c4 = arith.constant 4 : index
    %c0_6 = arith.constant 0 : index
    %5 = vector.load %arg10[%c4, %c0_6] : memref<108x1024xf32, #tpu.memory_space<vmem>>, vector<4x1024xf32>
    tpu.vector_store %arg10[%c4, %c0_6], %4 {strides = array<i32>} : memref<108x1024xf32, #tpu.memory_space<vmem>>, vector<4x1024xf32>,
    %c0_7 = arith.constant 0 : index
    %c0_8 = arith.constant 0 : index
    %c2 = arith.constant 2 : index
    %6 = vector.load %arg1[%c0_7, %c0_8, %c2] : memref<1x4x1408xf32, #tpu.memory_space<vmem>>, vector<1x4x1024xf32>
    %7 = vector.shape_cast %6 : vector<1x4x1024xf32> to vector<4x1024xf32>
    %c8 = arith.constant 8 : index
    %c0_9 = arith.constant 0 : index
    %8 = vector.load %arg10[%c8, %c0_9] : memref<108x1024xf32, #tpu.memory_space<vmem>>, vector<4x1024xf32>
    tpu.vector_store %arg10[%c8, %c0_9], %7 {strides = array<i32>} : memref<108x1024xf32, #tpu.memory_space<vmem>>, vector<4x1024xf32>,
    %c0_10 = arith.constant 0 : index
    %c0_11 = arith.constant 0 : index
    %c10 = arith.constant 10 : index
    %9 = vector.load %arg1[%c0_10, %c0_11, %c10] : memref<1x4x1408xf32, #tpu.memory_space<vmem>>, vector<1x4x1024xf32>
    %10 = vector.shape_cast %9 : vector<1x4x1024xf32> to vector<4x1024xf32>
    %c12 = arith.constant 12 : index
    %c0_12 = arith.constant 0 : index
    %11 = vector.load %arg10[%c12, %c0_12] : memref<108x1024xf32, #tpu.memory_space<vmem>>, vector<4x1024xf32>
    tpu.vector_store %arg10[%c12, %c0_12], %10 {strides = array<i32>} : memref<108x1024xf32, #tpu.memory_space<vmem>>, vector<4x1024xf32>,
    %c0_13 = arith.constant 0 : index
    %c0_14 = arith.constant 0 : index
    %c11 = arith.constant 11 : index
    %12 = vector.load %arg1[%c0_13, %c0_14, %c11] : memref<1x4x1408xf32, #tpu.memory_space<vmem>>, vector<1x4x1024xf32>
    %13 = vector.shape_cast %12 : vector<1x4x1024xf32> to vector<4x1024xf32>
    %c16 = arith.constant 16 : index
    %c0_15 = arith.constant 0 : index
    %14 = vector.load %arg10[%c16, %c0_15] : memref<108x1024xf32, #tpu.memory_space<vmem>>, vector<4x1024xf32>
    tpu.vector_store %arg10[%c16, %c0_15], %13 {strides = array<i32>} : memref<108x1024xf32, #tpu.memory_space<vmem>>, vector<4x1024xf32>,
    %c0_16 = arith.constant 0 : index
    %c0_17 = arith.constant 0 : index
    %c12_18 = arith.constant 12 : index
    %15 = vector.load %arg1[%c0_16, %c0_17, %c12_18] : memref<1x4x1408xf32, #tpu.memory_space<vmem>>, vector<1x4x1024xf32>
    %16 = vector.shape_cast %15 : vector<1x4x1024xf32> to vector<4x1024xf32>
    %c20 = arith.constant 20 : index
    %c0_19 = arith.constant 0 : index
    %17 = vector.load %arg10[%c20, %c0_19] : memref<108x1024xf32, #tpu.memory_space<vmem>>, vector<4x1024xf32>
    tpu.vector_store %arg10[%c20, %c0_19], %16 {strides = array<i32>} : memref<108x1024xf32, #tpu.memory_space<vmem>>, vector<4x1024xf32>,
    %c0_20 = arith.constant 0 : index
    %c0_21 = arith.constant 0 : index
    %c20_22 = arith.constant 20 : index
    %18 = vector.load %arg1[%c0_20, %c0_21, %c20_22] : memref<1x4x1408xf32, #tpu.memory_space<vmem>>, vector<1x4x1024xf32>
    %19 = vector.shape_cast %18 : vector<1x4x1024xf32> to vector<4x1024xf32>
    %c24 = arith.constant 24 : index
    %c0_23 = arith.constant 0 : index
    %20 = vector.load %arg10[%c24, %c0_23] : memref<108x1024xf32, #tpu.memory_space<vmem>>, vector<4x1024xf32>
    tpu.vector_store %arg10[%c24, %c0_23], %19 {strides = array<i32>} : memref<108x1024xf32, #tpu.memory_space<vmem>>, vector<4x1024xf32>,
    %c0_24 = arith.constant 0 : index
    %c0_25 = arith.constant 0 : index
    %c21 = arith.constant 21 : index
    %21 = vector.load %arg1[%c0_24, %c0_25, %c21] : memref<1x4x1408xf32, #tpu.memory_space<vmem>>, vector<1x4x1024xf32>
    %22 = vector.shape_cast %21 : vector<1x4x1024xf32> to vector<4x1024xf32>
    %c28 = arith.constant 28 : index
    %c0_26 = arith.constant 0 : index
    %23 = vector.load %arg10[%c28, %c0_26] : memref<108x1024xf32, #tpu.memory_space<vmem>>, vector<4x1024xf32>
    tpu.vector_store %arg10[%c28, %c0_26], %22 {strides = array<i32>} : memref<108x1024xf32, #tpu.memory_space<vmem>>, vector<4x1024xf32>,
    %c0_27 = arith.constant 0 : index
    %c0_28 = arith.constant 0 : index
    %c22 = arith.constant 22 : index
    %24 = vector.load %arg1[%c0_27, %c0_28, %c22] : memref<1x4x1408xf32, #tpu.memory_space<vmem>>, vector<1x4x1024xf32>
    %25 = vector.shape_cast %24 : vector<1x4x1024xf32> to vector<4x1024xf32>
    %c32 = arith.constant 32 : index
    %c0_29 = arith.constant 0 : index
    %26 = vector.load %arg10[%c32, %c0_29] : memref<108x1024xf32, #tpu.memory_space<vmem>>, vector<4x1024xf32>
    tpu.vector_store %arg10[%c32, %c0_29], %25 {strides = array<i32>} : memref<108x1024xf32, #tpu.memory_space<vmem>>, vector<4x1024xf32>,
    %c0_30 = arith.constant 0 : index
    %c0_31 = arith.constant 0 : index
    %c128 = arith.constant 128 : index
    %27 = vector.load %arg1[%c0_30, %c0_31, %c128] : memref<1x4x1408xf32, #tpu.memory_space<vmem>>, vector<1x4x1024xf32>
    %28 = vector.shape_cast %27 : vector<1x4x1024xf32> to vector<4x1024xf32>
    %c36 = arith.constant 36 : index
    %c0_32 = arith.constant 0 : index
    %29 = vector.load %arg10[%c36, %c0_32] : memref<108x1024xf32, #tpu.memory_space<vmem>>, vector<4x1024xf32>
    tpu.vector_store %arg10[%c36, %c0_32], %28 {strides = array<i32>} : memref<108x1024xf32, #tpu.memory_space<vmem>>, vector<4x1024xf32>,
    %c0_33 = arith.constant 0 : index
    %c0_34 = arith.constant 0 : index
    %c129 = arith.constant 129 : index
    %30 = vector.load %arg1[%c0_33, %c0_34, %c129] : memref<1x4x1408xf32, #tpu.memory_space<vmem>>, vector<1x4x1024xf32>
    %31 = vector.shape_cast %30 : vector<1x4x1024xf32> to vector<4x1024xf32>
    %c40 = arith.constant 40 : index
    %c0_35 = arith.constant 0 : index
    %32 = vector.load %arg10[%c40, %c0_35] : memref<108x1024xf32, #tpu.memory_space<vmem>>, vector<4x1024xf32>
    tpu.vector_store %arg10[%c40, %c0_35], %31 {strides = array<i32>} : memref<108x1024xf32, #tpu.memory_space<vmem>>, vector<4x1024xf32>,
    %c0_36 = arith.constant 0 : index
    %c0_37 = arith.constant 0 : index
    %c130 = arith.constant 130 : index
    %33 = vector.load %arg1[%c0_36, %c0_37, %c130] : memref<1x4x1408xf32, #tpu.memory_space<vmem>>, vector<1x4x1024xf32>
    %34 = vector.shape_cast %33 : vector<1x4x1024xf32> to vector<4x1024xf32>
    %c44 = arith.constant 44 : index
    %c0_38 = arith.constant 0 : index
    %35 = vector.load %arg10[%c44, %c0_38] : memref<108x1024xf32, #tpu.memory_space<vmem>>, vector<4x1024xf32>
    tpu.vector_store %arg10[%c44, %c0_38], %34 {strides = array<i32>} : memref<108x1024xf32, #tpu.memory_space<vmem>>, vector<4x1024xf32>,
    %c0_39 = arith.constant 0 : index
    %c0_40 = arith.constant 0 : index
    %c138 = arith.constant 138 : index
    %36 = vector.load %arg1[%c0_39, %c0_40, %c138] : memref<1x4x1408xf32, #tpu.memory_space<vmem>>, vector<1x4x1024xf32>
    %37 = vector.shape_cast %36 : vector<1x4x1024xf32> to vector<4x1024xf32>
    %c48 = arith.constant 48 : index
    %c0_41 = arith.constant 0 : index
    %38 = vector.load %arg10[%c48, %c0_41] : memref<108x1024xf32, #tpu.memory_space<vmem>>, vector<4x1024xf32>
    tpu.vector_store %arg10[%c48, %c0_41], %37 {strides = array<i32>} : memref<108x1024xf32, #tpu.memory_space<vmem>>, vector<4x1024xf32>,
    %c0_42 = arith.constant 0 : index
    %c0_43 = arith.constant 0 : index
    %c139 = arith.constant 139 : index
    %39 = vector.load %arg1[%c0_42, %c0_43, %c139] : memref<1x4x1408xf32, #tpu.memory_space<vmem>>, vector<1x4x1024xf32>
    %40 = vector.shape_cast %39 : vector<1x4x1024xf32> to vector<4x1024xf32>
    %c52 = arith.constant 52 : index
    %c0_44 = arith.constant 0 : index
    %41 = vector.load %arg10[%c52, %c0_44] : memref<108x1024xf32, #tpu.memory_space<vmem>>, vector<4x1024xf32>
    tpu.vector_store %arg10[%c52, %c0_44], %40 {strides = array<i32>} : memref<108x1024xf32, #tpu.memory_space<vmem>>, vector<4x1024xf32>,
    %c0_45 = arith.constant 0 : index
    %c0_46 = arith.constant 0 : index
    %c140 = arith.constant 140 : index
    %42 = vector.load %arg1[%c0_45, %c0_46, %c140] : memref<1x4x1408xf32, #tpu.memory_space<vmem>>, vector<1x4x1024xf32>
    %43 = vector.shape_cast %42 : vector<1x4x1024xf32> to vector<4x1024xf32>
    %c56 = arith.constant 56 : index
    %c0_47 = arith.constant 0 : index
    %44 = vector.load %arg10[%c56, %c0_47] : memref<108x1024xf32, #tpu.memory_space<vmem>>, vector<4x1024xf32>
    tpu.vector_store %arg10[%c56, %c0_47], %43 {strides = array<i32>} : memref<108x1024xf32, #tpu.memory_space<vmem>>, vector<4x1024xf32>,
    %c0_48 = arith.constant 0 : index
    %c0_49 = arith.constant 0 : index
    %c148 = arith.constant 148 : index
    %45 = vector.load %arg1[%c0_48, %c0_49, %c148] : memref<1x4x1408xf32, #tpu.memory_space<vmem>>, vector<1x4x1024xf32>
    %46 = vector.shape_cast %45 : vector<1x4x1024xf32> to vector<4x1024xf32>
    %c60 = arith.constant 60 : index
    %c0_50 = arith.constant 0 : index
    %47 = vector.load %arg10[%c60, %c0_50] : memref<108x1024xf32, #tpu.memory_space<vmem>>, vector<4x1024xf32>
    tpu.vector_store %arg10[%c60, %c0_50], %46 {strides = array<i32>} : memref<108x1024xf32, #tpu.memory_space<vmem>>, vector<4x1024xf32>,
    %c0_51 = arith.constant 0 : index
    %c0_52 = arith.constant 0 : index
    %c149 = arith.constant 149 : index
    %48 = vector.load %arg1[%c0_51, %c0_52, %c149] : memref<1x4x1408xf32, #tpu.memory_space<vmem>>, vector<1x4x1024xf32>
    %49 = vector.shape_cast %48 : vector<1x4x1024xf32> to vector<4x1024xf32>
    %c64 = arith.constant 64 : index
    %c0_53 = arith.constant 0 : index
    %50 = vector.load %arg10[%c64, %c0_53] : memref<108x1024xf32, #tpu.memory_space<vmem>>, vector<4x1024xf32>
    tpu.vector_store %arg10[%c64, %c0_53], %49 {strides = array<i32>} : memref<108x1024xf32, #tpu.memory_space<vmem>>, vector<4x1024xf32>,
    %c0_54 = arith.constant 0 : index
    %c0_55 = arith.constant 0 : index
    %c150 = arith.constant 150 : index
    %51 = vector.load %arg1[%c0_54, %c0_55, %c150] : memref<1x4x1408xf32, #tpu.memory_space<vmem>>, vector<1x4x1024xf32>
    %52 = vector.shape_cast %51 : vector<1x4x1024xf32> to vector<4x1024xf32>
    %c68 = arith.constant 68 : index
    %c0_56 = arith.constant 0 : index
    %53 = vector.load %arg10[%c68, %c0_56] : memref<108x1024xf32, #tpu.memory_space<vmem>>, vector<4x1024xf32>
    tpu.vector_store %arg10[%c68, %c0_56], %52 {strides = array<i32>} : memref<108x1024xf32, #tpu.memory_space<vmem>>, vector<4x1024xf32>,
    %c0_57 = arith.constant 0 : index
    %c0_58 = arith.constant 0 : index
    %c256 = arith.constant 256 : index
    %54 = vector.load %arg1[%c0_57, %c0_58, %c256] : memref<1x4x1408xf32, #tpu.memory_space<vmem>>, vector<1x4x1024xf32>
    %55 = vector.shape_cast %54 : vector<1x4x1024xf32> to vector<4x1024xf32>
    %c72 = arith.constant 72 : index
    %c0_59 = arith.constant 0 : index
    %56 = vector.load %arg10[%c72, %c0_59] : memref<108x1024xf32, #tpu.memory_space<vmem>>, vector<4x1024xf32>
    tpu.vector_store %arg10[%c72, %c0_59], %55 {strides = array<i32>} : memref<108x1024xf32, #tpu.memory_space<vmem>>, vector<4x1024xf32>,
    %c0_60 = arith.constant 0 : index
    %c0_61 = arith.constant 0 : index
    %c257 = arith.constant 257 : index
    %57 = vector.load %arg1[%c0_60, %c0_61, %c257] : memref<1x4x1408xf32, #tpu.memory_space<vmem>>, vector<1x4x1024xf32>
    %58 = vector.shape_cast %57 : vector<1x4x1024xf32> to vector<4x1024xf32>
    %c76 = arith.constant 76 : index
    %c0_62 = arith.constant 0 : index
    %59 = vector.load %arg10[%c76, %c0_62] : memref<108x1024xf32, #tpu.memory_space<vmem>>, vector<4x1024xf32>
    tpu.vector_store %arg10[%c76, %c0_62], %58 {strides = array<i32>} : memref<108x1024xf32, #tpu.memory_space<vmem>>, vector<4x1024xf32>,
    %c0_63 = arith.constant 0 : index
    %c0_64 = arith.constant 0 : index
    %c258 = arith.constant 258 : index
    %60 = vector.load %arg1[%c0_63, %c0_64, %c258] : memref<1x4x1408xf32, #tpu.memory_space<vmem>>, vector<1x4x1024xf32>
    %61 = vector.shape_cast %60 : vector<1x4x1024xf32> to vector<4x1024xf32>
    %c80 = arith.constant 80 : index
    %c0_65 = arith.constant 0 : index
    %62 = vector.load %arg10[%c80, %c0_65] : memref<108x1024xf32, #tpu.memory_space<vmem>>, vector<4x1024xf32>
    tpu.vector_store %arg10[%c80, %c0_65], %61 {strides = array<i32>} : memref<108x1024xf32, #tpu.memory_space<vmem>>, vector<4x1024xf32>,
    %c0_66 = arith.constant 0 : index
    %c0_67 = arith.constant 0 : index
    %c266 = arith.constant 266 : index
    %63 = vector.load %arg1[%c0_66, %c0_67, %c266] : memref<1x4x1408xf32, #tpu.memory_space<vmem>>, vector<1x4x1024xf32>
    %64 = vector.shape_cast %63 : vector<1x4x1024xf32> to vector<4x1024xf32>
    %c84 = arith.constant 84 : index
    %c0_68 = arith.constant 0 : index
    %65 = vector.load %arg10[%c84, %c0_68] : memref<108x1024xf32, #tpu.memory_space<vmem>>, vector<4x1024xf32>
    tpu.vector_store %arg10[%c84, %c0_68], %64 {strides = array<i32>} : memref<108x1024xf32, #tpu.memory_space<vmem>>, vector<4x1024xf32>,
    %c0_69 = arith.constant 0 : index
    %c0_70 = arith.constant 0 : index
    %c267 = arith.constant 267 : index
    %66 = vector.load %arg1[%c0_69, %c0_70, %c267] : memref<1x4x1408xf32, #tpu.memory_space<vmem>>, vector<1x4x1024xf32>
    %67 = vector.shape_cast %66 : vector<1x4x1024xf32> to vector<4x1024xf32>
    %c88 = arith.constant 88 : index
    %c0_71 = arith.constant 0 : index
    %68 = vector.load %arg10[%c88, %c0_71] : memref<108x1024xf32, #tpu.memory_space<vmem>>, vector<4x1024xf32>
    tpu.vector_store %arg10[%c88, %c0_71], %67 {strides = array<i32>} : memref<108x1024xf32, #tpu.memory_space<vmem>>, vector<4x1024xf32>,
    %c0_72 = arith.constant 0 : index
    %c0_73 = arith.constant 0 : index
    %c268 = arith.constant 268 : index
    %69 = vector.load %arg1[%c0_72, %c0_73, %c268] : memref<1x4x1408xf32, #tpu.memory_space<vmem>>, vector<1x4x1024xf32>
    %70 = vector.shape_cast %69 : vector<1x4x1024xf32> to vector<4x1024xf32>
    %c92 = arith.constant 92 : index
    %c0_74 = arith.constant 0 : index
    %71 = vector.load %arg10[%c92, %c0_74] : memref<108x1024xf32, #tpu.memory_space<vmem>>, vector<4x1024xf32>
    tpu.vector_store %arg10[%c92, %c0_74], %70 {strides = array<i32>} : memref<108x1024xf32, #tpu.memory_space<vmem>>, vector<4x1024xf32>,
    %c0_75 = arith.constant 0 : index
    %c0_76 = arith.constant 0 : index
    %c276 = arith.constant 276 : index
    %72 = vector.load %arg1[%c0_75, %c0_76, %c276] : memref<1x4x1408xf32, #tpu.memory_space<vmem>>, vector<1x4x1024xf32>
    %73 = vector.shape_cast %72 : vector<1x4x1024xf32> to vector<4x1024xf32>
    %c96 = arith.constant 96 : index
    %c0_77 = arith.constant 0 : index
    %74 = vector.load %arg10[%c96, %c0_77] : memref<108x1024xf32, #tpu.memory_space<vmem>>, vector<4x1024xf32>
    tpu.vector_store %arg10[%c96, %c0_77], %73 {strides = array<i32>} : memref<108x1024xf32, #tpu.memory_space<vmem>>, vector<4x1024xf32>,
    %c0_78 = arith.constant 0 : index
    %c0_79 = arith.constant 0 : index
    %c277 = arith.constant 277 : index
    %75 = vector.load %arg1[%c0_78, %c0_79, %c277] : memref<1x4x1408xf32, #tpu.memory_space<vmem>>, vector<1x4x1024xf32>
    %76 = vector.shape_cast %75 : vector<1x4x1024xf32> to vector<4x1024xf32>
    %c100 = arith.constant 100 : index
    %c0_80 = arith.constant 0 : index
    %77 = vector.load %arg10[%c100, %c0_80] : memref<108x1024xf32, #tpu.memory_space<vmem>>, vector<4x1024xf32>
    tpu.vector_store %arg10[%c100, %c0_80], %76 {strides = array<i32>} : memref<108x1024xf32, #tpu.memory_space<vmem>>, vector<4x1024xf32>,
    %c0_81 = arith.constant 0 : index
    %c0_82 = arith.constant 0 : index
    %c278 = arith.constant 278 : index
    %78 = vector.load %arg1[%c0_81, %c0_82, %c278] : memref<1x4x1408xf32, #tpu.memory_space<vmem>>, vector<1x4x1024xf32>
    %79 = vector.shape_cast %78 : vector<1x4x1024xf32> to vector<4x1024xf32>
    %c104 = arith.constant 104 : index
    %c0_83 = arith.constant 0 : index
    %80 = vector.load %arg10[%c104, %c0_83] : memref<108x1024xf32, #tpu.memory_space<vmem>>, vector<4x1024xf32>
    tpu.vector_store %arg10[%c104, %c0_83], %79 {strides = array<i32>} : memref<108x1024xf32, #tpu.memory_space<vmem>>, vector<4x1024xf32>,
    %c0_84 = arith.constant 0 : index
    %c0_85 = arith.constant 0 : index
    %81 = vector.load %arg2[%c0_84, %c0_85] : memref<4x108xbf16, #tpu.memory_space<vmem>>, vector<4x108xbf16>
    %c0_86 = arith.constant 0 : index
    %c0_87 = arith.constant 0 : index
    %82 = vector.load %arg10[%c0_86, %c0_87] : memref<108x1024xf32, #tpu.memory_space<vmem>>, vector<108x1024xf32>
    %83 = arith.truncf %82 : vector<108x1024xf32> to vector<108x1024xbf16>
    %cst = arith.constant dense<0.000000e+00> : vector<4x1024xf32>
    %84 = tpu.matmul %81, %83, %cst {dimension_numbers = #tpu.dot_dimension_numbers<[1], [0], [0], [1], [0, 0, 1, 1], [], []>} : vector<4x108xbf16>, vector<108x1024xbf16>, vector<4x1024xf32> -> vector<4x1024xf32>
    %cst_88 = arith.constant 0.000000e+00 : f32
    %85 = vector.broadcast %cst_88 : f32 to vector<4x1024xf32>
    %86 = arith.maximumf %84, %85 : vector<4x1024xf32>
    %cst_89 = arith.constant 0.000000e+00 : f32
    %87 = vector.broadcast %cst_89 : f32 to vector<4x1408xf32>
    %c0_90 = arith.constant 0 : index
    %c0_91 = arith.constant 0 : index
    %88 = vector.load %arg11[%c0_90, %c0_91] : memref<4x1408xf32, #tpu.memory_space<vmem>>, vector<4x1408xf32>
    tpu.vector_store %arg11[%c0_90, %c0_91], %87 {strides = array<i32>} : memref<4x1408xf32, #tpu.memory_space<vmem>>, vector<4x1408xf32>,
    %c0_92 = arith.constant 0 : index
    %c0_93 = arith.constant 0 : index
    %89 = vector.load %arg8[%c0_92, %c0_93] : memref<1x1024xf32, #tpu.memory_space<vmem>>, vector<1x1024xf32>
    %90 = vector.broadcast %89 : vector<1x1024xf32> to vector<4x1024xf32>
    %91 = arith.mulf %86, %90 : vector<4x1024xf32>
    %c0_94 = arith.constant 0 : index
    %c139_95 = arith.constant 139 : index
    %92 = vector.load %arg11[%c0_94, %c139_95] : memref<4x1408xf32, #tpu.memory_space<vmem>>, vector<4x1024xf32>
    tpu.vector_store %arg11[%c0_94, %c139_95], %91 {strides = array<i32>} : memref<4x1408xf32, #tpu.memory_space<vmem>>, vector<4x1024xf32>,
    %c0_96 = arith.constant 0 : index
    %c0_97 = arith.constant 0 : index
    %93 = vector.load %arg11[%c0_96, %c0_97] : memref<4x1408xf32, #tpu.memory_space<vmem>>, vector<4x1024xf32>
    %c0_98 = arith.constant 0 : index
    %c0_99 = arith.constant 0 : index
    %94 = vector.load %arg10[%c0_98, %c0_99] : memref<108x1024xf32, #tpu.memory_space<vmem>>, vector<4x1024xf32>
    tpu.vector_store %arg10[%c0_98, %c0_99], %93 {strides = array<i32>} : memref<108x1024xf32, #tpu.memory_space<vmem>>, vector<4x1024xf32>,
    %c0_100 = arith.constant 0 : index
    %c1_101 = arith.constant 1 : index
    %95 = vector.load %arg11[%c0_100, %c1_101] : memref<4x1408xf32, #tpu.memory_space<vmem>>, vector<4x1024xf32>
    %c4_102 = arith.constant 4 : index
    %c0_103 = arith.constant 0 : index
    %96 = vector.load %arg10[%c4_102, %c0_103] : memref<108x1024xf32, #tpu.memory_space<vmem>>, vector<4x1024xf32>
    tpu.vector_store %arg10[%c4_102, %c0_103], %95 {strides = array<i32>} : memref<108x1024xf32, #tpu.memory_space<vmem>>, vector<4x1024xf32>,
    %c0_104 = arith.constant 0 : index
    %c2_105 = arith.constant 2 : index
    %97 = vector.load %arg11[%c0_104, %c2_105] : memref<4x1408xf32, #tpu.memory_space<vmem>>, vector<4x1024xf32>
    %c8_106 = arith.constant 8 : index
    %c0_107 = arith.constant 0 : index
    %98 = vector.load %arg10[%c8_106, %c0_107] : memref<108x1024xf32, #tpu.memory_space<vmem>>, vector<4x1024xf32>
    tpu.vector_store %arg10[%c8_106, %c0_107], %97 {strides = array<i32>} : memref<108x1024xf32, #tpu.memory_space<vmem>>, vector<4x1024xf32>,
    %c0_108 = arith.constant 0 : index
    %c10_109 = arith.constant 10 : index
    %99 = vector.load %arg11[%c0_108, %c10_109] : memref<4x1408xf32, #tpu.memory_space<vmem>>, vector<4x1024xf32>
    %c12_110 = arith.constant 12 : index
    %c0_111 = arith.constant 0 : index
    %100 = vector.load %arg10[%c12_110, %c0_111] : memref<108x1024xf32, #tpu.memory_space<vmem>>, vector<4x1024xf32>
    tpu.vector_store %arg10[%c12_110, %c0_111], %99 {strides = array<i32>} : memref<108x1024xf32, #tpu.memory_space<vmem>>, vector<4x1024xf32>,
    %c0_112 = arith.constant 0 : index
    %c11_113 = arith.constant 11 : index
    %101 = vector.load %arg11[%c0_112, %c11_113] : memref<4x1408xf32, #tpu.memory_space<vmem>>, vector<4x1024xf32>
    %c16_114 = arith.constant 16 : index
    %c0_115 = arith.constant 0 : index
    %102 = vector.load %arg10[%c16_114, %c0_115] : memref<108x1024xf32, #tpu.memory_space<vmem>>, vector<4x1024xf32>
    tpu.vector_store %arg10[%c16_114, %c0_115], %101 {strides = array<i32>} : memref<108x1024xf32, #tpu.memory_space<vmem>>, vector<4x1024xf32>,
    %c0_116 = arith.constant 0 : index
    %c12_117 = arith.constant 12 : index
    %103 = vector.load %arg11[%c0_116, %c12_117] : memref<4x1408xf32, #tpu.memory_space<vmem>>, vector<4x1024xf32>
    %c20_118 = arith.constant 20 : index
    %c0_119 = arith.constant 0 : index
    %104 = vector.load %arg10[%c20_118, %c0_119] : memref<108x1024xf32, #tpu.memory_space<vmem>>, vector<4x1024xf32>
    tpu.vector_store %arg10[%c20_118, %c0_119], %103 {strides = array<i32>} : memref<108x1024xf32, #tpu.memory_space<vmem>>, vector<4x1024xf32>,
    %c0_120 = arith.constant 0 : index
    %c20_121 = arith.constant 20 : index
    %105 = vector.load %arg11[%c0_120, %c20_121] : memref<4x1408xf32, #tpu.memory_space<vmem>>, vector<4x1024xf32>
    %c24_122 = arith.constant 24 : index
    %c0_123 = arith.constant 0 : index
    %106 = vector.load %arg10[%c24_122, %c0_123] : memref<108x1024xf32, #tpu.memory_space<vmem>>, vector<4x1024xf32>
    tpu.vector_store %arg10[%c24_122, %c0_123], %105 {strides = array<i32>} : memref<108x1024xf32, #tpu.memory_space<vmem>>, vector<4x1024xf32>,
    %c0_124 = arith.constant 0 : index
    %c21_125 = arith.constant 21 : index
    %107 = vector.load %arg11[%c0_124, %c21_125] : memref<4x1408xf32, #tpu.memory_space<vmem>>, vector<4x1024xf32>
    %c28_126 = arith.constant 28 : index
    %c0_127 = arith.constant 0 : index
    %108 = vector.load %arg10[%c28_126, %c0_127] : memref<108x1024xf32, #tpu.memory_space<vmem>>, vector<4x1024xf32>
    tpu.vector_store %arg10[%c28_126, %c0_127], %107 {strides = array<i32>} : memref<108x1024xf32, #tpu.memory_space<vmem>>, vector<4x1024xf32>,
    %c0_128 = arith.constant 0 : index
    %c22_129 = arith.constant 22 : index
    %109 = vector.load %arg11[%c0_128, %c22_129] : memref<4x1408xf32, #tpu.memory_space<vmem>>, vector<4x1024xf32>
    %c32_130 = arith.constant 32 : index
    %c0_131 = arith.constant 0 : index
    %110 = vector.load %arg10[%c32_130, %c0_131] : memref<108x1024xf32, #tpu.memory_space<vmem>>, vector<4x1024xf32>
    tpu.vector_store %arg10[%c32_130, %c0_131], %109 {strides = array<i32>} : memref<108x1024xf32, #tpu.memory_space<vmem>>, vector<4x1024xf32>,
    %c0_132 = arith.constant 0 : index
    %c128_133 = arith.constant 128 : index
    %111 = vector.load %arg11[%c0_132, %c128_133] : memref<4x1408xf32, #tpu.memory_space<vmem>>, vector<4x1024xf32>
    %c36_134 = arith.constant 36 : index
    %c0_135 = arith.constant 0 : index
    %112 = vector.load %arg10[%c36_134, %c0_135] : memref<108x1024xf32, #tpu.memory_space<vmem>>, vector<4x1024xf32>
    tpu.vector_store %arg10[%c36_134, %c0_135], %111 {strides = array<i32>} : memref<108x1024xf32, #tpu.memory_space<vmem>>, vector<4x1024xf32>,
    %c0_136 = arith.constant 0 : index
    %c129_137 = arith.constant 129 : index
    %113 = vector.load %arg11[%c0_136, %c129_137] : memref<4x1408xf32, #tpu.memory_space<vmem>>, vector<4x1024xf32>
    %c40_138 = arith.constant 40 : index
    %c0_139 = arith.constant 0 : index
    %114 = vector.load %arg10[%c40_138, %c0_139] : memref<108x1024xf32, #tpu.memory_space<vmem>>, vector<4x1024xf32>
    tpu.vector_store %arg10[%c40_138, %c0_139], %113 {strides = array<i32>} : memref<108x1024xf32, #tpu.memory_space<vmem>>, vector<4x1024xf32>,
    %c0_140 = arith.constant 0 : index
    %c130_141 = arith.constant 130 : index
    %115 = vector.load %arg11[%c0_140, %c130_141] : memref<4x1408xf32, #tpu.memory_space<vmem>>, vector<4x1024xf32>
    %c44_142 = arith.constant 44 : index
    %c0_143 = arith.constant 0 : index
    %116 = vector.load %arg10[%c44_142, %c0_143] : memref<108x1024xf32, #tpu.memory_space<vmem>>, vector<4x1024xf32>
    tpu.vector_store %arg10[%c44_142, %c0_143], %115 {strides = array<i32>} : memref<108x1024xf32, #tpu.memory_space<vmem>>, vector<4x1024xf32>,
    %c0_144 = arith.constant 0 : index
    %c138_145 = arith.constant 138 : index
    %117 = vector.load %arg11[%c0_144, %c138_145] : memref<4x1408xf32, #tpu.memory_space<vmem>>, vector<4x1024xf32>
    %c48_146 = arith.constant 48 : index
    %c0_147 = arith.constant 0 : index
    %118 = vector.load %arg10[%c48_146, %c0_147] : memref<108x1024xf32, #tpu.memory_space<vmem>>, vector<4x1024xf32>
    tpu.vector_store %arg10[%c48_146, %c0_147], %117 {strides = array<i32>} : memref<108x1024xf32, #tpu.memory_space<vmem>>, vector<4x1024xf32>,
    %c0_148 = arith.constant 0 : index
    %c139_149 = arith.constant 139 : index
    %119 = vector.load %arg11[%c0_148, %c139_149] : memref<4x1408xf32, #tpu.memory_space<vmem>>, vector<4x1024xf32>
    %c52_150 = arith.constant 52 : index
    %c0_151 = arith.constant 0 : index
    %120 = vector.load %arg10[%c52_150, %c0_151] : memref<108x1024xf32, #tpu.memory_space<vmem>>, vector<4x1024xf32>
    tpu.vector_store %arg10[%c52_150, %c0_151], %119 {strides = array<i32>} : memref<108x1024xf32, #tpu.memory_space<vmem>>, vector<4x1024xf32>,
    %c0_152 = arith.constant 0 : index
    %c140_153 = arith.constant 140 : index
    %121 = vector.load %arg11[%c0_152, %c140_153] : memref<4x1408xf32, #tpu.memory_space<vmem>>, vector<4x1024xf32>
    %c56_154 = arith.constant 56 : index
    %c0_155 = arith.constant 0 : index
    %122 = vector.load %arg10[%c56_154, %c0_155] : memref<108x1024xf32, #tpu.memory_space<vmem>>, vector<4x1024xf32>
    tpu.vector_store %arg10[%c56_154, %c0_155], %121 {strides = array<i32>} : memref<108x1024xf32, #tpu.memory_space<vmem>>, vector<4x1024xf32>,
    %c0_156 = arith.constant 0 : index
    %c148_157 = arith.constant 148 : index
    %123 = vector.load %arg11[%c0_156, %c148_157] : memref<4x1408xf32, #tpu.memory_space<vmem>>, vector<4x1024xf32>
    %c60_158 = arith.constant 60 : index
    %c0_159 = arith.constant 0 : index
    %124 = vector.load %arg10[%c60_158, %c0_159] : memref<108x1024xf32, #tpu.memory_space<vmem>>, vector<4x1024xf32>
    tpu.vector_store %arg10[%c60_158, %c0_159], %123 {strides = array<i32>} : memref<108x1024xf32, #tpu.memory_space<vmem>>, vector<4x1024xf32>,
    %c0_160 = arith.constant 0 : index
    %c149_161 = arith.constant 149 : index
    %125 = vector.load %arg11[%c0_160, %c149_161] : memref<4x1408xf32, #tpu.memory_space<vmem>>, vector<4x1024xf32>
    %c64_162 = arith.constant 64 : index
    %c0_163 = arith.constant 0 : index
    %126 = vector.load %arg10[%c64_162, %c0_163] : memref<108x1024xf32, #tpu.memory_space<vmem>>, vector<4x1024xf32>
    tpu.vector_store %arg10[%c64_162, %c0_163], %125 {strides = array<i32>} : memref<108x1024xf32, #tpu.memory_space<vmem>>, vector<4x1024xf32>,
    %c0_164 = arith.constant 0 : index
    %c150_165 = arith.constant 150 : index
    %127 = vector.load %arg11[%c0_164, %c150_165] : memref<4x1408xf32, #tpu.memory_space<vmem>>, vector<4x1024xf32>
    %c68_166 = arith.constant 68 : index
    %c0_167 = arith.constant 0 : index
    %128 = vector.load %arg10[%c68_166, %c0_167] : memref<108x1024xf32, #tpu.memory_space<vmem>>, vector<4x1024xf32>
    tpu.vector_store %arg10[%c68_166, %c0_167], %127 {strides = array<i32>} : memref<108x1024xf32, #tpu.memory_space<vmem>>, vector<4x1024xf32>,
    %c0_168 = arith.constant 0 : index
    %c256_169 = arith.constant 256 : index
    %129 = vector.load %arg11[%c0_168, %c256_169] : memref<4x1408xf32, #tpu.memory_space<vmem>>, vector<4x1024xf32>
    %c72_170 = arith.constant 72 : index
    %c0_171 = arith.constant 0 : index
    %130 = vector.load %arg10[%c72_170, %c0_171] : memref<108x1024xf32, #tpu.memory_space<vmem>>, vector<4x1024xf32>
    tpu.vector_store %arg10[%c72_170, %c0_171], %129 {strides = array<i32>} : memref<108x1024xf32, #tpu.memory_space<vmem>>, vector<4x1024xf32>,
    %c0_172 = arith.constant 0 : index
    %c257_173 = arith.constant 257 : index
    %131 = vector.load %arg11[%c0_172, %c257_173] : memref<4x1408xf32, #tpu.memory_space<vmem>>, vector<4x1024xf32>
    %c76_174 = arith.constant 76 : index
    %c0_175 = arith.constant 0 : index
    %132 = vector.load %arg10[%c76_174, %c0_175] : memref<108x1024xf32, #tpu.memory_space<vmem>>, vector<4x1024xf32>
    tpu.vector_store %arg10[%c76_174, %c0_175], %131 {strides = array<i32>} : memref<108x1024xf32, #tpu.memory_space<vmem>>, vector<4x1024xf32>,
    %c0_176 = arith.constant 0 : index
    %c258_177 = arith.constant 258 : index
    %133 = vector.load %arg11[%c0_176, %c258_177] : memref<4x1408xf32, #tpu.memory_space<vmem>>, vector<4x1024xf32>
    %c80_178 = arith.constant 80 : index
    %c0_179 = arith.constant 0 : index
    %134 = vector.load %arg10[%c80_178, %c0_179] : memref<108x1024xf32, #tpu.memory_space<vmem>>, vector<4x1024xf32>
    tpu.vector_store %arg10[%c80_178, %c0_179], %133 {strides = array<i32>} : memref<108x1024xf32, #tpu.memory_space<vmem>>, vector<4x1024xf32>,
    %c0_180 = arith.constant 0 : index
    %c266_181 = arith.constant 266 : index
    %135 = vector.load %arg11[%c0_180, %c266_181] : memref<4x1408xf32, #tpu.memory_space<vmem>>, vector<4x1024xf32>
    %c84_182 = arith.constant 84 : index
    %c0_183 = arith.constant 0 : index
    %136 = vector.load %arg10[%c84_182, %c0_183] : memref<108x1024xf32, #tpu.memory_space<vmem>>, vector<4x1024xf32>
    tpu.vector_store %arg10[%c84_182, %c0_183], %135 {strides = array<i32>} : memref<108x1024xf32, #tpu.memory_space<vmem>>, vector<4x1024xf32>,
    %c0_184 = arith.constant 0 : index
    %c267_185 = arith.constant 267 : index
    %137 = vector.load %arg11[%c0_184, %c267_185] : memref<4x1408xf32, #tpu.memory_space<vmem>>, vector<4x1024xf32>
    %c88_186 = arith.constant 88 : index
    %c0_187 = arith.constant 0 : index
    %138 = vector.load %arg10[%c88_186, %c0_187] : memref<108x1024xf32, #tpu.memory_space<vmem>>, vector<4x1024xf32>
    tpu.vector_store %arg10[%c88_186, %c0_187], %137 {strides = array<i32>} : memref<108x1024xf32, #tpu.memory_space<vmem>>, vector<4x1024xf32>,
    %c0_188 = arith.constant 0 : index
    %c268_189 = arith.constant 268 : index
    %139 = vector.load %arg11[%c0_188, %c268_189] : memref<4x1408xf32, #tpu.memory_space<vmem>>, vector<4x1024xf32>
    %c92_190 = arith.constant 92 : index
    %c0_191 = arith.constant 0 : index
    %140 = vector.load %arg10[%c92_190, %c0_191] : memref<108x1024xf32, #tpu.memory_space<vmem>>, vector<4x1024xf32>
    tpu.vector_store %arg10[%c92_190, %c0_191], %139 {strides = array<i32>} : memref<108x1024xf32, #tpu.memory_space<vmem>>, vector<4x1024xf32>,
    %c0_192 = arith.constant 0 : index
    %c276_193 = arith.constant 276 : index
    %141 = vector.load %arg11[%c0_192, %c276_193] : memref<4x1408xf32, #tpu.memory_space<vmem>>, vector<4x1024xf32>
    %c96_194 = arith.constant 96 : index
    %c0_195 = arith.constant 0 : index
    %142 = vector.load %arg10[%c96_194, %c0_195] : memref<108x1024xf32, #tpu.memory_space<vmem>>, vector<4x1024xf32>
    tpu.vector_store %arg10[%c96_194, %c0_195], %141 {strides = array<i32>} : memref<108x1024xf32, #tpu.memory_space<vmem>>, vector<4x1024xf32>,
    %c0_196 = arith.constant 0 : index
    %c277_197 = arith.constant 277 : index
    %143 = vector.load %arg11[%c0_196, %c277_197] : memref<4x1408xf32, #tpu.memory_space<vmem>>, vector<4x1024xf32>
    %c100_198 = arith.constant 100 : index
    %c0_199 = arith.constant 0 : index
    %144 = vector.load %arg10[%c100_198, %c0_199] : memref<108x1024xf32, #tpu.memory_space<vmem>>, vector<4x1024xf32>
    tpu.vector_store %arg10[%c100_198, %c0_199], %143 {strides = array<i32>} : memref<108x1024xf32, #tpu.memory_space<vmem>>, vector<4x1024xf32>,
    %c0_200 = arith.constant 0 : index
    %c278_201 = arith.constant 278 : index
    %145 = vector.load %arg11[%c0_200, %c278_201] : memref<4x1408xf32, #tpu.memory_space<vmem>>, vector<4x1024xf32>
    %c104_202 = arith.constant 104 : index
    %c0_203 = arith.constant 0 : index
    %146 = vector.load %arg10[%c104_202, %c0_203] : memref<108x1024xf32, #tpu.memory_space<vmem>>, vector<4x1024xf32>
    tpu.vector_store %arg10[%c104_202, %c0_203], %145 {strides = array<i32>} : memref<108x1024xf32, #tpu.memory_space<vmem>>, vector<4x1024xf32>,
    %c0_204 = arith.constant 0 : index
    %c0_205 = arith.constant 0 : index
    %147 = vector.load %arg3[%c0_204, %c0_205] : memref<4x108xbf16, #tpu.memory_space<vmem>>, vector<4x108xbf16>
    %c0_206 = arith.constant 0 : index
    %c0_207 = arith.constant 0 : index
    %148 = vector.load %arg10[%c0_206, %c0_207] : memref<108x1024xf32, #tpu.memory_space<vmem>>, vector<108x1024xf32>
    %149 = arith.truncf %148 : vector<108x1024xf32> to vector<108x1024xbf16>
    %cst_208 = arith.constant dense<0.000000e+00> : vector<4x1024xf32>
    %150 = tpu.matmul %147, %149, %cst_208 {dimension_numbers = #tpu.dot_dimension_numbers<[1], [0], [0], [1], [0, 0, 1, 1], [], []>} : vector<4x108xbf16>, vector<108x1024xbf16>, vector<4x1024xf32> -> vector<4x1024xf32>
    %c0_209 = arith.constant 0 : index
    %c0_210 = arith.constant 0 : index
    %151 = vector.load %arg8[%c0_209, %c0_210] : memref<1x1024xf32, #tpu.memory_space<vmem>>, vector<1x1024xf32>
    %152 = vector.broadcast %151 : vector<1x1024xf32> to vector<4x1024xf32>
    %153 = arith.mulf %150, %152 : vector<4x1024xf32>
    %cst_211 = arith.constant dense<0.000000e+00> : vector<4xf32>
    %154 = vector.multi_reduction <add>, %153, %cst_211 [1] : vector<4x1024xf32> to vector<4xf32>
    %155 = vector.shape_cast %154 : vector<4xf32> to vector<4x1xf32>
    %cst_212 = arith.constant 0.001953125 : f32
    %156 = vector.broadcast %cst_212 : f32 to vector<4x1xf32>
    %157 = arith.mulf %155, %156 : vector<4x1xf32>
    %c0_213 = arith.constant 0 : index
    %c0_214 = arith.constant 0 : index
    %158 = vector.load %arg4[%c0_213, %c0_214] : memref<4x1xf32, #tpu.memory_space<vmem>>, vector<4x1xf32>
    %159 = arith.mulf %158, %157 : vector<4x1xf32>
    %cst_215 = arith.constant dense<0.000000e+00> : vector<1xf32>
    %160 = vector.multi_reduction <add>, %159, %cst_215 [0] : vector<4x1xf32> to vector<1xf32>
    %161 = vector.shape_cast %160 : vector<1xf32> to vector<1x1xf32>
    %c0_216 = arith.constant 0 : index
    %c0_217 = arith.constant 0 : index
    %162 = vector.load %arg5[%c0_216, %c0_217] : memref<1x1xf32, #tpu.memory_space<vmem>>, vector<1x1xf32>
    %163 = arith.addf %161, %162 : vector<1x1xf32>
    %cst_218 = arith.constant 0.000000e+00 : f32
    %164 = vector.broadcast %cst_218 : f32 to vector<1x1xf32>
    %165 = arith.maximumf %163, %164 : vector<1x1xf32>
    %c0_219 = arith.constant 0 : index
    %c0_220 = arith.constant 0 : index
    %166 = vector.load %arg6[%c0_219, %c0_220] : memref<4x1xf32, #tpu.memory_space<vmem>>, vector<4x1xf32>
    %167 = vector.broadcast %165 : vector<1x1xf32> to vector<4x1xf32>
    %168 = arith.mulf %166, %167 : vector<4x1xf32>
    %cst_221 = arith.constant dense<0.000000e+00> : vector<4xf32>
    %169 = vector.multi_reduction <add>, %168, %cst_221 [1] : vector<4x1xf32> to vector<4xf32>
    %170 = vector.shape_cast %169 : vector<4xf32> to vector<4x1xf32>
    %c0_222 = arith.constant 0 : index
    %c0_223 = arith.constant 0 : index
    %171 = vector.load %arg7[%c0_222, %c0_223] : memref<4x1xf32, #tpu.memory_space<vmem>>, vector<4x1xf32>
    %172 = arith.addf %170, %171 : vector<4x1xf32>
    %173 = arith.negf %172 : vector<4x1xf32>
    %174 = math.exp %173 : vector<4x1xf32>
    %cst_224 = arith.constant 1.000000e+00 : f32
    %175 = vector.broadcast %cst_224 : f32 to vector<4x1xf32>
    %176 = arith.addf %175, %174 : vector<4x1xf32>
    %177 = arith.divf %175, %176 : vector<4x1xf32>
    %c0_225 = arith.constant 0 : index
    %c0_226 = arith.constant 0 : index
    %c139_227 = arith.constant 139 : index
    %178 = vector.load %arg1[%c0_225, %c0_226, %c139_227] : memref<1x4x1408xf32, #tpu.memory_space<vmem>>, vector<1x4x1024xf32>
    %179 = vector.shape_cast %178 : vector<1x4x1024xf32> to vector<4x1024xf32>
    %180 = vector.broadcast %177 : vector<4x1xf32> to vector<4x1024xf32>
    %181 = arith.mulf %150, %180 : vector<4x1024xf32>
    %182 = arith.addf %181, %179 : vector<4x1024xf32>
    %cst_228 = arith.constant 0.000000e+00 : f32
    %183 = vector.broadcast %cst_228 : f32 to vector<4x1024xf32>
    %184 = arith.maximumf %182, %183 : vector<4x1024xf32>
    %c0_229 = arith.constant 0 : index
    %c0_230 = arith.constant 0 : index
    %c0_231 = arith.constant 0 : index
    %185 = vector.load %arg9[%c0_229, %c0_230, %c0_231] : memref<1x4x1024xf32, #tpu.memory_space<vmem>>, vector<1x4x1024xf32>
    %186 = vector.shape_cast %185 : vector<1x4x1024xf32> to vector<4x1024xf32>
    %187 = vector.shape_cast %184 : vector<4x1024xf32> to vector<1x4x1024xf32>
    tpu.vector_store %arg9[%c0_229, %c0_230, %c0_231], %187 {strides = array<i32>} : memref<1x4x1024xf32, #tpu.memory_space<vmem>>, vector<1x4x1024xf32>,
    return
  }
  func.func @transform_0(%arg0: i32) -> (i32, i32, i32) {
    %c0_i32 = arith.constant 0 : i32
    %c0_i32_0 = arith.constant 0 : i32
    %c0_i32_1 = arith.constant 0 : i32
    return %arg0, %c0_i32, %c0_i32_0 : i32, i32, i32
  }
  func.func @transform_1(%arg0: i32) -> (i32, i32) {
    %c0_i32 = arith.constant 0 : i32
    %c0_i32_0 = arith.constant 0 : i32
    %c0_i32_1 = arith.constant 0 : i32
    return %c0_i32, %c0_i32_0 : i32, i32
  }
  func.func @transform_2(%arg0: i32) -> (i32, i32) {
    %c0_i32 = arith.constant 0 : i32
    %c0_i32_0 = arith.constant 0 : i32
    %c0_i32_1 = arith.constant 0 : i32
    return %c0_i32, %c0_i32_0 : i32, i32
  }
  func.func @transform_3(%arg0: i32) -> (i32, i32) {
    %c0_i32 = arith.constant 0 : i32
    %c0_i32_0 = arith.constant 0 : i32
    %c0_i32_1 = arith.constant 0 : i32
    return %c0_i32, %c0_i32_0 : i32, i32
  }
  func.func @transform_4(%arg0: i32) -> (i32, i32) {
    %c0_i32 = arith.constant 0 : i32
    %c0_i32_0 = arith.constant 0 : i32
    %c0_i32_1 = arith.constant 0 : i32
    return %c0_i32, %c0_i32_0 : i32, i32
  }
  func.func @transform_5(%arg0: i32) -> (i32, i32) {
    %c0_i32 = arith.constant 0 : i32
    %c0_i32_0 = arith.constant 0 : i32
    %c0_i32_1 = arith.constant 0 : i32
    return %c0_i32, %c0_i32_0 : i32, i32
  }
  func.func @transform_6(%arg0: i32) -> (i32, i32) {
    %c0_i32 = arith.constant 0 : i32
    %c0_i32_0 = arith.constant 0 : i32
    %c0_i32_1 = arith.constant 0 : i32
    return %c0_i32, %c0_i32_0 : i32, i32
  }
  func.func @transform_7(%arg0: i32) -> (i32, i32) {
    %c0_i32 = arith.constant 0 : i32
    %c0_i32_0 = arith.constant 0 : i32
    %c0_i32_1 = arith.constant 0 : i32
    return %c0_i32, %c0_i32_0 : i32, i32
  }
  func.func @transform_8(%arg0: i32) -> (i32, i32, i32) {
    %c0_i32 = arith.constant 0 : i32
    %c0_i32_0 = arith.constant 0 : i32
    %c0_i32_1 = arith.constant 0 : i32
    return %arg0, %c0_i32, %c0_i32_0 : i32, i32, i32
  }
}

</mosaic_0001>

<bundles_post_ra>
// kernel: basic_block_forward.1
= control target key start
LH: loop header
LB: loop body
LE: loop exit
PB: predicated region body
PF: predicated region fallthrough
CT: control target
= control target key end

     0   :  { %s4447_s29 = smov 0   ;;  %s6861_s0 = inlined_call_operand.vmem [shape: f32[2,4,1408], index: 0, kind: input, shape index: {}]   ;;  %s6862_s1 = inlined_call_operand.vmem [shape: bf16[4,108], index: 1, kind: input, shape index: {}]   ;;  %s6863_s2 = inlined_call_operand.vmem [shape: bf16[4,108], index: 2, kind: input, shape index: {}]   ;;  %s6864_s3 = inlined_call_operand.vmem [shape: f32[4,1], index: 3, kind: input, shape index: {}]   ;;  %s6865_s4 = inlined_call_operand.<no memory space> [shape: f32[1,1], index: 4, kind: input, shape index: {}]   ;;  %s6866_s5 = inlined_call_operand.vmem [shape: f32[4,1], index: 5, kind: input, shape index: {}]   ;;  %s6867_s6 = inlined_call_operand.vmem [shape: f32[4,1], index: 6, kind: input, shape index: {}]   ;;  %s6868_s7 = inlined_call_operand.vmem [shape: f32[1,1024], index: 7, kind: input, shape index: {}]   ;;  %s6869_s8 = inlined_call_operand.vmem [shape: f32[2,4,1024], index: 8, kind: output, shape index: {}]  }
   0x1   :  { %v13_v0 = vstv %s6865_s4 }
   0x2   :  { %14 = vst [vmem:[#allocation4] sm:$0x1] %v13_v0 }
   0x3 LB: > { %s4253_s30 = sadd.s32 4294967295, %s4386_s29   ;;  %p4257_p0 = scmp.ge.s32.totalorder %s4386_s29, 1  ;;  %s4386_s29 = sphi %s4447_s29, %s20_s29  }
   0x4   : > { %p264_p1 = scmp.lt.s32.totalorder %s4386_s29, 3 }
   0x6   : > { %p265_p2 = pnand %p4257_p0, %p264_p1 }
   0x7   : > { %p298_p3 = scmp.lt.s32.totalorder (!%p265_p2), %s4253_s30, 1  ;;  %s4388_s12 = smov (!%p265_p2), 108  }
   0x8   : > { %268 = sbr.rel (%p265_p2) target bundleno = 1957 (0x7a5), region = 52  ;;  %s4389_s13 = smov (!%p265_p2), 107  }
   0x9   : > { %s4390_s14 = smov (!%p265_p2), 106   ;;  %s4391_s15 = smov (!%p265_p2), 126  }
   0xa   : > { %s4392_s16 = smov (!%p265_p2), 118   ;;  %s4393_s17 = smov (!%p265_p2), 117  }
   0xb   : > { %s4394_s18 = smov (!%p265_p2), 116   ;;  %s4395_s19 = smov (!%p265_p2), 127  }
   0xc   : > { %s4398_s24 = smov (!%p265_p2), 11  }
   0xd   : > { %s6871_s30 = smov (!%p298_p3, %s4253_s30), 1  ;;  %vm711_vm0 = vcmask 875520   ;;  %vm653_vm1 = vcmask 883712   ;;  %vm768_vm2 = vcmask 867328   ;;  %vm423_vm3 = vcmask 1031168  }
   0xe   : > { %s4281_s4 = smul.u32 44, %s6871_s30  ;;  %vm481_vm4 = vcmask 965632   ;;  %vm1917_vm5 = vcmask 1045504   ;;  %vm538_vm6 = vcmask 957440   ;;  %vm596_vm7 = vcmask 949248  }
   0xf   : > { %vm366_vm8 = vcmask 1039360   ;;  %vm2208_vm9 = vcmask 1043544   ;;  %vm2209_vm10 = vcmask 1047556   ;;  %vm2194_vm11 = vcmask 89088  }
  0x10   : > { %s4461_s11 = scalar_lea.vmem %s6861_s0, %s4281_s4  ;;  %vm2210_vm12 = vmor %vm2209_vm10, %vm2208_vm9  ;;  %vm2196_vm13 = vcmask 1043456   ;;  %vm2215_vm14 = vcmask 84992   ;;  %vm4075_vm15 = vcmask 3072  }
  0x11   : > { %v4464_v1 = vld [vmem:[%s4461_s11 + $0x10] sm:$0xff]  ;;  %v4467_v2 = vld [vmem:[%s4461_s11 + $0x8] sm:$0xff]  ;;  %v4530_v8 = vld [vmem:[%s4461_s11 + $0x18] sm:$0xff] }
  0x12   : > { %1594 = vrot.lane.b32.xlu1 %v4464_v1, %s4388_s12  ;;  %v4473_v3 = vcombine.high %v4464_v1, %v4464_v1  ;;  %1590 = vrot.lane.b32.xlu0 %v4467_v2, %s4388_s12  ;;  %v4479_v4 = vcombine.high %v4467_v2, %v4467_v2  ;;  %v4483_v5 = vcombine.low %v4467_v2, %v4467_v2  ;;  %v4486_v6 = vld [vmem:[%s4461_s11 + $0x4] sm:$0xff]  ;;  %v4558_v11 = vld [vmem:[%s4461_s11 + $0xc] sm:$0xff] }
  0x13   : > { %1285 = vst [vmem:[#allocation2 + $0x30] sm:$0xf] %v4467_v2  ;;  %1287 = vst [vmem:[#allocation2 + $0x1e0] sm:$0xf] %v4464_v1  ;;  %v4499_v7 = vcombine.low %v4464_v1, %v4464_v1  ;;  %v1644_v9 = vcombine.low %v4530_v8, %v4530_v8  ;;  %v4551_v10 = vcombine.high %v4486_v6, %v4486_v6  ;;  %v4619_v15 = vld [vmem:[%s4461_s11 + $0x14] sm:$0xff]  ;;  %v4643_v19 = vld [vmem:[%s4461_s11] sm:$0xff] }
  0x14   : > { %810 = vst [vmem:[#allocation2 + $0x298] sm:$0xf0] %v4486_v6  ;;  %1286 = vst [vmem:[#allocation2 + $0x210] sm:$0xf] %v4479_v4  ;;  %v4566_v12 = vcombine.low %v4558_v11, %v4558_v11  ;;  %v4589_v13 = vcombine.low %v4486_v6, %v4486_v6  ;;  %v4612_v14 = vcombine.high %v4558_v11, %v4558_v11 }
  0x15   : > { %1288 = vst [vmem:[#allocation2 + $0x50] sm:$0xf] %v4473_v3  ;;  %v4627_v16 = vcombine.low %v4619_v15, %v4619_v15  ;;  %v4652_v23 = vcombine.high %v4643_v19, %v4643_v19 }
  0x16   : > { %1647 = vrot.lane.b32.xlu1 %v4483_v5, %s4389_s13  ;;  %1649 = vrot.lane.b32.xlu0 %v4467_v2, %s4389_s13  ;;  %809 = vst [vmem:[#allocation2 + $0xd8] sm:$0xf0] %v4589_v13 }
  0x1a   : > { %1651 = vrot.lane.b32.xlu1 %v4499_v7, %s4389_s13  ;;  %1592 = vrot.lane.b32.xlu0 %v4479_v4, %s4388_s12 }
  0x1e   : > { %1705 = vrot.lane.b32.xlu1 %v4479_v4, %s4390_s14  ;;  %1703 = vrot.lane.b32.xlu0 %v4467_v2, %s4390_s14 }
  0x22   : > { %1707 = vrot.lane.b32.xlu0 %v4464_v1, %s4390_s14  ;;  %1366 = vrot.lane.b32.xlu1 %v4479_v4, %s4391_s15 }
  0x26   : > { %1368 = vrot.lane.b32.xlu0 %v4464_v1, %s4391_s15  ;;  %1423 = vrot.lane.b32.xlu1 %v4467_v2, %s4392_s16 }
  0x2a   : > { %1425 = vrot.lane.b32.xlu0 %v4499_v7, %s4392_s16  ;;  %1479 = vrot.lane.b32.xlu1 %v4479_v4, %s4393_s17 }
  0x2e   : > { %1481 = vrot.lane.b32.xlu0 %v4464_v1, %s4393_s17  ;;  %1536 = vrot.lane.b32.xlu1 %v4467_v2, %s4394_s18 }
  0x32   : > { %1538 = vrot.lane.b32.xlu0 %v4499_v7, %s4394_s18  ;;  %1596 = vrot.lane.b32.xlu1 %v4473_v3, %s4388_s12 }
  0x36   : > { %1598 = vrot.lane.b32.xlu0 %v4530_v8, %s4388_s12  ;;  %1653 = vrot.lane.b32.xlu1 %v4464_v1, %s4389_s13 }
  0x3a   : > { %1655 = vrot.lane.b32.xlu0 %v1644_v9, %s4389_s13  ;;  %1709 = vrot.lane.b32.xlu1 %v4473_v3, %s4390_s14 }
  0x3e   : > { %1711 = vrot.lane.b32.xlu0 %v4530_v8, %s4390_s14  ;;  %1364 = vrot.lane.b32.xlu1 %v4467_v2, %s4391_s15 }
  0x42   : > { %1421 = vrot.lane.b32.xlu0 %v4483_v5, %s4392_s16  ;;  %1477 = vrot.lane.b32.xlu1 %v4467_v2, %s4393_s17 }
  0x46   : > { %1534 = vrot.lane.b32.xlu0 %v4483_v5, %s4394_s18  ;;  %1172 = vrot.lane.b32.xlu1 %v4551_v10, %s4389_s13 }
  0x4a   : > { %1174 = vrot.lane.b32.xlu0 %v4558_v11, %s4389_s13  ;;  %1229 = vrot.lane.b32.xlu1 %v4486_v6, %s4390_s14 }
  0x4e   : > { %1231 = vrot.lane.b32.xlu0 %v4566_v12, %s4390_s14  ;;  %1310 = vrot.lane.b32.xlu1 %v4467_v2, %s4395_s19 }
  0x52   : > { %1312 = vrot.lane.b32.xlu0 %v4499_v7, %s4395_s19  ;;  %1370 = vrot.lane.b32.xlu1 %v4473_v3, %s4391_s15 }
  0x56   : > { %1372 = vrot.lane.b32.xlu0 %v4530_v8, %s4391_s15  ;;  %1427 = vrot.lane.b32.xlu1 %v4464_v1, %s4392_s16 }
  0x5a   : > { %1429 = vrot.lane.b32.xlu0 %v1644_v9, %s4392_s16  ;;  %1483 = vrot.lane.b32.xlu1 %v4473_v3, %s4393_s17 }
  0x5e   : > { %1485 = vrot.lane.b32.xlu0 %v4530_v8, %s4393_s17  ;;  %1540 = vrot.lane.b32.xlu1 %v4464_v1, %s4394_s18 }
  0x62   : > { %1542 = vrot.lane.b32.xlu0 %v1644_v9, %s4394_s18  ;;  %1170 = vrot.lane.b32.xlu1 %v4486_v6, %s4389_s13 }
  0x66   : > { %1227 = vrot.lane.b32.xlu0 %v4589_v13, %s4390_s14  ;;  %1308 = vrot.lane.b32.xlu1 %v4483_v5, %s4395_s19 }
  0x6a   : > { %948 = vrot.lane.b32.xlu1 %v4558_v11, %s4392_s16  ;;  %946 = vrot.lane.b32.xlu0 %v4551_v10, %s4392_s16 }
  0x6e   : > { %1005 = vrot.lane.b32.xlu1 %v4566_v12, %s4393_s17  ;;  %1003 = vrot.lane.b32.xlu0 %v4486_v6, %s4393_s17 }
  0x72   : > { %1061 = vrot.lane.b32.xlu1 %v4558_v11, %s4394_s18  ;;  %1059 = vrot.lane.b32.xlu0 %v4551_v10, %s4394_s18 }
  0x76   : > { %1118 = vrot.lane.b32.xlu1 %v4566_v12, %s4388_s12  ;;  %1116 = vrot.lane.b32.xlu0 %v4486_v6, %s4388_s12 }
  0x7a   : > { %1178 = vrot.lane.b32.xlu1 %v4619_v15, %s4389_s13  ;;  %1176 = vrot.lane.b32.xlu0 %v4612_v14, %s4389_s13 }
  0x7e   : > { %1235 = vrot.lane.b32.xlu1 %v4627_v16, %s4390_s14  ;;  %1233 = vrot.lane.b32.xlu0 %v4558_v11, %s4390_s14 }
  0x82   : > { %1316 = vrot.lane.b32.xlu1 %v1644_v9, %s4395_s19  ;;  %1314 = vrot.lane.b32.xlu0 %v4464_v1, %s4395_s19  ;;  %v794_v9 = vld [vmem:[%s4461_s11 + $0xc] sm:$0xff] }
  0x83   : > { %812 = vst [vmem:[#allocation2 + $0x170] sm:$0xf0] %v794_v9 }
  0x84   : > { %v4636_v17 = vpop.permute.xlu1 %1594  ;;  %v1591_v18 = vpop.permute.xlu0 %1590 }
  0x86   : > { %1001 = vrot.lane.b32.xlu1 %v4589_v13, %s4393_s17  ;;  %944 = vrot.lane.b32.xlu0 %v4486_v6, %s4392_s16 }
  0x88   : > { %v1648_v20 = vpop.permute.xlu1 %1647  ;;  %v1650_v21 = vpop.permute.xlu0 %1649 }
  0x89   : > { %v1665_v22 = vsel %vm711_vm0, %v1648_v20, %v1650_v21 }
  0x8a   : > { %1681 = vst [vmem:[#allocation2 + $0x240] sm:$0xf0] %v1665_v22  ;;  %1114 = vrot.lane.b32.xlu1 %v4589_v13, %s4388_s12  ;;  %1057 = vrot.lane.b32.xlu0 %v4486_v6, %s4394_s18 }
  0x8c   : > { %v4654_v24 = vpop.permute.xlu1 %1651  ;;  %v1593_v25 = vpop.permute.xlu0 %1592 }
  0x8d   : > { %v1666_v26 = vsel %vm711_vm0, %v1650_v21, %v4654_v24  ;;  %v1608_v27 = vsel %vm653_vm1, %v1591_v18, %v1593_v25  ;;  %v1609_v28 = vsel %vm653_vm1, %v1593_v25, %v4636_v17 }
  0x8e   : > { %1682 = vst [vmem:[#allocation2 + $0x258] sm:$0xf0] %v1666_v26  ;;  %1624 = vst [vmem:[#allocation2 + $0x240] sm:$0xf] %v1608_v27  ;;  %754 = vrot.lane.b32.xlu1 %v4467_v2, %s4390_s14  ;;  %752 = vrot.lane.b32.xlu0 %v4652_v23, %s4390_s14 }
  0x8f   : > { %1625 = vst [vmem:[#allocation2 + $0x258] sm:$0xf] %v1609_v28 }
  0x90   : > { %v1706_v29 = vpop.permute.xlu1 %1705  ;;  %v1704_v30 = vpop.permute.xlu0 %1703 }
  0x91   : > { %v1721_v31 = vsel %vm768_vm2, %v1704_v30, %v1706_v29 }
  0x92   : > { %1737 = vst [vmem:[#allocation2 + $0x190] sm:$0xf] %v1721_v31  ;;  %835 = vrot.lane.b32.xlu1 %v4558_v11, %s4395_s19  ;;  %833 = vrot.lane.b32.xlu0 %v4551_v10, %s4395_s19 }
  0x94   : > { %v1708_v32 = vpop.permute.xlu0 %1707  ;;  %v4670_v33 = vpop.permute.xlu1 %1366 }
  0x95   : > { %v1722_v34 = vsel %vm768_vm2, %v1706_v29, %v1708_v32  ;;  %v1842_v39 = vld [vmem:[#allocation2 + $0x240] sm:$0xff] }
  0x96   : > { %1738 = vst [vmem:[#allocation2 + $0x220] sm:$0xf] %v1722_v34  ;;  %892 = vrot.lane.b32.xlu1 %v4566_v12, %s4391_s15  ;;  %890 = vrot.lane.b32.xlu0 %v4486_v6, %s4391_s15  ;;  %v1843_v44 = vld [vmem:[#allocation2 + $0x258] sm:$0xff] }
  0x98   : > { %v4677_v35 = vpop.permute.xlu0 %1368  ;;  %v4679_v36 = vpop.permute.xlu1 %1423 }
  0x99   : > { %v1383_v37 = vsel %vm423_vm3, %v4670_v33, %v4677_v35  ;;  %v1850_v38 = vld [vmem:[#allocation2 + $0x190] sm:$0xf] }
  0x9a   : > { %1399 = vst [vmem:[#allocation2 + $0x20] sm:$0xf] %v1383_v37  ;;  %952 = vrot.lane.b32.xlu1 %v4619_v15, %s4392_s16  ;;  %950 = vrot.lane.b32.xlu0 %v4612_v14, %s4392_s16  ;;  %v1906_v42 = vpack.c.bf16 %v1850_v38, %v1842_v39 }
  0x9c   : > { %v4688_v40 = vpop.permute.xlu0 %1425  ;;  %v4690_v41 = vpop.permute.xlu1 %1479  ;;  %v1919_v49 = vsel %vm1917_vm5, %v1906_v42, 0 }
  0x9d   : > { %v1440_v43 = vsel %vm481_vm4, %v4679_v36, %v4688_v40  ;;  %v1851_v45 = vld [vmem:[#allocation2 + $0x220] sm:$0xf] }
  0x9e   : > { %1456 = vst [vmem:[#allocation2 + $0x20] sm:$0xf0] %v1440_v43  ;;  %1009 = vrot.lane.b32.xlu1 %v4627_v16, %s4393_s17  ;;  %1007 = vrot.lane.b32.xlu0 %v4558_v11, %s4393_s17  ;;  %v1907_v46 = vpack.c.bf16 %v1851_v45, %v1843_v44 }
  0xa0   : > { %4261 = vmatprep.subr.msk.bf16.mxu0 %vm1917_vm5, %v1907_v46  ;;  %v4701_v47 = vpop.permute.xlu0 %1481  ;;  %v1537_v48 = vpop.permute.xlu1 %1536 }
  0xa1   : > { %v1496_v50 = vsel %vm538_vm6, %v4690_v41, %v4701_v47  ;;  %1945 = vmatpush1.bf16.msra.mxu0 %v1919_v49 }
  0xa2   : > { %1512 = vst [vmem:[#allocation2 + $0x168] sm:$0xf] %v1496_v50  ;;  %1065 = vrot.lane.b32.xlu1 %v4619_v15, %s4394_s18  ;;  %1063 = vrot.lane.b32.xlu0 %v4612_v14, %s4394_s18 }
  0xa4   : > { %v4711_v51 = vpop.permute.xlu0 %1538  ;;  %v1597_v52 = vpop.permute.xlu1 %1596 }
  0xa5   : > { %v1553_v53 = vsel %vm596_vm7, %v1537_v48, %v4711_v51  ;;  %v1610_v54 = vsel %vm653_vm1, %v4636_v17, %v1597_v52  ;;  %v1827_v63 = vld [vmem:[#allocation2 + $0x20] sm:$0xff]  ;;  %v802_v17 = vcombine.low %v794_v9, %v794_v9 }
  0xa6   : > { %1569 = vst [vmem:[#allocation2 + $0x168] sm:$0xf0] %v1553_v53  ;;  %1626 = vst [vmem:[#allocation2 + $0x1b8] sm:$0xf] %v1610_v54  ;;  %1122 = vrot.lane.b32.xlu1 %v4627_v16, %s4388_s12  ;;  %1120 = vrot.lane.b32.xlu0 %v4558_v11, %s4388_s12 }
  0xa7   : > { %811 = vst [vmem:[#allocation2 + $0xb8] sm:$0xf0] %v802_v17 }
  0xa8   : > { %v4721_v55 = vpop.permute.xlu0 %1598  ;;  %v1654_v56 = vpop.permute.xlu1 %1653 }
  0xa9   : > { %v1611_v57 = vsel %vm653_vm1, %v1597_v52, %v4721_v55  ;;  %v1667_v58 = vsel %vm711_vm0, %v4654_v24, %v1654_v56 }
  0xaa   : > { %1627 = vst [vmem:[#allocation2 + $0x118] sm:$0xf] %v1611_v57  ;;  %1683 = vst [vmem:[#allocation2 + $0x1b8] sm:$0xf0] %v1667_v58  ;;  %831 = vrot.lane.b32.xlu1 %v4486_v6, %s4395_s19  ;;  %750 = vrot.lane.b32.xlu0 %v4643_v19, %s4390_s14  ;;  %v4810_v57 = vcombine.low %v4643_v19, %v4643_v19 }
  0xac   : > { %v4731_v59 = vpop.permute.xlu0 %1655  ;;  %v1710_v60 = vpop.permute.xlu1 %1709 }
  0xad   : > { %v1668_v61 = vsel %vm711_vm0, %v1654_v56, %v4731_v59  ;;  %v1723_v62 = vsel %vm768_vm2, %v1708_v32, %v1710_v60  ;;  %v1835_v0 = vld [vmem:[#allocation2 + $0x168] sm:$0xff] }
  0xae   : > { %1684 = vst [vmem:[#allocation2 + $0x118] sm:$0xf0] %v1668_v61  ;;  %1739 = vst [vmem:[#allocation2 + $0x8] sm:$0xf] %v1723_v62  ;;  %888 = vrot.lane.b32.xlu0 %v4589_v13, %s4391_s15  ;;  %522 = vrot.lane.b32.xlu1 %v4652_v23, %s4393_s17  ;;  %v1899_v6 = vpack.c.bf16 %v1835_v0, %v1827_v63 }
  0xb0   : > { %v4741_v10 = vpop.permute.xlu0 %1711  ;;  %1946 = vmatprep.subr.bf16.mxu0 %v1899_v6  ;;  %v1365_v12 = vpop.permute.xlu1 %1364 }
  0xb1   : > { %v1724_v18 = vsel %vm768_vm2, %v1710_v60, %v4741_v10  ;;  %v1382_v20 = vsel %vm423_vm3, %v1365_v12, %v4670_v33  ;;  %v1844_v26 = vld [vmem:[#allocation2 + $0x1b8] sm:$0xff] }
  0xb2   : > { %1740 = vst [vmem:[#allocation2 + $0x18] sm:$0xf] %v1724_v18  ;;  %1398 = vst [vmem:[#allocation2 + $0x140] sm:$0xf] %v1382_v20  ;;  %524 = vrot.lane.b32.xlu0 %v4467_v2, %s4393_s17  ;;  %580 = vrot.lane.b32.xlu1 %v4643_v19, %s4394_s18 }
  0xb4   : > { %v1422_v13 = vpop.permute.xlu0 %1421  ;;  %v1478_v21 = vpop.permute.xlu1 %1477 }
  0xb5   : > { %v1439_v22 = vsel %vm481_vm4, %v1422_v13, %v4679_v36  ;;  %v1495_v24 = vsel %vm538_vm6, %v1478_v21, %v4690_v41  ;;  %v1852_v25 = vld [vmem:[#allocation2 + $0x8] sm:$0xf]  ;;  %v1845_v31 = vld [vmem:[#allocation2 + $0x118] sm:$0xff] }
  0xb6   : > { %1455 = vst [vmem:[#allocation2 + $0x140] sm:$0xf0] %v1439_v22  ;;  %1511 = vst [vmem:[#allocation2 + $0x348] sm:$0xf] %v1495_v24  ;;  %582 = vrot.lane.b32.xlu0 %v4483_v5, %s4394_s18  ;;  %637 = vrot.lane.b32.xlu1 %v4652_v23, %s4388_s12  ;;  %v1908_v29 = vpack.c.bf16 %v1852_v25, %v1844_v26 }
  0xb8   : > { %v1535_v27 = vpop.permute.xlu0 %1534  ;;  %v4759_v28 = vpop.permute.xlu1 %1172  ;;  %v1925_v37 = vsel %vm1917_vm5, %v1908_v29, 0 }
  0xb9   : > { %v1552_v30 = vsel %vm596_vm7, %v1535_v27, %v1537_v48  ;;  %v1853_v32 = vld [vmem:[#allocation2 + $0x18] sm:$0xf] }
  0xba   : > { %1568 = vst [vmem:[#allocation2 + $0x348] sm:$0xf0] %v1552_v30  ;;  %639 = vrot.lane.b32.xlu0 %v4467_v2, %s4388_s12  ;;  %695 = vrot.lane.b32.xlu1 %v4643_v19, %s4389_s13  ;;  %v1909_v33 = vpack.c.bf16 %v1853_v32, %v1845_v31  ;;  %v4396_v31 = vmov 0.0  }
  0xbb   : > { %2114 = vst [vmem:[#allocation3] sm:$0xff] %v4396_v31  ;;  %2115 = vst [vmem:[#allocation3 + $0x8] sm:$0xff] %v4396_v31 }
  0xbc   : > { %4263 = vmatprep.subr.msk.bf16.mxu1 %vm1917_vm5, %v1909_v33  ;;  %v4767_v34 = vpop.permute.xlu0 %1174  ;;  %v4769_v36 = vpop.permute.xlu1 %1229  ;;  %2116 = vst [vmem:[#allocation3 + $0x10] sm:$0xff] %v4396_v31  ;;  %2117 = vst [vmem:[#allocation3 + $0x18] sm:$0xff] %v4396_v31 }
  0xbd   : > { %v1189_v38 = vsel %vm711_vm0, %v4759_v28, %v4767_v34  ;;  %1986 = vmatpush1.bf16.msra.mxu1 %v1925_v37  ;;  %v1826_v43 = vld [vmem:[#allocation2 + $0x140] sm:$0xff]  ;;  %2118 = vst [vmem:[#allocation3 + $0x20] sm:$0xff] %v4396_v31  ;;  %2119 = vst [vmem:[#allocation3 + $0x28] sm:$0xf] %v4396_v31 }
  0xbe   : > { %1205 = vst [vmem:[#allocation2 + $0x370] sm:$0xf] %v1189_v38  ;;  %697 = vrot.lane.b32.xlu0 %v4483_v5, %s4389_s13  ;;  %756 = vrot.lane.b32.xlu1 %v4479_v4, %s4390_s14  ;;  %v4870_v38 = vld [vmem:[%s4461_s11 + $0x18] sm:$0xff] }
  0xbf   : > { %1289 = vst [vmem:[#allocation2 + $0x80] sm:$0xf] %v4870_v38 }
  0xc0   : > { %v4779_v39 = vpop.permute.xlu0 %1231  ;;  %v4781_v41 = vpop.permute.xlu1 %1310 }
  0xc1   : > { %v1246_v42 = vsel %vm768_vm2, %v4769_v36, %v4779_v39  ;;  %v1834_v44 = vld [vmem:[#allocation2 + $0x348] sm:$0xff] }
  0xc2   : > { %1262 = vst [vmem:[#allocation2 + $0x370] sm:$0xf0] %v1246_v42  ;;  %758 = vrot.lane.b32.xlu0 %v4464_v1, %s4390_s14  ;;  %837 = vrot.lane.b32.xlu1 %v4612_v14, %s4395_s19  ;;  %v1898_v45 = vpack.c.bf16 %v1834_v44, %v1826_v43  ;;  %v309_v14 = vld [vmem:[%s4461_s11] sm:$0xff]  ;;  %v4878_v42 = vcombine.high %v4870_v38, %v4870_v38 }
  0xc3   : > { %v317_v54 = vcombine.high %v309_v14, %v309_v14  ;;  %325 = vst [vmem:[#allocation2 + $0x2b0] sm:$0xf] %v309_v14 }
  0xc4   : > { %1947 = vmatpush1.bf16.msra.mxu0 %v1898_v45  ;;  %v4790_v46 = vpop.permute.xlu0 %1312  ;;  %v1371_v48 = vpop.permute.xlu1 %1370  ;;  %1290 = vst [vmem:[#allocation2 + $0x1f0] sm:$0xf] %v4878_v42 }
  0xc5   : > { %v1327_v49 = vsel %vm366_vm8, %v4781_v41, %v4790_v46  ;;  %v1384_v50 = vsel %vm423_vm3, %v4677_v35, %v1371_v48  ;;  %326 = vst [vmem:[#allocation2 + $0xd0] sm:$0xf] %v317_v54 }
  0xc6   : > { %1343 = vst [vmem:[#allocation2 + $0x210] sm:$0xf0] %v1327_v49  ;;  %1400 = vst [vmem:[#allocation2 + $0x68] sm:$0xf] %v1384_v50  ;;  %839 = vrot.lane.b32.xlu0 %v4619_v15, %s4395_s19  ;;  %894 = vrot.lane.b32.xlu1 %v4558_v11, %s4391_s15 }
  0xc8   : > { %v4802_v52 = vpop.permute.xlu0 %1372  ;;  %v1428_v53 = vpop.permute.xlu1 %1427 }
  0xc9   : > { %v1385_v56 = vsel %vm423_vm3, %v1371_v48, %v4802_v52  ;;  %v1441_v35 = vsel %vm481_vm4, %v4688_v40, %v1428_v53  ;;  %v1811_v61 = vld [vmem:[#allocation2 + $0x370] sm:$0xff]  ;;  %v310_v48 = vld [vmem:[%s4461_s11 + $0x8] sm:$0xff] }
  0xca   : > { %1401 = vst [vmem:[#allocation2 + $0x78] sm:$0xf] %v1385_v56  ;;  %1457 = vst [vmem:[#allocation2 + $0x68] sm:$0xf0] %v1441_v35  ;;  %896 = vrot.lane.b32.xlu0 %v4627_v16, %s4391_s15  ;;  %520 = vrot.lane.b32.xlu1 %v4643_v19, %s4393_s17  ;;  %v318_v14 = vcombine.high %v310_v48, %v310_v48 }
  0xcb   : > { %327 = vst [vmem:[#allocation2 + $0x10] sm:$0xf] %v310_v48 }
  0xcc   : > { %v4816_v11 = vpop.permute.xlu0 %1429  ;;  %v1484_v58 = vpop.permute.xlu1 %1483  ;;  %328 = vst [vmem:[#allocation2 + $0x48] sm:$0xf] %v318_v14 }
  0xcd   : > { %v1442_v60 = vsel %vm481_vm4, %v1428_v53, %v4816_v11  ;;  %v1497_v40 = vsel %vm538_vm6, %v4701_v47, %v1484_v58  ;;  %v1819_v62 = vld [vmem:[#allocation2 + $0x210] sm:$0xff] }
  0xce   : > { %1458 = vst [vmem:[#allocation2 + $0x78] sm:$0xf0] %v1442_v60  ;;  %1513 = vst [vmem:[#allocation2 + $0x288] sm:$0xf] %v1497_v40  ;;  %578 = vrot.lane.b32.xlu0 %v4810_v57, %s4394_s18  ;;  %635 = vrot.lane.b32.xlu1 %v4643_v19, %s4388_s12  ;;  %v1891_v16 = vpack.c.bf16 %v1819_v62, %v1811_v61 }
  0xd0   : > { %v4826_v63 = vpop.permute.xlu0 %1485  ;;  %1948 = vmatprep.subr.bf16.mxu0 %v1891_v16  ;;  %v1541_v0 = vpop.permute.xlu1 %1540 }
  0xd1   : > { %v1498_v6 = vsel %vm538_vm6, %v1484_v58, %v4826_v63  ;;  %v1554_v47 = vsel %vm596_vm7, %v4711_v51, %v1541_v0  ;;  %v1828_v29 = vld [vmem:[#allocation2 + $0x68] sm:$0xff] }
  0xd2   : > { %1514 = vst [vmem:[#allocation2 + $0x1d0] sm:$0xf] %v1498_v6  ;;  %1570 = vst [vmem:[#allocation2 + $0x288] sm:$0xf0] %v1554_v47  ;;  %693 = vrot.lane.b32.xlu0 %v4810_v57, %s4389_s13  ;;  %350 = vrot.lane.b32.xlu1 %v4643_v19, %s4395_s19 }
  0xd4   : > { %v4836_v9 = vpop.permute.xlu0 %1542  ;;  %v1171_v12 = vpop.permute.xlu1 %1170 }
  0xd5   : > { %v1555_v17 = vsel %vm596_vm7, %v1541_v0, %v4836_v9  ;;  %v1188_v18 = vsel %vm711_vm0, %v1171_v12, %v4759_v28  ;;  %v1829_v26 = vld [vmem:[#allocation2 + $0x78] sm:$0xff] }
  0xd6   : > { %1571 = vst [vmem:[#allocation2 + $0x1d0] sm:$0xf0] %v1555_v17  ;;  %1204 = vst [vmem:[#allocation2 + $0x218] sm:$0xf] %v1188_v18  ;;  %352 = vrot.lane.b32.xlu0 %v4483_v5, %s4395_s19  ;;  %407 = vrot.lane.b32.xlu1 %v4652_v23, %s4391_s15 }
  0xd8   : > { %v1228_v51 = vpop.permute.xlu0 %1227  ;;  %v1309_v20 = vpop.permute.xlu1 %1308 }
  0xd9   : > { %v1245_v13 = vsel %vm768_vm2, %v1228_v51, %v4769_v36  ;;  %v1326_v21 = vsel %vm366_vm8, %v1309_v20, %v4781_v41  ;;  %v1836_v23 = vld [vmem:[#allocation2 + $0x288] sm:$0xff] }
  0xda   : > { %1261 = vst [vmem:[#allocation2 + $0x218] sm:$0xf0] %v1245_v13  ;;  %1342 = vst [vmem:[#allocation2 + $0x30] sm:$0xf0] %v1326_v21  ;;  %409 = vrot.lane.b32.xlu0 %v4467_v2, %s4391_s15  ;;  %465 = vrot.lane.b32.xlu1 %v4643_v19, %s4392_s16  ;;  %v1900_v30 = vpack.c.bf16 %v1836_v23, %v1828_v29 }
  0xdc   : > { %v4854_v22 = vpop.permute.xlu1 %948  ;;  %v4856_v24 = vpop.permute.xlu0 %946 }
  0xdd   : > { %v963_v25 = vsel %vm481_vm4, %v4856_v24, %v4854_v22  ;;  %v1837_v27 = vld [vmem:[#allocation2 + $0x1d0] sm:$0xff] }
  0xde   : > { %979 = vst [vmem:[#allocation2 + $0x228] sm:$0xf] %v963_v25  ;;  %467 = vrot.lane.b32.xlu0 %v4483_v5, %s4392_s16  ;;  %526 = vrot.lane.b32.xlu1 %v4479_v4, %s4393_s17  ;;  %v1901_v28 = vpack.c.bf16 %v1837_v27, %v1829_v26 }
  0xe0   : > { %1987 = vmatprep.subr.bf16.mxu1 %v1901_v28  ;;  %v4865_v32 = vpop.permute.xlu1 %1005  ;;  %v1004_v33 = vpop.permute.xlu0 %1003  ;;  %v4947_v28 = vld [vmem:[%s4461_s11 + $0x20] sm:$0xff] }
  0xe1   : > { %v1020_v5 = vsel %vm538_vm6, %v1004_v33, %v4865_v32  ;;  %1988 = vmatpush1.bf16.msra.mxu1 %v1900_v30  ;;  %v1810_v36 = vld [vmem:[#allocation2 + $0x218] sm:$0xff]  ;;  %v1818_v37 = vld [vmem:[#allocation2 + $0x30] sm:$0xff] }
  0xe2   : > { %1036 = vst [vmem:[#allocation2 + $0x228] sm:$0xf0] %v1020_v5  ;;  %528 = vrot.lane.b32.xlu0 %v4464_v1, %s4393_s17  ;;  %584 = vrot.lane.b32.xlu1 %v4467_v2, %s4394_s18  ;;  %v1890_v41 = vpack.c.bf16 %v1818_v37, %v1810_v36 }
  0xe4   : > { %1949 = vmatpush1.bf16.msra.mxu0 %v1890_v41  ;;  %v4881_v43 = vpop.permute.xlu1 %1061  ;;  %v1060_v44 = vpop.permute.xlu0 %1059 }
  0xe5   : > { %v1076_v45 = vsel %vm596_vm7, %v1060_v44, %v4881_v43 }
  0xe6   : > { %1092 = vst [vmem:[#allocation2 + $0xf8] sm:$0xf] %v1076_v45  ;;  %586 = vrot.lane.b32.xlu0 %v4499_v7, %s4394_s18  ;;  %641 = vrot.lane.b32.xlu1 %v4479_v4, %s4388_s12 }
  0xe8   : > { %v4891_v49 = vpop.permute.xlu1 %1118  ;;  %v1117_v50 = vpop.permute.xlu0 %1116 }
  0xe9   : > { %v1133_v53 = vsel %vm653_vm1, %v1117_v50, %v4891_v49  ;;  %v1795_v62 = vld [vmem:[#allocation2 + $0x228] sm:$0xff] }
  0xea   : > { %1149 = vst [vmem:[#allocation2 + $0xf8] sm:$0xf0] %v1133_v53  ;;  %643 = vrot.lane.b32.xlu0 %v4464_v1, %s4388_s12  ;;  %699 = vrot.lane.b32.xlu1 %v4467_v2, %s4389_s13 }
  0xec   : > { %v4899_v54 = vpop.permute.xlu1 %1178  ;;  %v1177_v56 = vpop.permute.xlu0 %1176 }
  0xed   : > { %v1190_v35 = vsel %vm711_vm0, %v4767_v34, %v1177_v56  ;;  %v1191_v58 = vsel %vm711_vm0, %v1177_v56, %v4899_v54 }
  0xee   : > { %1206 = vst [vmem:[#allocation2 + $0xa8] sm:$0xf] %v1190_v35  ;;  %1207 = vst [vmem:[#allocation2 + $0xc8] sm:$0xf] %v1191_v58  ;;  %701 = vrot.lane.b32.xlu0 %v4499_v7, %s4389_s13  ;;  %348 = vrot.lane.b32.xlu1 %v4810_v57, %s4395_s19 }
  0xf0   : > { %v4909_v60 = vpop.permute.xlu1 %1235  ;;  %v1234_v40 = vpop.permute.xlu0 %1233 }
  0xf1   : > { %v1247_v61 = vsel %vm768_vm2, %v4779_v39, %v1234_v40  ;;  %v1248_v34 = vsel %vm768_vm2, %v1234_v40, %v4909_v60  ;;  %v1803_v16 = vld [vmem:[#allocation2 + $0xf8] sm:$0xff] }
  0xf2   : > { %1263 = vst [vmem:[#allocation2 + $0xa8] sm:$0xf0] %v1247_v61  ;;  %1264 = vst [vmem:[#allocation2 + $0xc8] sm:$0xf0] %v1248_v34  ;;  %405 = vrot.lane.b32.xlu0 %v4643_v19, %s4391_s15  ;;  %463 = vrot.lane.b32.xlu1 %v4810_v57, %s4392_s16  ;;  %v1883_v0 = vpack.c.bf16 %v1803_v16, %v1795_v62 }
  0xf4   : > { %v4919_v6 = vpop.permute.xlu1 %1316  ;;  %1950 = vmatprep.subr.bf16.mxu0 %v1883_v0  ;;  %v1315_v47 = vpop.permute.xlu0 %1314 }
  0xf5   : > { %v1328_v39 = vsel %vm366_vm8, %v4790_v46, %v1315_v47  ;;  %v1329_v12 = vsel %vm366_vm8, %v1315_v47, %v4919_v6 }
  0xf6   : > { %1344 = vst [vmem:[#allocation2 + $0x1e0] sm:$0xf0] %v1328_v39  ;;  %1345 = vst [vmem:[#allocation2 + $0x50] sm:$0xf0] %v1329_v12  ;;  %354 = vrot.lane.b32.xlu0 %v4467_v2, %s4395_s19  ;;  %356 = vrot.lane.b32.xlu1 %v4499_v7, %s4395_s19 }
  0xf8   : > { %v1002_v19 = vpop.permute.xlu1 %1001  ;;  %v945_v57 = vpop.permute.xlu0 %944 }
  0xf9   : > { %v1019_v17 = vsel %vm538_vm6, %v1002_v19, %v1004_v33  ;;  %v962_v18 = vsel %vm481_vm4, %v945_v57, %v4856_v24  ;;  %v1813_v20 = vld [vmem:[#allocation2 + $0xc8] sm:$0xff]  ;;  %v4940_v24 = vcombine.high %v4530_v8, %v4530_v8 }
  0xfa   : > { %1035 = vst [vmem:[#allocation2 + $0x2b8] sm:$0xf0] %v1019_v17  ;;  %978 = vst [vmem:[#allocation2 + $0x2b8] sm:$0xf] %v962_v18  ;;  %411 = vrot.lane.b32.xlu0 %v4479_v4, %s4391_s15  ;;  %413 = vrot.lane.b32.xlu1 %v4464_v1, %s4391_s15  ;;  %v1812_v25 = vld [vmem:[#allocation2 + $0xa8] sm:$0xff]  ;;  %v5022_v17 = vcombine.high %v4947_v28, %v4947_v28 }
  0xfb   : > { %v1580_v18 = vld [vmem:[%s4461_s11 + $0x28] sm:$0xf] }
  0xfc   : > { %v1115_v46 = vpop.permute.xlu1 %1114  ;;  %v1058_v51 = vpop.permute.xlu0 %1057 }
  0xfd   : > { %v1132_v13 = vsel %vm653_vm1, %v1115_v46, %v1117_v50  ;;  %v1075_v21 = vsel %vm596_vm7, %v1058_v51, %v1060_v44  ;;  %v1821_v23 = vld [vmem:[#allocation2 + $0x50] sm:$0xff]  ;;  %v1820_v26 = vld [vmem:[#allocation2 + $0x1e0] sm:$0xff]  ;;  %v4397_v44 = vmov 0  }
  0xfe   : > { %1148 = vst [vmem:[#allocation2 + $0x270] sm:$0xf0] %v1132_v13  ;;  %1091 = vst [vmem:[#allocation2 + $0x270] sm:$0xf] %v1075_v21  ;;  %469 = vrot.lane.b32.xlu0 %v4467_v2, %s4392_s16  ;;  %471 = vrot.lane.b32.xlu1 %v4499_v7, %s4392_s16  ;;  %v1893_v4 = vpack.c.bf16 %v1821_v23, %v1813_v20  ;;  %v1892_v27 = vpack.c.bf16 %v1820_v26, %v1812_v25  ;;  %v4319_v13 = vld [vmem:[%s4461_s11 + $0x28] ss:$0 sps:$4 sm:$0xff]  }
  0xff   : > { %v4962_v2 = vcombine.low %v4947_v28, %v4947_v28  ;;  %1974 = vmatprep.mubr.bf16.mxu0 %v4397_v44  ;;  %2015 = vmatprep.mubr.bf16.mxu1 %v4397_v44 }
 0x100   : > { %1989 = vmatprep.subr.bf16.mxu1 %v1893_v4  ;;  %v4949_v29 = vpop.permute.xlu1 %754  ;;  %v4951_v30 = vpop.permute.xlu0 %752  ;;  %4301 = vset.pattern.permute.xlu1 %v4397_v44 }
 0x101   : > { %v770_v31 = vsel %vm768_vm2, %v4951_v30, %v4949_v29  ;;  %1990 = vmatpush1.bf16.msra.mxu1 %v1892_v27  ;;  %v1794_v36 = vld [vmem:[#allocation2 + $0x2b8] sm:$0xff]  ;;  %4302 = vset.pattern.permute.xlu0 %v4397_v44 }
 0x102   : > { %786 = vst [vmem:[#allocation2 + $0x298] sm:$0xf] %v770_v31  ;;  %1600 = vrot.lane.b32.xlu0 %v4940_v24, %s4388_s12  ;;  %1602 = vrot.lane.b32.xlu1 %v4947_v28, %s4388_s12 }
 0x104   : > { %v4964_v7 = vpop.permute.xlu1 %835  ;;  %v834_v33 = vpop.permute.xlu0 %833 }
 0x105   : > { %v850_v5 = vsel %vm366_vm8, %v834_v33, %v4964_v7  ;;  %v1802_v37 = vld [vmem:[#allocation2 + $0x270] sm:$0xff] }
 0x106   : > { %866 = vst [vmem:[#allocation2 + $0x2f0] sm:$0xf] %v850_v5  ;;  %1657 = vrot.lane.b32.xlu0 %v4530_v8, %s4389_s13  ;;  %1659 = vrot.lane.b32.xlu1 %v4962_v2, %s4389_s13  ;;  %v1882_v41 = vpack.c.bf16 %v1802_v37, %v1794_v36 }
 0x108   : > { %1951 = vmatpush1.bf16.msra.mxu0 %v1882_v41  ;;  %v4974_v45 = vpop.permute.xlu1 %892  ;;  %v891_v48 = vpop.permute.xlu0 %890  ;;  %v5052_v41 = vcombine.high %v4619_v15, %v4619_v15 }
 0x109   : > { %v907_v50 = vsel %vm423_vm3, %v891_v48, %v4974_v45  ;;  %v1779_v34 = vld [vmem:[#allocation2 + $0x298] sm:$0xff] }
 0x10a   : > { %923 = vst [vmem:[#allocation2 + $0x2f0] sm:$0xf0] %v907_v50  ;;  %1713 = vrot.lane.b32.xlu0 %v4940_v24, %s4390_s14  ;;  %1715 = vrot.lane.b32.xlu1 %v4947_v28, %s4390_s14 }
 0x10c   : > { %v4984_v14 = vpop.permute.xlu1 %952  ;;  %v951_v53 = vpop.permute.xlu0 %950 }
 0x10d   : > { %v964_v56 = vsel %vm481_vm4, %v4854_v22, %v951_v53  ;;  %v965_v35 = vsel %vm481_vm4, %v951_v53, %v4984_v14 }
 0x10e   : > { %980 = vst [vmem:[#allocation2 + $0x178] sm:$0xf] %v964_v56  ;;  %981 = vst [vmem:[#allocation2 + $0x200] sm:$0xf] %v965_v35  ;;  %1374 = vrot.lane.b32.xlu0 %v4940_v24, %s4391_s15  ;;  %1376 = vrot.lane.b32.xlu1 %v4947_v28, %s4391_s15 }
 0x110   : > { %v4994_v58 = vpop.permute.xlu1 %1009  ;;  %v1008_v40 = vpop.permute.xlu0 %1007 }
 0x111   : > { %v1021_v61 = vsel %vm538_vm6, %v4865_v32, %v1008_v40  ;;  %v1022_v22 = vsel %vm538_vm6, %v1008_v40, %v4994_v58  ;;  %v1787_v62 = vld [vmem:[#allocation2 + $0x2f0] sm:$0xff] }
 0x112   : > { %1037 = vst [vmem:[#allocation2 + $0x178] sm:$0xf0] %v1021_v61  ;;  %1038 = vst [vmem:[#allocation2 + $0x200] sm:$0xf0] %v1022_v22  ;;  %1431 = vrot.lane.b32.xlu0 %v4530_v8, %s4392_s16  ;;  %1433 = vrot.lane.b32.xlu1 %v4962_v2, %s4392_s16  ;;  %v1875_v16 = vpack.c.bf16 %v1787_v62, %v1779_v34 }
 0x114   : > { %v5004_v0 = vpop.permute.xlu1 %1065  ;;  %1952 = vmatprep.subr.bf16.mxu0 %v1875_v16  ;;  %v1064_v47 = vpop.permute.xlu0 %1063 }
 0x115   : > { %v1077_v32 = vsel %vm596_vm7, %v4881_v43, %v1064_v47  ;;  %v1078_v39 = vsel %vm596_vm7, %v1064_v47, %v5004_v0 }
 0x116   : > { %1093 = vst [vmem:[#allocation2 + $0x1c8] sm:$0xf] %v1077_v32  ;;  %1094 = vst [vmem:[#allocation2 + $0xb0] sm:$0xf] %v1078_v39  ;;  %1487 = vrot.lane.b32.xlu0 %v4940_v24, %s4393_s17  ;;  %1489 = vrot.lane.b32.xlu1 %v4947_v28, %s4393_s17 }
 0x118   : > { %v5014_v12 = vpop.permute.xlu1 %1122  ;;  %v1121_v19 = vpop.permute.xlu0 %1120 }
 0x119   : > { %v1134_v57 = vsel %vm653_vm1, %v4891_v49, %v1121_v19  ;;  %v1135_v43 = vsel %vm653_vm1, %v1121_v19, %v5014_v12  ;;  %v1797_v25 = vld [vmem:[#allocation2 + $0x200] sm:$0xff]  ;;  %v1796_v4 = vld [vmem:[#allocation2 + $0x178] sm:$0xff] }
 0x11a   : > { %1150 = vst [vmem:[#allocation2 + $0x1c8] sm:$0xf0] %v1134_v57  ;;  %1151 = vst [vmem:[#allocation2 + $0xb0] sm:$0xf0] %v1135_v43  ;;  %1544 = vrot.lane.b32.xlu0 %v4530_v8, %s4394_s18  ;;  %1546 = vrot.lane.b32.xlu1 %v4962_v2, %s4394_s18  ;;  %v1354_v57 = vld [vmem:[%s4461_s11 + $0x28] sm:$0xf] }
 0x11c   : > { %v832_v46 = vpop.permute.xlu1 %831  ;;  %v751_v51 = vpop.permute.xlu0 %750 }
 0x11d   : > { %v849_v49 = vsel %vm366_vm8, %v832_v46, %v834_v33  ;;  %v769_v20 = vsel %vm768_vm2, %v751_v51, %v4951_v30  ;;  %v1693_v33 = vld [vmem:[%s4461_s11 + $0x28] sm:$0xf] }
 0x11e   : > { %865 = vst [vmem:[#allocation2 + $0x1f8] sm:$0xf] %v849_v49  ;;  %785 = vst [vmem:[#allocation2 + $0xd8] sm:$0xf] %v769_v20  ;;  %1604 = vrot.lane.b32.xlu0 %v5022_v17, %s4388_s12  ;;  %1606 = vrot.lane.b32.xlu1 %v1580_v18, %s4388_s12 }
 0x120   : > { %v889_v21 = vpop.permute.xlu0 %888  ;;  %v5036_v23 = vpop.permute.xlu1 %522 }
 0x121   : > { %v906_v26 = vsel %vm423_vm3, %v889_v21, %v891_v48  ;;  %v1805_v24 = vld [vmem:[#allocation2 + $0xb0] sm:$0xff]  ;;  %v1804_v27 = vld [vmem:[#allocation2 + $0x1c8] sm:$0xff]  ;;  %v5058_v48 = vld [vmem:[%s4461_s11 + $0x1c] sm:$0xff] }
 0x122   : > { %922 = vst [vmem:[#allocation2 + $0x1f8] sm:$0xf0] %v906_v26  ;;  %1661 = vrot.lane.b32.xlu0 %v4947_v28, %s4389_s13  ;;  %1663 = vrot.lane.b32.xlu1 %v4319_v13, %s4389_s13  ;;  %v1885_v30 = vpack.c.bf16 %v1805_v24, %v1797_v25  ;;  %v1884_v31 = vpack.c.bf16 %v1804_v27, %v1796_v4  ;;  %v1467_v25 = vld [vmem:[%s4461_s11 + $0x28] sm:$0xf] }
 0x123   : > { %v5071_v22 = vcombine.low %v5058_v48, %v5058_v48  ;;  %v4324_v27 = vld [vmem:[%s4461_s11 + $0x28] ss:$0 sps:$4 sm:$0xff]  }
 0x124   : > { %1991 = vmatprep.subr.bf16.mxu1 %v1885_v30  ;;  %v5043_v5 = vpop.permute.xlu0 %524  ;;  %v5045_v36 = vpop.permute.xlu1 %580 }
 0x125   : > { %v540_v37 = vsel %vm538_vm6, %v5036_v23, %v5043_v5  ;;  %1992 = vmatpush1.bf16.msra.mxu1 %v1884_v31  ;;  %v1778_v35 = vld [vmem:[#allocation2 + $0xd8] sm:$0xff] }
 0x126   : > { %556 = vst [vmem:[#allocation2 + $0x330] sm:$0xf] %v540_v37  ;;  %1717 = vrot.lane.b32.xlu0 %v5022_v17, %s4390_s14  ;;  %1719 = vrot.lane.b32.xlu1 %v1693_v33, %s4390_s14 }
 0x128   : > { %v5060_v50 = vpop.permute.xlu0 %582  ;;  %v638_v53 = vpop.permute.xlu1 %637 }
 0x129   : > { %v598_v56 = vsel %vm596_vm7, %v5045_v36, %v5060_v50  ;;  %v1786_v40 = vld [vmem:[#allocation2 + $0x1f8] sm:$0xff] }
 0x12a   : > { %614 = vst [vmem:[#allocation2 + $0x330] sm:$0xf0] %v598_v56  ;;  %1180 = vrot.lane.b32.xlu0 %v5052_v41, %s4389_s13  ;;  %1182 = vrot.lane.b32.xlu1 %v5058_v48, %s4389_s13  ;;  %v1874_v61 = vpack.c.bf16 %v1786_v40, %v1778_v35 }
 0x12c   : > { %1953 = vmatpush1.bf16.msra.mxu0 %v1874_v61  ;;  %v5073_v34 = vpop.permute.xlu0 %639  ;;  %v696_v62 = vpop.permute.xlu1 %695 }
 0x12d   : > { %v655_v16 = vsel %vm653_vm1, %v638_v53, %v5073_v34 }
 0x12e   : > { %671 = vst [vmem:[#allocation2 + $0x120] sm:$0xf] %v655_v16  ;;  %1237 = vrot.lane.b32.xlu0 %v4619_v15, %s4390_s14  ;;  %1239 = vrot.lane.b32.xlu1 %v5071_v22, %s4390_s14 }
 0x130   : > { %v5081_v47 = vpop.permute.xlu0 %697  ;;  %v757_v32 = vpop.permute.xlu1 %756 }
 0x131   : > { %v713_v39 = vsel %vm711_vm0, %v696_v62, %v5081_v47  ;;  %v771_v19 = vsel %vm768_vm2, %v4949_v29, %v757_v32  ;;  %v1763_v13 = vld [vmem:[#allocation2 + $0x330] sm:$0xff] }
 0x132   : > { %729 = vst [vmem:[#allocation2 + $0x120] sm:$0xf0] %v713_v39  ;;  %787 = vst [vmem:[#allocation2 + $0xb8] sm:$0xf] %v771_v19  ;;  %1318 = vrot.lane.b32.xlu0 %v4530_v8, %s4395_s19  ;;  %1320 = vrot.lane.b32.xlu1 %v4962_v2, %s4395_s19  ;;  %v4323_v8 = vld [vmem:[%s4461_s11 + $0x28] ss:$0 sps:$4 sm:$0xff]  }
 0x134   : > { %v5092_v43 = vpop.permute.xlu0 %758  ;;  %v838_v18 = vpop.permute.xlu1 %837 }
 0x135   : > { %v772_v46 = vsel %vm768_vm2, %v757_v32, %v5092_v43  ;;  %v851_v51 = vsel %vm366_vm8, %v4964_v7, %v838_v18 }
 0x136   : > { %788 = vst [vmem:[#allocation2 + $0x170] sm:$0xf] %v772_v46  ;;  %867 = vst [vmem:[#allocation2 + $0x358] sm:$0xf] %v851_v51  ;;  %1378 = vrot.lane.b32.xlu0 %v5022_v17, %s4391_s15  ;;  %1380 = vrot.lane.b32.xlu1 %v1354_v57, %s4391_s15 }
 0x138   : > { %v5102_v29 = vpop.permute.xlu0 %839  ;;  %v895_v2 = vpop.permute.xlu1 %894 }
 0x139   : > { %v852_v49 = vsel %vm366_vm8, %v838_v18, %v5102_v29  ;;  %v908_v20 = vsel %vm423_vm3, %v4974_v45, %v895_v2  ;;  %v1771_v7 = vld [vmem:[#allocation2 + $0x120] sm:$0xff] }
 0x13a   : > { %868 = vst [vmem:[#allocation2 + $0x1c0] sm:$0xf] %v852_v49  ;;  %924 = vst [vmem:[#allocation2 + $0x358] sm:$0xf0] %v908_v20  ;;  %1435 = vrot.lane.b32.xlu0 %v4947_v28, %s4392_s16  ;;  %1437 = vrot.lane.b32.xlu1 %v4323_v8, %s4392_s16  ;;  %v1867_v21 = vpack.c.bf16 %v1771_v7, %v1763_v13  ;;  %v1272_v8 = vld [vmem:[%s4461_s11 + $0x20] sm:$0xff] }
 0x13b   : > { %v1280_v20 = vcombine.high %v1272_v8, %v1272_v8  ;;  %1291 = vst [vmem:[#allocation2 + $0x160] sm:$0xf] %v1272_v8 }
 0x13c   : > { %v5112_v26 = vpop.permute.xlu0 %896  ;;  %1954 = vmatprep.subr.bf16.mxu0 %v1867_v21  ;;  %v521_v24 = vpop.permute.xlu1 %520  ;;  %v5167_v21 = vcombine.high %v5058_v48, %v5058_v48 }
 0x13d   : > { %v909_v4 = vsel %vm423_vm3, %v895_v2, %v5112_v26  ;;  %v539_v45 = vsel %vm538_vm6, %v521_v24, %v5036_v23  ;;  %v1781_v40 = vld [vmem:[#allocation2 + $0x170] sm:$0xff]  ;;  %1292 = vst [vmem:[#allocation2 + $0x60] sm:$0xf] %v1280_v20  ;;  %v1160_v24 = vld [vmem:[%s4461_s11 + $0x24] sm:$0xf] }
 0x13e   : > { %925 = vst [vmem:[#allocation2 + $0x1c0] sm:$0xf0] %v909_v4  ;;  %555 = vst [vmem:[#allocation2 + $0x28] sm:$0xf] %v539_v45  ;;  %1491 = vrot.lane.b32.xlu0 %v5022_v17, %s4393_s17  ;;  %1493 = vrot.lane.b32.xlu1 %v1467_v25, %s4393_s17  ;;  %v5170_v25 = vld [vmem:[%s4461_s11 + $0x14] sm:$0xff] }
 0x13f   : > { %v795_v4 = vld [vmem:[%s4461_s11 + $0x14] sm:$0xff] }
 0x140   : > { %v579_v30 = vpop.permute.xlu0 %578  ;;  %v636_v31 = vpop.permute.xlu1 %635  ;;  %814 = vst [vmem:[#allocation2 + $0xa0] sm:$0xf0] %v795_v4 }
 0x141   : > { %v597_v33 = vsel %vm596_vm7, %v579_v30, %v5045_v36  ;;  %v654_v37 = vsel %vm653_vm1, %v636_v31, %v638_v53  ;;  %v1788_v17 = vld [vmem:[#allocation2 + $0x358] sm:$0xff] }
 0x142   : > { %613 = vst [vmem:[#allocation2 + $0x28] sm:$0xf0] %v597_v33  ;;  %670 = vst [vmem:[#allocation2 + $0x350] sm:$0xf] %v654_v37  ;;  %1548 = vrot.lane.b32.xlu0 %v4947_v28, %s4394_s18  ;;  %1550 = vrot.lane.b32.xlu1 %v4324_v27, %s4394_s18  ;;  %v1780_v53 = vld [vmem:[#allocation2 + $0xb8] sm:$0xff]  ;;  %v803_v27 = vcombine.low %v795_v4, %v795_v4 }
 0x143   : > { %v1876_v16 = vpack.c.bf16 %v1788_v17, %v1780_v53  ;;  %v4326_v33 = vld [vmem:[%s4461_s11 + $0x24] ss:$0 sps:$4 sm:$0xff]  }
 0x144   : > { %v694_v23 = vpop.permute.xlu0 %693  ;;  %v5128_v56 = vpop.permute.xlu1 %350  ;;  %813 = vst [vmem:[#allocation2 + $0x98] sm:$0xf0] %v803_v27  ;;  %v934_v27 = vld [vmem:[%s4461_s11 + $0x24] sm:$0xf] }
 0x145   : > { %v712_v35 = vsel %vm711_vm0, %v694_v23, %v696_v62  ;;  %v1789_v61 = vld [vmem:[#allocation2 + $0x1c0] sm:$0xff] }
 0x146   : > { %728 = vst [vmem:[#allocation2 + $0x350] sm:$0xf0] %v712_v35  ;;  %954 = vrot.lane.b32.xlu0 %v5052_v41, %s4392_s16  ;;  %956 = vrot.lane.b32.xlu1 %v5058_v48, %s4392_s16  ;;  %v1877_v36 = vpack.c.bf16 %v1789_v61, %v1781_v40 }
 0x148   : > { %1993 = vmatprep.subr.bf16.mxu1 %v1877_v36  ;;  %v5135_v32 = vpop.permute.xlu0 %352  ;;  %v5137_v39 = vpop.permute.xlu1 %407  ;;  %v4328_v36 = vld [vmem:[%s4461_s11 + $0x28] ss:$0 sps:$4 sm:$0xff]  }
 0x149   : > { %v368_v62 = vsel %vm366_vm8, %v5128_v56, %v5135_v32  ;;  %1994 = vmatpush1.bf16.msra.mxu1 %v1876_v16  ;;  %v1762_v46 = vld [vmem:[#allocation2 + $0x28] sm:$0xff] }
 0x14a   : > { %384 = vst [vmem:[#allocation2 + $0xd0] sm:$0xf0] %v368_v62  ;;  %1011 = vrot.lane.b32.xlu0 %v4619_v15, %s4393_s17  ;;  %1013 = vrot.lane.b32.xlu1 %v5071_v22, %s4393_s17 }
 0x14c   : > { %v5146_v19 = vpop.permute.xlu0 %409  ;;  %v5148_v57 = vpop.permute.xlu1 %465 }
 0x14d   : > { %v425_v18 = vsel %vm423_vm3, %v5137_v39, %v5146_v19  ;;  %v1770_v51 = vld [vmem:[#allocation2 + $0x350] sm:$0xff] }
 0x14e   : > { %441 = vst [vmem:[#allocation2 + $0x110] sm:$0xf] %v425_v18  ;;  %1067 = vrot.lane.b32.xlu0 %v5052_v41, %s4394_s18  ;;  %1069 = vrot.lane.b32.xlu1 %v5058_v48, %s4394_s18  ;;  %v1866_v15 = vpack.c.bf16 %v1770_v51, %v1762_v46 }
 0x150   : > { %1955 = vmatpush1.bf16.msra.mxu0 %v1866_v15  ;;  %v5158_v2 = vpop.permute.xlu0 %467  ;;  %v527_v49 = vpop.permute.xlu1 %526 }
 0x151   : > { %v483_v13 = vsel %vm481_vm4, %v5148_v57, %v5158_v2  ;;  %v541_v7 = vsel %vm538_vm6, %v5043_v5, %v527_v49 }
 0x152   : > { %499 = vst [vmem:[#allocation2 + $0x110] sm:$0xf0] %v483_v13  ;;  %557 = vst [vmem:[#allocation2 + $0x2d0] sm:$0xf] %v541_v7  ;;  %1124 = vrot.lane.b32.xlu0 %v5170_v25, %s4388_s12  ;;  %1126 = vrot.lane.b32.xlu1 %v5071_v22, %s4388_s12 }
 0x154   : > { %v5178_v45 = vpop.permute.xlu0 %528  ;;  %v585_v5 = vpop.permute.xlu1 %584 }
 0x155   : > { %v542_v30 = vsel %vm538_vm6, %v527_v49, %v5178_v45  ;;  %v599_v31 = vsel %vm596_vm7, %v5060_v50, %v585_v5  ;;  %v1747_v50 = vld [vmem:[#allocation2 + $0xd0] sm:$0xff] }
 0x156   : > { %558 = vst [vmem:[#allocation2 + $0x198] sm:$0xf] %v542_v30  ;;  %615 = vst [vmem:[#allocation2 + $0x2d0] sm:$0xf0] %v599_v31  ;;  %1184 = vrot.lane.b32.xlu0 %v5167_v21, %s4389_s13  ;;  %1186 = vrot.lane.b32.xlu1 %v1160_v24, %s4389_s13 }
 0x158   : > { %v5188_v37 = vpop.permute.xlu0 %586  ;;  %v642_v23 = vpop.permute.xlu1 %641 }
 0x159   : > { %v600_v17 = vsel %vm596_vm7, %v585_v5, %v5188_v37  ;;  %v656_v35 = vsel %vm653_vm1, %v5073_v34, %v642_v23  ;;  %v1755_v40 = vld [vmem:[#allocation2 + $0x110] sm:$0xff] }
 0x15a   : > { %616 = vst [vmem:[#allocation2 + $0x198] sm:$0xf0] %v600_v17  ;;  %672 = vst [vmem:[#allocation2 + $0x1a0] sm:$0xf] %v656_v35  ;;  %1241 = vrot.lane.b32.xlu0 %v5058_v48, %s4390_s14  ;;  %1243 = vrot.lane.b32.xlu1 %v4326_v33, %s4390_s14  ;;  %v1859_v61 = vpack.c.bf16 %v1755_v40, %v1747_v50  ;;  %v4330_v17 = vld [vmem:[%s4461_s11 + $0x24] ss:$0 sps:$4 sm:$0xff]  }
 0x15c   : > { %v5198_v53 = vpop.permute.xlu0 %643  ;;  %v700_v16 = vpop.permute.xlu1 %699  ;;  %1956 = vmatprep.subr.bf16.mxu0 %v1859_v61 }
 0x15d   : > { %v657_v62 = vsel %vm653_vm1, %v642_v23, %v5198_v53  ;;  %v714_v34 = vsel %vm711_vm0, %v5081_v47, %v700_v16  ;;  %v1764_v4 = vld [vmem:[#allocation2 + $0x2d0] sm:$0xff] }
 0x15e   : > { %673 = vst [vmem:[#allocation2 + $0x260] sm:$0xf] %v657_v62  ;;  %730 = vst [vmem:[#allocation2 + $0x1a0] sm:$0xf0] %v714_v34  ;;  %1322 = vrot.lane.b32.xlu0 %v4947_v28, %s4395_s19  ;;  %1324 = vrot.lane.b32.xlu1 %v4328_v36, %s4395_s19  ;;  %v1047_v36 = vld [vmem:[%s4461_s11 + $0x24] sm:$0xf] }
 0x160   : > { %v5207_v18 = vpop.permute.xlu0 %701  ;;  %v349_v46 = vpop.permute.xlu1 %348 }
 0x161   : > { %v715_v51 = vsel %vm711_vm0, %v700_v16, %v5207_v18  ;;  %v367_v15 = vsel %vm366_vm8, %v349_v46, %v5128_v56  ;;  %v4331_v46 = vld [vmem:[%s4461_s11 + $0x24] ss:$0 sps:$4 sm:$0xff]  }
 0x162   : > { %731 = vst [vmem:[#allocation2 + $0x260] sm:$0xf0] %v715_v51  ;;  %383 = vst [vmem:[#allocation2 + $0x2b0] sm:$0xf0] %v367_v15  ;;  %760 = vrot.lane.b32.xlu0 %v4473_v3, %s4390_s14  ;;  %762 = vrot.lane.b32.xlu1 %v4870_v38, %s4390_s14 }
 0x164   : > { %v406_v28 = vpop.permute.xlu0 %405  ;;  %v464_v47 = vpop.permute.xlu1 %463 }
 0x165   : > { %v424_v8 = vsel %vm423_vm3, %v406_v28, %v5137_v39  ;;  %v482_v49 = vsel %vm481_vm4, %v464_v47, %v5148_v57  ;;  %v1772_v13 = vld [vmem:[#allocation2 + $0x1a0] sm:$0xff]  ;;  %v1765_v57 = vld [vmem:[#allocation2 + $0x198] sm:$0xff] }
 0x166   : > { %440 = vst [vmem:[#allocation2 + $0x108] sm:$0xf] %v424_v8  ;;  %498 = vst [vmem:[#allocation2 + $0x108] sm:$0xf0] %v482_v49  ;;  %841 = vrot.lane.b32.xlu0 %v5052_v41, %s4395_s19  ;;  %843 = vrot.lane.b32.xlu1 %v5058_v48, %s4395_s19  ;;  %v1868_v5 = vpack.c.bf16 %v1772_v13, %v1764_v4  ;;  %v796_v4 = vld [vmem:[%s4461_s11 + $0x1c] sm:$0xff] }
 0x167   : > { %816 = vst [vmem:[#allocation2 + $0xf0] sm:$0xf0] %v796_v4 }
 0x168   : > { %v355_v56 = vpop.permute.xlu0 %354  ;;  %v5225_v20 = vpop.permute.xlu1 %356 }
 0x169   : > { %v369_v7 = vsel %vm366_vm8, %v5135_v32, %v355_v56  ;;  %v370_v39 = vsel %vm366_vm8, %v355_v56, %v5225_v20  ;;  %v1773_v24 = vld [vmem:[#allocation2 + $0x260] sm:$0xff] }
 0x16a   : > { %385 = vst [vmem:[#allocation2 + $0x10] sm:$0xf0] %v369_v7  ;;  %386 = vst [vmem:[#allocation2 + $0x48] sm:$0xf0] %v370_v39  ;;  %898 = vrot.lane.b32.xlu0 %v5170_v25, %s4391_s15  ;;  %900 = vrot.lane.b32.xlu1 %v5071_v22, %s4391_s15  ;;  %v1869_v41 = vpack.c.bf16 %v1773_v24, %v1765_v57  ;;  %v1746_v25 = vld [vmem:[#allocation2 + $0x2b0] sm:$0xff] }
 0x16c   : > { %v412_v30 = vpop.permute.xlu0 %411  ;;  %1995 = vmatprep.subr.bf16.mxu1 %v1869_v41  ;;  %v5236_v32 = vpop.permute.xlu1 %413  ;;  %v5295_v41 = vcombine.low %v4870_v38, %v4870_v38 }
 0x16d   : > { %v426_v31 = vsel %vm423_vm3, %v5146_v19, %v412_v30  ;;  %v427_v33 = vsel %vm423_vm3, %v412_v30, %v5236_v32  ;;  %1996 = vmatpush1.bf16.msra.mxu1 %v1868_v5  ;;  %v1754_v23 = vld [vmem:[#allocation2 + $0x108] sm:$0xff]  ;;  %v5251_v19 = vld [vmem:[%s6862_s1] sm:$0x3] }
 0x16e   : > { %442 = vst [vmem:[#allocation2 + $0x90] sm:$0xf] %v426_v31  ;;  %443 = vst [vmem:[#allocation2 + $0x318] sm:$0xf] %v427_v33  ;;  %958 = vrot.lane.b32.xlu0 %v5167_v21, %s4392_s16  ;;  %960 = vrot.lane.b32.xlu1 %v934_v27, %s4392_s16  ;;  %v1858_v22 = vpack.c.bf16 %v1754_v23, %v1746_v25 }
 0x170   : > { %v470_v35 = vpop.permute.xlu0 %469  ;;  %v5246_v50 = vpop.permute.xlu1 %471  ;;  %1957 = vmatpush1.bf16.msra.mxu0 %v1858_v22 }
 0x171   : > { %v484_v40 = vsel %vm481_vm4, %v5158_v2, %v470_v35  ;;  %v485_v61 = vsel %vm481_vm4, %v470_v35, %v5246_v50  ;;  %v1749_v28 = vld [vmem:[#allocation2 + $0x48] sm:$0xff]  ;;  %v1748_v49 = vld [vmem:[#allocation2 + $0x10] sm:$0xff] }
 0x172   : > { %500 = vst [vmem:[#allocation2 + $0x90] sm:$0xf0] %v484_v40  ;;  %501 = vst [vmem:[#allocation2 + $0x318] sm:$0xf0] %v485_v61  ;;  %1015 = vrot.lane.b32.xlu0 %v5058_v48, %s4393_s17  ;;  %1017 = vrot.lane.b32.xlu1 %v4330_v17, %s4393_s17 }
 0x173   : > { %4262 = vmatmul.mubr.msk.bf16.vlgmr.msra.gmra.mxu0 %vm653_vm1, %v5251_v19 }
 0x174   : > { %v1601_v16 = vpop.permute.xlu0 %1600  ;;  %v5263_v62 = vpop.permute.xlu1 %1602  ;;  %2056 = vmatprep.mubr.bf16.mxu0 %v4397_v44 }
 0x175   : > { %v1612_v2 = vsel %vm653_vm1, %v4721_v55, %v1601_v16  ;;  %v1613_v34 = vsel %vm653_vm1, %v1601_v16, %v5263_v62 }
 0x176   : > { %1628 = vst [vmem:[#allocation2 + $0x88] sm:$0xf] %v1612_v2  ;;  %1629 = vst [vmem:[#allocation2 + $0x368] sm:$0xf] %v1613_v34  ;;  %1071 = vrot.lane.b32.xlu0 %v5167_v21, %s4394_s18  ;;  %1073 = vrot.lane.b32.xlu1 %v1047_v36, %s4394_s18 }
 0x178   : > { %v1658_v51 = vpop.permute.xlu0 %1657  ;;  %v5274_v15 = vpop.permute.xlu1 %1659 }
 0x179   : > { %v1669_v47 = vsel %vm711_vm0, %v4731_v59, %v1658_v51  ;;  %v1670_v55 = vsel %vm711_vm0, %v1658_v51, %v5274_v15  ;;  %v1757_v8 = vld [vmem:[#allocation2 + $0x318] sm:$0xff]  ;;  %v1756_v56 = vld [vmem:[#allocation2 + $0x90] sm:$0xff]  ;;  %v740_v51 = vld [vmem:[%s4461_s11 + $0x20] sm:$0xf] }
 0x17a   : > { %1685 = vst [vmem:[#allocation2 + $0x88] sm:$0xf0] %v1669_v47  ;;  %1686 = vst [vmem:[#allocation2 + $0x368] sm:$0xf0] %v1670_v55  ;;  %1128 = vrot.lane.b32.xlu0 %v5058_v48, %s4388_s12  ;;  %1130 = vrot.lane.b32.xlu1 %v4331_v46, %s4388_s12  ;;  %v1861_v13 = vpack.c.bf16 %v1757_v8, %v1749_v28  ;;  %v1860_v7 = vpack.c.bf16 %v1756_v56, %v1748_v49  ;;  %v311_v28 = vld [vmem:[%s4461_s11 + $0x10] sm:$0xff] }
 0x17b   : > { %v319_v8 = vcombine.high %v311_v28, %v311_v28  ;;  %329 = vst [vmem:[#allocation2 + $0x360] sm:$0xf] %v311_v28  ;;  %v821_v56 = vld [vmem:[%s4461_s11 + $0x24] sm:$0xf] }
 0x17c   : > { %v1714_v39 = vpop.permute.xlu0 %1713  ;;  %v5283_v57 = vpop.permute.xlu1 %1715  ;;  %1997 = vmatprep.subr.bf16.mxu1 %v1861_v13 }
 0x17d   : > { %v1725_v59 = vsel %vm768_vm2, %v4741_v10, %v1714_v39  ;;  %v1726_v24 = vsel %vm768_vm2, %v1714_v39, %v5283_v57  ;;  %1998 = vmatpush1.bf16.msra.mxu1 %v1860_v7  ;;  %v804_v10 = vcombine.low %v796_v4, %v796_v4  ;;  %330 = vst [vmem:[#allocation2 + $0x328] sm:$0xf] %v319_v8 }
 0x17e   : > { %1741 = vst [vmem:[#allocation2] sm:$0xf] %v1725_v59  ;;  %1742 = vst [vmem:[#allocation2 + $0x2a0] sm:$0xf] %v1726_v24  ;;  %530 = vrot.lane.b32.xlu0 %v4473_v3, %s4393_s17  ;;  %532 = vrot.lane.b32.xlu1 %v4870_v38, %s4393_s17  ;;  %v4334_v59 = vld [vmem:[%s4461_s11 + $0x24] ss:$0 sps:$4 sm:$0xff]  }
 0x17f   : > { %815 = vst [vmem:[#allocation2 + $0x320] sm:$0xf0] %v804_v10 }
 0x180   : > { %v1375_v5 = vpop.permute.xlu0 %1374  ;;  %v5298_v27 = vpop.permute.xlu1 %1376  ;;  %4264 = vmatmul.mubr.msk.bf16.vlgmr.msra.gmra.mxu1 %vm653_vm1, %v5251_v19 }
 0x181   : > { %v1386_v30 = vsel %vm423_vm3, %v4802_v52, %v1375_v5  ;;  %v1387_v31 = vsel %vm423_vm3, %v1375_v5, %v5298_v27  ;;  %2097 = vmatprep.mubr.bf16.mxu1 %v4397_v44  ;;  %v1847_v23 = vld [vmem:[#allocation2 + $0x368] sm:$0xff] }
 0x182   : > { %1402 = vst [vmem:[#allocation2 + $0x188] sm:$0xf] %v1386_v30  ;;  %1403 = vst [vmem:[#allocation2 + $0x238] sm:$0xf] %v1387_v31  ;;  %588 = vrot.lane.b32.xlu0 %v4464_v1, %s4394_s18  ;;  %590 = vrot.lane.b32.xlu1 %v5295_v41, %s4394_s18  ;;  %v1846_v35 = vld [vmem:[#allocation2 + $0x88] sm:$0xff] }
 0x184   : > { %v1432_v33 = vpop.permute.xlu0 %1431  ;;  %v5311_v25 = vpop.permute.xlu1 %1433 }
 0x185   : > { %v1443_v52 = vsel %vm481_vm4, %v4816_v11, %v1432_v33  ;;  %v1444_v22 = vsel %vm481_vm4, %v1432_v33, %v5311_v25  ;;  %v1855_v17 = vld [vmem:[#allocation2 + $0x2a0] sm:$0xf] }
 0x186   : > { %v1854_v40 = vld [vmem:[#allocation2] sm:$0xf]  ;;  %1459 = vst [vmem:[#allocation2 + $0x188] sm:$0xf0] %v1443_v52  ;;  %1460 = vst [vmem:[#allocation2 + $0x238] sm:$0xf0] %v1444_v22  ;;  %645 = vrot.lane.b32.xlu0 %v4473_v3, %s4388_s12  ;;  %647 = vrot.lane.b32.xlu1 %v4870_v38, %s4388_s12  ;;  %v1911_v61 = vpack.c.bf16 %v1855_v17, %v1847_v23 }
 0x187   : > { %v1910_v36 = vpack.c.bf16 %v1854_v40, %v1846_v35 }
 0x188   : > { %v1488_v16 = vpop.permute.xlu0 %1487  ;;  %v5321_v11 = vpop.permute.xlu1 %1489  ;;  %4265 = vmatprep.subr.msk.bf16.mxu0 %vm1917_vm5, %v1911_v61 }
 0x189   : > { %v1931_v2 = vsel %vm1917_vm5, %v1910_v36, 0  ;;  %v1499_v34 = vsel %vm538_vm6, %v4826_v63, %v1488_v16  ;;  %v1500_v46 = vsel %vm538_vm6, %v1488_v16, %v5321_v11 }
 0x18a   : > { %2027 = vmatpush1.bf16.msra.mxu0 %v1931_v2  ;;  %1515 = vst [vmem:[#allocation2 + $0x280] sm:$0xf] %v1499_v34  ;;  %1516 = vst [vmem:[#allocation2 + $0x300] sm:$0xf] %v1500_v46  ;;  %703 = vrot.lane.b32.xlu0 %v4464_v1, %s4389_s13 }
 0x18b   : > { %705 = vrot.lane.b32.xlu1 %v5295_v41, %s4389_s13 }
 0x18c   : > { %v1545_v47 = vpop.permute.xlu0 %1544  ;;  %v5335_v55 = vpop.permute.xlu1 %1546 }
 0x18d   : > { %v1556_v63 = vsel %vm596_vm7, %v4836_v9, %v1545_v47  ;;  %v1557_v49 = vsel %vm596_vm7, %v1545_v47, %v5335_v55  ;;  %v1831_v5 = vld [vmem:[#allocation2 + $0x238] sm:$0xff]  ;;  %v510_v47 = vld [vmem:[%s4461_s11 + $0x20] sm:$0xf] }
 0x18e   : > { %1572 = vst [vmem:[#allocation2 + $0x280] sm:$0xf0] %v1556_v63  ;;  %1573 = vst [vmem:[#allocation2 + $0x300] sm:$0xf0] %v1557_v49  ;;  %764 = vrot.lane.b32.xlu0 %v4878_v42, %s4390_s14 }
 0x18f   : > { %766 = vrot.lane.b32.xlu1 %v740_v51, %s4390_s14 }
 0x190   : > { %v1605_v13 = vpop.permute.xlu0 %1604  ;;  %v1607_v7 = vpop.permute.xlu1 %1606 }
 0x191   : > { %v1614_v39 = vsel %vm653_vm1, %v5263_v62, %v1605_v13  ;;  %v1615_v9 = vsel %vm653_vm1, %v1605_v13, %v1607_v7  ;;  %v1830_v62 = vld [vmem:[#allocation2 + $0x188] sm:$0xff] }
 0x192   : > { %1630 = vst [vmem:[#allocation2 + $0x180] sm:$0xf] %v1614_v39  ;;  %1631 = vst [vmem:[#allocation2 + $0x250] sm:$0xf] %v1615_v9  ;;  %845 = vrot.lane.b32.xlu0 %v5167_v21, %s4395_s19 }
 0x193   : > { %847 = vrot.lane.b32.xlu1 %v821_v56, %s4395_s19  ;;  %v312_v56 = vld [vmem:[%s4461_s11 + $0x18] sm:$0xff] }
 0x194   : > { %v1662_v24 = vpop.permute.xlu0 %1661  ;;  %v1664_v4 = vpop.permute.xlu1 %1663  ;;  %v320_v39 = vcombine.high %v312_v56, %v312_v56  ;;  %331 = vst [vmem:[#allocation2 + $0x40] sm:$0xf] %v312_v56 }
 0x195   : > { %v1671_v10 = vsel %vm711_vm0, %v5274_v15, %v1662_v24  ;;  %v1672_v30 = vsel %vm711_vm0, %v1662_v24, %v1664_v4  ;;  %v1839_v31 = vld [vmem:[#allocation2 + $0x300] sm:$0xff] }
 0x196   : > { %v1838_v33 = vld [vmem:[#allocation2 + $0x280] sm:$0xff]  ;;  %1687 = vst [vmem:[#allocation2 + $0x180] sm:$0xf0] %v1671_v10  ;;  %1688 = vst [vmem:[#allocation2 + $0x250] sm:$0xf0] %v1672_v30  ;;  %902 = vrot.lane.b32.xlu0 %v5058_v48, %s4391_s15  ;;  %v1903_v21 = vpack.c.bf16 %v1839_v31, %v1831_v5 }
 0x197   : > { %904 = vrot.lane.b32.xlu1 %v4334_v59, %s4391_s15  ;;  %v1902_v23 = vpack.c.bf16 %v1838_v33, %v1830_v62  ;;  %332 = vst [vmem:[#allocation2 + $0x378] sm:$0xf] %v320_v39  ;;  %v625_v59 = vld [vmem:[%s4461_s11 + $0x20] sm:$0xf] }
 0x198   : > { %v1718_v52 = vpop.permute.xlu0 %1717  ;;  %v1720_v22 = vpop.permute.xlu1 %1719  ;;  %2028 = vmatprep.subr.bf16.mxu0 %v1903_v21 }
 0x199   : > { %v1727_v15 = vsel %vm768_vm2, %v5283_v57, %v1718_v52  ;;  %v1728_v17 = vsel %vm768_vm2, %v1718_v52, %v1720_v22  ;;  %2029 = vmatpush1.bf16.msra.mxu0 %v1902_v23  ;;  %v4336_v23 = vld [vmem:[%s4461_s11 + $0x20] ss:$0 sps:$4 sm:$0xff]  }
 0x19a   : > { %1743 = vst [vmem:[#allocation2 + $0x1b0] sm:$0xf] %v1727_v15  ;;  %1744 = vst [vmem:[#allocation2 + $0x150] sm:$0xf] %v1728_v17  ;;  %358 = vrot.lane.b32.xlu0 %v4464_v1, %s4395_s19  ;;  %v4337_v17 = vld [vmem:[%s4461_s11 + $0x20] ss:$0 sps:$4 sm:$0xff]  }
 0x19b   : > { %360 = vrot.lane.b32.xlu1 %v5295_v41, %s4395_s19 }
 0x19c   : > { %v1181_v48 = vpop.permute.xlu0 %1180  ;;  %v5365_v35 = vpop.permute.xlu1 %1182 }
 0x19d   : > { %v1192_v40 = vsel %vm711_vm0, %v4899_v54, %v1181_v48  ;;  %v1193_v57 = vsel %vm711_vm0, %v1181_v48, %v5365_v35  ;;  %v1849_v16 = vld [vmem:[#allocation2 + $0x250] sm:$0xff]  ;;  %v1848_v46 = vld [vmem:[#allocation2 + $0x180] sm:$0xff] }
 0x19e   : > { %1208 = vst [vmem:[#allocation2 + $0x338] sm:$0xf] %v1192_v40  ;;  %1209 = vst [vmem:[#allocation2 + $0x230] sm:$0xf] %v1193_v57  ;;  %415 = vrot.lane.b32.xlu0 %v4473_v3, %s4391_s15 }
 0x19f   : > { %417 = vrot.lane.b32.xlu1 %v4870_v38, %s4391_s15 }
 0x1a0   : > { %v1238_v61 = vpop.permute.xlu0 %1237  ;;  %v5375_v36 = vpop.permute.xlu1 %1239 }
 0x1a1   : > { %v1249_v2 = vsel %vm768_vm2, %v4909_v60, %v1238_v61  ;;  %v1250_v54 = vsel %vm768_vm2, %v1238_v61, %v5375_v36  ;;  %v1857_v34 = vld [vmem:[#allocation2 + $0x150] sm:$0xf]  ;;  %v395_v61 = vld [vmem:[%s4461_s11 + $0x20] sm:$0xf] }
 0x1a2   : > { %v1856_v51 = vld [vmem:[#allocation2 + $0x1b0] sm:$0xf]  ;;  %1265 = vst [vmem:[#allocation2 + $0x338] sm:$0xf0] %v1249_v2  ;;  %1266 = vst [vmem:[#allocation2 + $0x230] sm:$0xf0] %v1250_v54  ;;  %473 = vrot.lane.b32.xlu0 %v4464_v1, %s4392_s16  ;;  %v1913_v3 = vpack.c.bf16 %v1857_v34, %v1849_v16 }
 0x1a3   : > { %475 = vrot.lane.b32.xlu1 %v5295_v41, %s4392_s16  ;;  %v1912_v28 = vpack.c.bf16 %v1856_v51, %v1848_v46  ;;  %v4335_v41 = vld [vmem:[%s4461_s11 + $0x20] ss:$0 sps:$4 sm:$0xff]  }
 0x1a4   : > { %v1319_v60 = vpop.permute.xlu0 %1318  ;;  %v5386_v8 = vpop.permute.xlu1 %1320  ;;  %4267 = vmatprep.subr.msk.bf16.mxu1 %vm1917_vm5, %v1913_v3 }
 0x1a5   : > { %v1937_v63 = vsel %vm1917_vm5, %v1912_v28, 0  ;;  %v1330_v49 = vsel %vm366_vm8, %v4919_v6, %v1319_v60  ;;  %v1331_v1 = vsel %vm366_vm8, %v1319_v60, %v5386_v8 }
 0x1a6   : > { %2068 = vmatpush1.bf16.msra.mxu1 %v1937_v63  ;;  %1346 = vst [vmem:[#allocation2 + $0x80] sm:$0xf0] %v1330_v49  ;;  %1347 = vst [vmem:[#allocation2 + $0x1f0] sm:$0xf0] %v1331_v1  ;;  %534 = vrot.lane.b32.xlu0 %v4878_v42, %s4393_s17 }
 0x1a7   : > { %536 = vrot.lane.b32.xlu1 %v510_v47, %s4393_s17 }
 0x1a8   : > { %v1379_v13 = vpop.permute.xlu0 %1378  ;;  %v1381_v7 = vpop.permute.xlu1 %1380 }
 0x1a9   : > { %v1388_v6 = vsel %vm423_vm3, %v5298_v27, %v1379_v13  ;;  %v1389_v9 = vsel %vm423_vm3, %v1379_v13, %v1381_v7  ;;  %v1815_v5 = vld [vmem:[#allocation2 + $0x230] sm:$0xff]  ;;  %v1814_v31 = vld [vmem:[#allocation2 + $0x338] sm:$0xff] }
 0x1aa   : > { %1404 = vst [vmem:[#allocation2 + $0x2c8] sm:$0xf] %v1388_v6  ;;  %1405 = vst [vmem:[#allocation2 + $0x70] sm:$0xf] %v1389_v9  ;;  %592 = vrot.lane.b32.xlu0 %v4870_v38, %s4394_s18 }
 0x1ab   : > { %594 = vrot.lane.b32.xlu1 %v4335_v41, %s4394_s18 }
 0x1ac   : > { %v1436_v24 = vpop.permute.xlu0 %1435  ;;  %v1438_v4 = vpop.permute.xlu1 %1437 }
 0x1ad   : > { %v1445_v10 = vsel %vm481_vm4, %v5311_v25, %v1436_v24  ;;  %v1446_v27 = vsel %vm481_vm4, %v1436_v24, %v1438_v4  ;;  %v1823_v30 = vld [vmem:[#allocation2 + $0x1f0] sm:$0xff]  ;;  %v1822_v62 = vld [vmem:[#allocation2 + $0x80] sm:$0xff] }
 0x1ae   : > { %1461 = vst [vmem:[#allocation2 + $0x2c8] sm:$0xf0] %v1445_v10  ;;  %1462 = vst [vmem:[#allocation2 + $0x70] sm:$0xf0] %v1446_v27  ;;  %649 = vrot.lane.b32.xlu0 %v4878_v42, %s4388_s12  ;;  %v1895_v33 = vpack.c.bf16 %v1823_v30, %v1815_v5  ;;  %v1894_v21 = vpack.c.bf16 %v1822_v62, %v1814_v31 }
 0x1af   : > { %651 = vrot.lane.b32.xlu1 %v625_v59, %s4388_s12 }
 0x1b0   : > { %v1492_v52 = vpop.permute.xlu0 %1491  ;;  %v1494_v22 = vpop.permute.xlu1 %1493  ;;  %2030 = vmatprep.subr.bf16.mxu0 %v1895_v33 }
 0x1b1   : > { %v1501_v25 = vsel %vm538_vm6, %v5321_v11, %v1492_v52  ;;  %v1502_v15 = vsel %vm538_vm6, %v1492_v52, %v1494_v22  ;;  %2031 = vmatpush1.bf16.msra.mxu0 %v1894_v21 }
 0x1b2   : > { %1517 = vst [vmem:[#allocation2 + $0x308] sm:$0xf] %v1501_v25  ;;  %1518 = vst [vmem:[#allocation2 + $0x290] sm:$0xf] %v1502_v15  ;;  %707 = vrot.lane.b32.xlu0 %v4870_v38, %s4389_s13 }
 0x1b3   : > { %709 = vrot.lane.b32.xlu1 %v4336_v23, %s4389_s13 }
 0x1b4   : > { %v1549_v48 = vpop.permute.xlu0 %1548  ;;  %v1551_v40 = vpop.permute.xlu1 %1550 }
 0x1b5   : > { %v1558_v57 = vsel %vm596_vm7, %v5335_v55, %v1549_v48  ;;  %v1559_v11 = vsel %vm596_vm7, %v1549_v48, %v1551_v40  ;;  %v4338_v55 = vld [vmem:[%s4461_s11 + $0x20] ss:$0 sps:$4 sm:$0xff]   ;;  %v1833_v3 = vld [vmem:[#allocation2 + $0x70] sm:$0xff]  ;;  %v1832_v60 = vld [vmem:[#allocation2 + $0x2c8] sm:$0xff] }
 0x1b6   : > { %1574 = vst [vmem:[#allocation2 + $0x308] sm:$0xf0] %v1558_v57  ;;  %1575 = vst [vmem:[#allocation2 + $0x290] sm:$0xf0] %v1559_v11  ;;  %362 = vrot.lane.b32.xlu0 %v4870_v38, %s4395_s19 }
 0x1b7   : > { %364 = vrot.lane.b32.xlu1 %v4337_v17, %s4395_s19 }
 0x1b8   : > { %v955_v16 = vpop.permute.xlu0 %954  ;;  %v5427_v2 = vpop.permute.xlu1 %956 }
 0x1b9   : > { %v966_v54 = vsel %vm481_vm4, %v4984_v14, %v955_v16  ;;  %v967_v34 = vsel %vm481_vm4, %v955_v16, %v5427_v2 }
 0x1ba   : > { %982 = vst [vmem:[#allocation2 + $0x2e8] sm:$0xf] %v966_v54  ;;  %983 = vst [vmem:[#allocation2 + $0x208] sm:$0xf] %v967_v34  ;;  %419 = vrot.lane.b32.xlu0 %v4878_v42, %s4391_s15 }
 0x1bb   : > { %421 = vrot.lane.b32.xlu1 %v395_v61, %s4391_s15 }
 0x1bc   : > { %v1012_v46 = vpop.permute.xlu0 %1011  ;;  %v5437_v51 = vpop.permute.xlu1 %1013 }
 0x1bd   : > { %v1023_v28 = vsel %vm538_vm6, %v4994_v58, %v1012_v46  ;;  %v1024_v14 = vsel %vm538_vm6, %v1012_v46, %v5437_v51  ;;  %v1841_v47 = vld [vmem:[#allocation2 + $0x290] sm:$0xff]  ;;  %v1840_v63 = vld [vmem:[#allocation2 + $0x308] sm:$0xff] }
 0x1be   : > { %1039 = vst [vmem:[#allocation2 + $0x2e8] sm:$0xf0] %v1023_v28  ;;  %1040 = vst [vmem:[#allocation2 + $0x208] sm:$0xf0] %v1024_v14  ;;  %477 = vrot.lane.b32.xlu0 %v4870_v38, %s4392_s16  ;;  %v1905_v42 = vpack.c.bf16 %v1841_v47, %v1833_v3  ;;  %v1904_v49 = vpack.c.bf16 %v1840_v63, %v1832_v60 }
 0x1bf   : > { %479 = vrot.lane.b32.xlu1 %v4338_v55, %s4392_s16 }
 0x1c0   : > { %v1068_v1 = vpop.permute.xlu0 %1067  ;;  %v5446_v41 = vpop.permute.xlu1 %1069  ;;  %2069 = vmatprep.subr.bf16.mxu1 %v1905_v42 }
 0x1c1   : > { %v1079_v58 = vsel %vm596_vm7, %v5004_v0, %v1068_v1  ;;  %v1080_v56 = vsel %vm596_vm7, %v1068_v1, %v5446_v41  ;;  %2070 = vmatpush1.bf16.msra.mxu1 %v1904_v49 }
 0x1c2   : > { %1095 = vst [vmem:[#allocation2 + $0x138] sm:$0xf] %v1079_v58  ;;  %1096 = vst [vmem:[#allocation2 + $0x2c0] sm:$0xf] %v1080_v56 }
 0x1c4   : > { %v1125_v13 = vpop.permute.xlu0 %1124  ;;  %v5452_v7 = vpop.permute.xlu1 %1126 }
 0x1c5   : > { %v1136_v38 = vsel %vm653_vm1, %v5014_v12, %v1125_v13  ;;  %v1137_v39 = vsel %vm653_vm1, %v1125_v13, %v5452_v7  ;;  %v1799_v5 = vld [vmem:[#allocation2 + $0x208] sm:$0xff] }
 0x1c6   : > { %1152 = vst [vmem:[#allocation2 + $0x138] sm:$0xf0] %v1136_v38  ;;  %1153 = vst [vmem:[#allocation2 + $0x2c0] sm:$0xf0] %v1137_v39  ;;  %v1798_v30 = vld [vmem:[#allocation2 + $0x2e8] sm:$0xff] }
 0x1c8   : > { %v1185_v6 = vpop.permute.xlu0 %1184  ;;  %v1187_v9 = vpop.permute.xlu1 %1186 }
 0x1c9   : > { %v1194_v0 = vsel %vm711_vm0, %v5365_v35, %v1185_v6  ;;  %v1195_v59 = vsel %vm711_vm0, %v1185_v6, %v1187_v9 }
 0x1ca   : > { %1210 = vst [vmem:[#allocation2 + $0xc0] sm:$0xf] %v1194_v0  ;;  %1211 = vst [vmem:[#allocation2 + $0x128] sm:$0xf] %v1195_v59 }
 0x1cc   : > { %v1242_v24 = vpop.permute.xlu0 %1241  ;;  %v1244_v4 = vpop.permute.xlu1 %1243 }
 0x1cd   : > { %v1251_v12 = vsel %vm768_vm2, %v5375_v36, %v1242_v24  ;;  %v1252_v10 = vsel %vm768_vm2, %v1242_v24, %v1244_v4  ;;  %v1807_v27 = vld [vmem:[#allocation2 + $0x2c0] sm:$0xff]  ;;  %v1806_v31 = vld [vmem:[#allocation2 + $0x138] sm:$0xff] }
 0x1ce   : > { %1267 = vst [vmem:[#allocation2 + $0xc0] sm:$0xf0] %v1251_v12  ;;  %1268 = vst [vmem:[#allocation2 + $0x128] sm:$0xf0] %v1252_v10  ;;  %v1887_v62 = vpack.c.bf16 %v1807_v27, %v1799_v5  ;;  %v1886_v33 = vpack.c.bf16 %v1806_v31, %v1798_v30 }
 0x1d0   : > { %v1323_v35 = vpop.permute.xlu0 %1322  ;;  %v1325_v21 = vpop.permute.xlu1 %1324  ;;  %2032 = vmatprep.subr.bf16.mxu0 %v1887_v62 }
 0x1d1   : > { %v1332_v23 = vsel %vm366_vm8, %v5386_v8, %v1323_v35  ;;  %v1333_v52 = vsel %vm366_vm8, %v1323_v35, %v1325_v21  ;;  %2033 = vmatpush1.bf16.msra.mxu0 %v1886_v33 }
 0x1d2   : > { %1348 = vst [vmem:[#allocation2 + $0x160] sm:$0xf0] %v1332_v23  ;;  %1349 = vst [vmem:[#allocation2 + $0x60] sm:$0xf0] %v1333_v52 }
 0x1d4   : > { %v761_v36 = vpop.permute.xlu0 %760  ;;  %v5467_v22 = vpop.permute.xlu1 %762 }
 0x1d5   : > { %v773_v25 = vsel %vm768_vm2, %v5092_v43, %v761_v36  ;;  %v774_v15 = vsel %vm768_vm2, %v761_v36, %v5467_v22  ;;  %v1817_v8 = vld [vmem:[#allocation2 + $0x128] sm:$0xff]  ;;  %v1816_v61 = vld [vmem:[#allocation2 + $0xc0] sm:$0xff] }
 0x1d6   : > { %789 = vst [vmem:[#allocation2 + $0x98] sm:$0xf] %v773_v25  ;;  %790 = vst [vmem:[#allocation2 + $0xa0] sm:$0xf] %v774_v15 }
 0x1d8   : > { %v842_v17 = vpop.permute.xlu0 %841  ;;  %v5473_v48 = vpop.permute.xlu1 %843 }
 0x1d9   : > { %v853_v40 = vsel %vm366_vm8, %v5102_v29, %v842_v17  ;;  %v854_v57 = vsel %vm366_vm8, %v842_v17, %v5473_v48  ;;  %v1825_v11 = vld [vmem:[#allocation2 + $0x60] sm:$0xff] }
 0x1da   : > { %v1824_v16 = vld [vmem:[#allocation2 + $0x160] sm:$0xff]  ;;  %869 = vst [vmem:[#allocation2 + $0x248] sm:$0xf] %v853_v40  ;;  %870 = vst [vmem:[#allocation2 + $0x340] sm:$0xf] %v854_v57  ;;  %v1897_v43 = vpack.c.bf16 %v1825_v11, %v1817_v8 }
 0x1db   : > { %v1896_v54 = vpack.c.bf16 %v1824_v16, %v1816_v61 }
 0x1dc   : > { %v899_v34 = vpop.permute.xlu0 %898  ;;  %v5479_v55 = vpop.permute.xlu1 %900  ;;  %2071 = vmatprep.subr.bf16.mxu1 %v1897_v43 }
 0x1dd   : > { %v910_v46 = vsel %vm423_vm3, %v5112_v26, %v899_v34  ;;  %v911_v29 = vsel %vm423_vm3, %v899_v34, %v5479_v55  ;;  %2072 = vmatpush1.bf16.msra.mxu1 %v1896_v54  ;;  %v1783_v42 = vld [vmem:[#allocation2 + $0xa0] sm:$0xff]  ;;  %v1782_v58 = vld [vmem:[#allocation2 + $0x98] sm:$0xff] }
 0x1de   : > { %926 = vst [vmem:[#allocation2 + $0x248] sm:$0xf0] %v910_v46  ;;  %927 = vst [vmem:[#allocation2 + $0x340] sm:$0xf0] %v911_v29 }
 0x1e0   : > { %v959_v3 = vpop.permute.xlu0 %958  ;;  %v961_v28 = vpop.permute.xlu1 %960 }
 0x1e1   : > { %v968_v14 = vsel %vm481_vm4, %v5427_v2, %v959_v3  ;;  %v969_v47 = vsel %vm481_vm4, %v959_v3, %v961_v28 }
 0x1e2   : > { %984 = vst [vmem:[#allocation2 + $0x2f8] sm:$0xf] %v968_v14  ;;  %985 = vst [vmem:[#allocation2 + $0x268] sm:$0xf] %v969_v47 }
 0x1e4   : > { %v1016_v60 = vpop.permute.xlu0 %1015  ;;  %v1018_v63 = vpop.permute.xlu1 %1017 }
 0x1e5   : > { %v1025_v26 = vsel %vm538_vm6, %v5437_v51, %v1016_v60  ;;  %v1026_v49 = vsel %vm538_vm6, %v1016_v60, %v1018_v63  ;;  %v1791_v1 = vld [vmem:[#allocation2 + $0x340] sm:$0xff]  ;;  %v1790_v56 = vld [vmem:[#allocation2 + $0x248] sm:$0xff] }
 0x1e6   : > { %1041 = vst [vmem:[#allocation2 + $0x2f8] sm:$0xf0] %v1025_v26  ;;  %1042 = vst [vmem:[#allocation2 + $0x268] sm:$0xf0] %v1026_v49  ;;  %v1879_v13 = vpack.c.bf16 %v1791_v1, %v1783_v42  ;;  %v1878_v38 = vpack.c.bf16 %v1790_v56, %v1782_v58 }
 0x1e8   : > { %v1072_v2 = vpop.permute.xlu0 %1071  ;;  %v1074_v39 = vpop.permute.xlu1 %1073  ;;  %2034 = vmatprep.subr.bf16.mxu0 %v1879_v13 }
 0x1e9   : > { %v1081_v6 = vsel %vm596_vm7, %v5446_v41, %v1072_v2  ;;  %v1082_v9 = vsel %vm596_vm7, %v1072_v2, %v1074_v39  ;;  %2035 = vmatpush1.bf16.msra.mxu0 %v1878_v38 }
 0x1ea   : > { %1097 = vst [vmem:[#allocation2 + $0xe8] sm:$0xf] %v1081_v6  ;;  %1098 = vst [vmem:[#allocation2 + $0x1d8] sm:$0xf] %v1082_v9 }
 0x1ec   : > { %v1129_v51 = vpop.permute.xlu0 %1128  ;;  %v1131_v0 = vpop.permute.xlu1 %1130 }
 0x1ed   : > { %v1138_v59 = vsel %vm653_vm1, %v5452_v7, %v1129_v51  ;;  %v1139_v24 = vsel %vm653_vm1, %v1129_v51, %v1131_v0  ;;  %v1801_v30 = vld [vmem:[#allocation2 + $0x268] sm:$0xff]  ;;  %v1800_v33 = vld [vmem:[#allocation2 + $0x2f8] sm:$0xff] }
 0x1ee   : > { %1154 = vst [vmem:[#allocation2 + $0xe8] sm:$0xf0] %v1138_v59  ;;  %1155 = vst [vmem:[#allocation2 + $0x1d8] sm:$0xf0] %v1139_v24 }
 0x1f0   : > { %v531_v4 = vpop.permute.xlu0 %530  ;;  %v5497_v5 = vpop.permute.xlu1 %532 }
 0x1f1   : > { %v543_v41 = vsel %vm538_vm6, %v5178_v45, %v531_v4  ;;  %v544_v12 = vsel %vm538_vm6, %v531_v4, %v5497_v5 }
 0x1f2   : > { %559 = vst [vmem:[#allocation2 + $0x1a8] sm:$0xf] %v543_v41  ;;  %560 = vst [vmem:[#allocation2 + $0x158] sm:$0xf] %v544_v12 }
 0x1f4   : > { %v589_v10 = vpop.permute.xlu0 %588  ;;  %v5503_v27 = vpop.permute.xlu1 %590 }
 0x1f5   : > { %v601_v7 = vsel %vm596_vm7, %v5188_v37, %v589_v10  ;;  %v602_v31 = vsel %vm596_vm7, %v589_v10, %v5503_v27  ;;  %v1809_v62 = vld [vmem:[#allocation2 + $0x1d8] sm:$0xff]  ;;  %v1808_v35 = vld [vmem:[#allocation2 + $0xe8] sm:$0xff] }
 0x1f6   : > { %617 = vst [vmem:[#allocation2 + $0x1a8] sm:$0xf0] %v601_v7  ;;  %618 = vst [vmem:[#allocation2 + $0x158] sm:$0xf0] %v602_v31  ;;  %v1889_v45 = vpack.c.bf16 %v1809_v62, %v1801_v30  ;;  %v1888_v21 = vpack.c.bf16 %v1808_v35, %v1800_v33 }
 0x1f8   : > { %v646_v23 = vpop.permute.xlu0 %645  ;;  %v5509_v52 = vpop.permute.xlu1 %647  ;;  %2073 = vmatprep.subr.bf16.mxu1 %v1889_v45 }
 0x1f9   : > { %v658_v36 = vsel %vm653_vm1, %v5198_v53, %v646_v23  ;;  %v659_v37 = vsel %vm653_vm1, %v646_v23, %v5509_v52  ;;  %2074 = vmatpush1.bf16.msra.mxu1 %v1888_v21 }
 0x1fa   : > { %674 = vst [vmem:[#allocation2 + $0xe0] sm:$0xf] %v658_v36  ;;  %675 = vst [vmem:[#allocation2 + $0x130] sm:$0xf] %v659_v37 }
 0x1fc   : > { %v704_v25 = vpop.permute.xlu0 %703 }
 0x1fd   : > { %v5515_v15 = vpop.permute.xlu1 %705  ;;  %v716_v17 = vsel %vm711_vm0, %v5207_v18, %v704_v25  ;;  %v1767_v43 = vld [vmem:[#allocation2 + $0x158] sm:$0xff]  ;;  %v1766_v46 = vld [vmem:[#allocation2 + $0x1a8] sm:$0xff] }
 0x1fe   : > { %v717_v8 = vsel %vm711_vm0, %v704_v25, %v5515_v15  ;;  %732 = vst [vmem:[#allocation2 + $0xe0] sm:$0xf0] %v716_v17 }
 0x1ff   : > { %733 = vst [vmem:[#allocation2 + $0x130] sm:$0xf0] %v717_v8 }
 0x200   : > { %v765_v40 = vpop.permute.xlu0 %764 }
 0x201   : > { %v767_v57 = vpop.permute.xlu1 %766  ;;  %v775_v53 = vsel %vm768_vm2, %v5467_v22, %v765_v40 }
 0x202   : > { %v776_v11 = vsel %vm768_vm2, %v765_v40, %v767_v57  ;;  %791 = vst [vmem:[#allocation2 + $0x320] sm:$0xf] %v775_v53 }
 0x203   : > { %792 = vst [vmem:[#allocation2 + $0xf0] sm:$0xf] %v776_v11 }
 0x204   : > { %v846_v61 = vpop.permute.xlu0 %845 }
 0x205   : > { %v848_v16 = vpop.permute.xlu1 %847  ;;  %v855_v18 = vsel %vm366_vm8, %v5473_v48, %v846_v61  ;;  %v1774_v29 = vld [vmem:[#allocation2 + $0xe0] sm:$0xff] }
 0x206   : > { %v856_v54 = vsel %vm366_vm8, %v846_v61, %v848_v16  ;;  %v1775_v34 = vld [vmem:[#allocation2 + $0x130] sm:$0xff]  ;;  %871 = vst [vmem:[#allocation2 + $0x2a8] sm:$0xf] %v855_v18  ;;  %v1870_v28 = vpack.c.bf16 %v1774_v29, %v1766_v46 }
 0x207   : > { %872 = vst [vmem:[#allocation2 + $0x310] sm:$0xf] %v856_v54  ;;  %v1871_v3 = vpack.c.bf16 %v1775_v34, %v1767_v43 }
 0x208   : > { %v903_v22 = vpop.permute.xlu0 %902 }
 0x209   : > { %v905_v14 = vpop.permute.xlu1 %904  ;;  %2036 = vmatprep.subr.bf16.mxu0 %v1871_v3  ;;  %v912_v47 = vsel %vm423_vm3, %v5479_v55, %v903_v22  ;;  %v1784_v38 = vld [vmem:[#allocation2 + $0x320] sm:$0xff] }
 0x20a   : > { %v913_v60 = vsel %vm423_vm3, %v903_v22, %v905_v14  ;;  %2037 = vmatpush1.bf16.msra.mxu0 %v1870_v28  ;;  %928 = vst [vmem:[#allocation2 + $0x2a8] sm:$0xf0] %v912_v47  ;;  %v1785_v55 = vld [vmem:[#allocation2 + $0xf0] sm:$0xff]  ;;  %v5577_v28 = vld [vmem:[%s6868_s7] sm:$0xff] }
 0x20b   : > { %929 = vst [vmem:[#allocation2 + $0x310] sm:$0xf0] %v913_v60 }
 0x20c   : > { %v359_v48 = vpop.permute.xlu0 %358 }
 0x20d   : > { %v5530_v63 = vpop.permute.xlu1 %360  ;;  %v371_v42 = vsel %vm366_vm8, %v5225_v20, %v359_v48 }
 0x20e   : > { %v372_v26 = vsel %vm366_vm8, %v359_v48, %v5530_v63  ;;  %387 = vst [vmem:[#allocation2 + $0x360] sm:$0xf0] %v371_v42 }
 0x20f   : > { %388 = vst [vmem:[#allocation2 + $0x328] sm:$0xf0] %v372_v26 }
 0x210   : > { %v416_v49 = vpop.permute.xlu0 %415 }
 0x211   : > { %v5536_v1 = vpop.permute.xlu1 %417  ;;  %v428_v58 = vsel %vm423_vm3, %v5236_v32, %v416_v49  ;;  %v1792_v2 = vld [vmem:[#allocation2 + $0x2a8] sm:$0xff] }
 0x212   : > { %v429_v56 = vsel %vm423_vm3, %v416_v49, %v5536_v1  ;;  %v1793_v13 = vld [vmem:[#allocation2 + $0x310] sm:$0xff]  ;;  %444 = vst [vmem:[#allocation2 + $0x148] sm:$0xf] %v428_v58  ;;  %v1880_v39 = vpack.c.bf16 %v1792_v2, %v1784_v38 }
 0x213   : > { %445 = vst [vmem:[#allocation2 + $0x100] sm:$0xf] %v429_v56  ;;  %v1881_v20 = vpack.c.bf16 %v1793_v13, %v1785_v55 }
 0x214   : > { %v474_v6 = vpop.permute.xlu0 %473 }
 0x215   : > { %v5542_v9 = vpop.permute.xlu1 %475  ;;  %2075 = vmatprep.subr.bf16.mxu1 %v1881_v20  ;;  %v486_v51 = vsel %vm481_vm4, %v5246_v50, %v474_v6  ;;  %v1750_v31 = vld [vmem:[#allocation2 + $0x360] sm:$0xff] }
 0x216   : > { %v487_v32 = vsel %vm481_vm4, %v474_v6, %v5542_v9  ;;  %2076 = vmatpush1.bf16.msra.mxu1 %v1880_v39  ;;  %502 = vst [vmem:[#allocation2 + $0x148] sm:$0xf0] %v486_v51  ;;  %v1751_v10 = vld [vmem:[#allocation2 + $0x328] sm:$0xff] }
 0x217   : > { %503 = vst [vmem:[#allocation2 + $0x100] sm:$0xf0] %v487_v32 }
 0x218   : > { %v535_v0 = vpop.permute.xlu0 %534 }
 0x219   : > { %v537_v59 = vpop.permute.xlu1 %536  ;;  %v545_v24 = vsel %vm538_vm6, %v5497_v5, %v535_v0 }
 0x21a   : > { %v546_v4 = vsel %vm538_vm6, %v535_v0, %v537_v59  ;;  %561 = vst [vmem:[#allocation2 + $0x2e0] sm:$0xf] %v545_v24 }
 0x21b   : > { %562 = vst [vmem:[#allocation2 + $0x278] sm:$0xf] %v546_v4 }
 0x21c   : > { %v593_v41 = vpop.permute.xlu0 %592 }
 0x21d   : > { %v595_v12 = vpop.permute.xlu1 %594  ;;  %v603_v50 = vsel %vm596_vm7, %v5503_v27, %v593_v41  ;;  %v1758_v62 = vld [vmem:[#allocation2 + $0x148] sm:$0xff] }
 0x21e   : > { %v604_v30 = vsel %vm596_vm7, %v593_v41, %v595_v12  ;;  %v1759_v7 = vld [vmem:[#allocation2 + $0x100] sm:$0xff]  ;;  %619 = vst [vmem:[#allocation2 + $0x2e0] sm:$0xf0] %v603_v50  ;;  %v1862_v35 = vpack.c.bf16 %v1758_v62, %v1750_v31 }
 0x21f   : > { %620 = vst [vmem:[#allocation2 + $0x278] sm:$0xf0] %v604_v30  ;;  %v1863_v33 = vpack.c.bf16 %v1759_v7, %v1751_v10 }
 0x220   : > { %v650_v5 = vpop.permute.xlu0 %649 }
 0x221   : > { %v652_v45 = vpop.permute.xlu1 %651  ;;  %2038 = vmatprep.subr.bf16.mxu0 %v1863_v33  ;;  %v660_v21 = vsel %vm653_vm1, %v5509_v52, %v650_v5  ;;  %v2122_v52 = vlaneseq }
 0x222   : > { %v661_v23 = vsel %vm653_vm1, %v650_v5, %v652_v45  ;;  %2039 = vmatpush1.bf16.msra.mxu0 %v1862_v35  ;;  %676 = vst [vmem:[#allocation2 + $0x1e8] sm:$0xf] %v660_v21 }
 0x223   : > { %677 = vst [vmem:[#allocation2 + $0x38] sm:$0xf] %v661_v23  ;;  %v5566_v53 = vshrl.u32 %v2122_v52, 7 }
 0x224   : > { %v708_v27 = vpop.permute.xlu0 %707 }
 0x225   : > { %v710_v36 = vpop.permute.xlu1 %709  ;;  %4266 = vmatmul.mubr.msk.bf16.vlgmr.msra.gmra.mxu0 %vm653_vm1, %v5251_v19  ;;  %v718_v37 = vsel %vm711_vm0, %v5515_v15, %v708_v27  ;;  %v1768_v54 = vld [vmem:[#allocation2 + $0x2e0] sm:$0xff]  ;;  %v5572_v3 = vsub.s32 0, %v5566_v53  ;;  %v2128_v47 = vsub.s32 1, %v5566_v53  ;;  %v2132_v0 = vsub.s32 2, %v5566_v53 }
 0x226   : > { %v719_v25 = vsel %vm711_vm0, %v708_v27, %v710_v36  ;;  %3873 = vmatprep.mubr.bf16.mxu0 %v4397_v44  ;;  %734 = vst [vmem:[#allocation2 + $0x1e8] sm:$0xf0] %v718_v37  ;;  %v1769_v61 = vld [vmem:[#allocation2 + $0x278] sm:$0xff]  ;;  %v2136_v59 = vsub.s32 3, %v5566_v53 }
 0x227   : > { %735 = vst [vmem:[#allocation2 + $0x38] sm:$0xf0] %v719_v25  ;;  %v2129_v49 = vrot.slane %v5577_v28, %v2128_v47  ;;  %v2133_v24 = vrot.slane %v5577_v28, %v2132_v0 }
 0x228   : > { %v363_v17 = vpop.permute.xlu0 %362  ;;  %v2137_v12 = vrot.slane %v5577_v28, %v2136_v59 }
 0x229   : > { %v365_v8 = vpop.permute.xlu1 %364  ;;  %v373_v40 = vsel %vm366_vm8, %v5530_v63, %v363_v17  ;;  %v2125_v63 = vrot.slane %v5577_v28, %v5572_v3 }
 0x22a   : > { %v374_v57 = vsel %vm366_vm8, %v363_v17, %v365_v8  ;;  %389 = vst [vmem:[#allocation2 + $0x40] sm:$0xf0] %v373_v40 }
 0x22b   : > { %390 = vst [vmem:[#allocation2 + $0x378] sm:$0xf0] %v374_v57  ;;  %v2140_v57 = vsub.s32 4, %v5566_v53 }
 0x22c   : > { %v420_v11 = vpop.permute.xlu0 %419 }
 0x22d   : > { %v422_v15 = vpop.permute.xlu1 %421  ;;  %v430_v16 = vsel %vm423_vm3, %v5536_v1, %v420_v11  ;;  %v1776_v34 = vld [vmem:[#allocation2 + $0x1e8] sm:$0xff] }
 0x22e   : > { %v431_v43 = vsel %vm423_vm3, %v420_v11, %v422_v15  ;;  %v1777_v18 = vld [vmem:[#allocation2 + $0x38] sm:$0xff]  ;;  %446 = vst [vmem:[#allocation2 + $0x58] sm:$0xf] %v430_v16  ;;  %v1872_v29 = vpack.c.bf16 %v1776_v34, %v1768_v54  ;;  %v2144_v11 = vsub.s32 5, %v5566_v53  ;;  %v2141_v15 = vrot.slane %v5577_v28, %v2140_v57 }
 0x22f   : > { %447 = vst [vmem:[#allocation2 + $0x2d8] sm:$0xf] %v431_v43  ;;  %v1873_v46 = vpack.c.bf16 %v1777_v18, %v1769_v61 }
 0x230   : > { %v478_v22 = vpop.permute.xlu0 %477  ;;  %v2145_v43 = vrot.slane %v5577_v28, %v2144_v11 }
 0x231   : > { %v480_v14 = vpop.permute.xlu1 %479  ;;  %2077 = vmatprep.subr.bf16.mxu1 %v1873_v46  ;;  %v488_v60 = vsel %vm481_vm4, %v5542_v9, %v478_v22  ;;  %v1752_v20 = vld [vmem:[#allocation2 + $0x40] sm:$0xff] }
 0x232   : > { %v489_v48 = vsel %vm481_vm4, %v478_v22, %v480_v14  ;;  %2078 = vmatpush1.bf16.msra.mxu1 %v1872_v29  ;;  %504 = vst [vmem:[#allocation2 + $0x58] sm:$0xf0] %v488_v60  ;;  %v1753_v13 = vld [vmem:[#allocation2 + $0x378] sm:$0xff]  ;;  %v2148_v60 = vsub.s32 6, %v5566_v53 }
 0x233   : > { %505 = vst [vmem:[#allocation2 + $0x2d8] sm:$0xf0] %v489_v48  ;;  %v1976_v42 = vpop.f32.mrf.mxu0  ;;  %v2152_v48 = vsub.s32 7, %v5566_v53 }
 0x234   : > { %v2106_v26 = vmax.f32 %v1976_v42, 0.0 }
 0x235   : > { %v1978_v1 = vpop.f32.mrf.mxu0 }
 0x236   : > { %v2162_v55 = vmul.f32 %v2125_v63, %v2106_v26  ;;  %v2107_v58 = vmax.f32 %v1978_v1, 0.0  ;;  %v2153_v1 = vrot.slane %v5577_v28, %v2152_v48 }
 0x237   : > { %v1980_v56 = vpop.f32.mrf.mxu0 }
 0x238   : > { %v2163_v38 = vmul.f32 %v2129_v49, %v2107_v58  ;;  %v2149_v49 = vrot.slane %v5577_v28, %v2148_v60 }
 0x239   : > { %v1760_v39 = vld [vmem:[#allocation2 + $0x58] sm:$0xff]  ;;  %v1981_v6 = vpop.f32.mrf.mxu0 }
 0x23a   : > { %v1761_v2 = vld [vmem:[#allocation2 + $0x2d8] sm:$0xff]  ;;  %v1864_v51 = vpack.c.bf16 %v1760_v39, %v1752_v20  ;;  %v2178_v32 = vcombine.low %v2162_v55, %v2163_v38 }
 0x23b   : > { %v1865_v9 = vpack.c.bf16 %v1761_v2, %v1753_v13 }
 0x23c   : > { %2182 = vrot.lane.b32.xlu0 %v2178_v32, %s4398_s24 }
 0x23d   : > { %2079 = vmatprep.subr.bf16.mxu1 %v1865_v9 }
 0x23e   : > { %2080 = vmatpush1.bf16.msra.mxu1 %v1864_v51 }
 0x240   : > { %v2017_v4 = vpop.f32.mrf.mxu1 }
 0x241   : > { %4268 = vmatmul.mubr.msk.bf16.vlgmr.msra.gmra.mxu1 %vm653_vm1, %v5251_v19  ;;  %v2108_v41 = vmax.f32 %v2017_v4, 0.0 }
 0x242   : > { %3914 = vmatprep.mubr.bf16.mxu1 %v4397_v44  ;;  %v2019_v10 = vpop.f32.mrf.mxu1 }
 0x243   : > { %v2164_v50 = vmul.f32 %v2133_v24, %v2108_v41  ;;  %v2109_v30 = vmax.f32 %v2019_v10, 0.0 }
 0x244   : > { %v2021_v7 = vpop.f32.mrf.mxu1 }
 0x245   : > { %v2165_v31 = vmul.f32 %v2137_v12, %v2109_v30 }
 0x246   : > { %v2022_v62 = vpop.f32.mrf.mxu1 }
 0x247   : > { %v2179_v33 = vcombine.low %v2164_v50, %v2165_v31 }
 0x249   : > { %2184 = vrot.lane.b32.xlu1 %v2179_v33, %s4398_s24 }
 0x2ae   : > { %v2183_v19 = vpop.permute.xlu0 %2182 }
 0x2af   : > { %v2190_v35 = vrot.slane %v2183_v19, 4 }
 0x2b1   : > { %v2195_v5 = vsel %vm2194_vm11, %v2190_v35, %v2183_v19 }
 0x2b2   : > { %2211 = vst.msk [vmem:[#allocation3 + $0x4] sm:$0xff] %vm2210_vm12, %v2195_v5 }
 0x2b9   : > { %v5602_v45 = vld [vmem:[#allocation3] sm:$0xff] }
 0x2ba   : > { %v5604_v21 = vld [vmem:[#allocation3 + $0x4] sm:$0xff]  ;;  %v5608_v23 = vcombine.high %v5602_v45, %v5602_v45  ;;  %2233 = vst [vmem:[#allocation2 + $0x2b0] sm:$0xf] %v5602_v45 }
 0x2bb   : > { %v5613_v27 = vcombine.low %v5604_v21, %v5604_v21  ;;  %2710 = vst [vmem:[#allocation2 + $0x298] sm:$0xf0] %v5604_v21  ;;  %v5616_v36 = vpop.permute.xlu1 %2184  ;;  %v5695_v28 = vcombine.high %v5604_v21, %v5604_v21 }
 0x2bc   : > { %v2191_v37 = vrot.slane %v5616_v36, 4  ;;  %2234 = vst [vmem:[#allocation2 + $0xd0] sm:$0xf] %v5608_v23 }
 0x2bd   : > { %2709 = vst [vmem:[#allocation2 + $0xd8] sm:$0xf0] %v5613_v27 }
 0x2be   : > { %v2197_v25 = vsel %vm2196_vm13, %v2190_v35, %v2191_v37 }
 0x2bf   : > { %v5626_v52 = vsel %vm2194_vm11, %v2197_v25, %v5616_v36 }
 0x2c0   : > { %2212 = vst [vmem:[#allocation3 + $0xc] sm:$0xff] %v5626_v52  ;;  %v5631_v17 = vcombine.low %v5626_v52, %v5626_v52  ;;  %2712 = vst [vmem:[#allocation2 + $0x170] sm:$0xf0] %v5626_v52 }
 0x2c2   : > { %2711 = vst [vmem:[#allocation2 + $0xb8] sm:$0xf0] %v5631_v17 }
 0x2c7   : > { %v5635_v8 = vld [vmem:[#allocation3 + $0x8] sm:$0xff] }
 0x2c8   : > { %v5639_v40 = vcombine.high %v5635_v8, %v5635_v8  ;;  %2235 = vst [vmem:[#allocation2 + $0x10] sm:$0xf] %v5635_v8  ;;  %3185 = vst [vmem:[#allocation2 + $0x30] sm:$0xf] %v5635_v8  ;;  %v5664_v63 = vcombine.low %v5635_v8, %v5635_v8 }
 0x2ca   : > { %2236 = vst [vmem:[#allocation2 + $0x48] sm:$0xf] %v5639_v40  ;;  %3186 = vst [vmem:[#allocation2 + $0x210] sm:$0xf] %v5639_v40 }
 0x2e5   : > { %v2058_v61 = vpop.f32.mrf.mxu0 }
 0x2e6   : > { %v2110_v16 = vmax.f32 %v2058_v61, 0.0 }
 0x2e7   : > { %v2060_v18 = vpop.f32.mrf.mxu0 }
 0x2e8   : > { %v2166_v54 = vmul.f32 %v2141_v15, %v2110_v16  ;;  %v2111_v34 = vmax.f32 %v2060_v18, 0.0 }
 0x2e9   : > { %v2062_v46 = vpop.f32.mrf.mxu0 }
 0x2ea   : > { %v2167_v29 = vmul.f32 %v2145_v43, %v2111_v34 }
 0x2eb   : > { %v2063_v22 = vpop.f32.mrf.mxu0 }
 0x2ec   : > { %v2180_v14 = vcombine.low %v2166_v54, %v2167_v29 }
 0x2ee   : > { %2186 = vrot.lane.b32.xlu0 %v2180_v14, %s4398_s24 }
 0x2f2   : > { %3490 = vrot.lane.b32.xlu0 %v5635_v8, %s4388_s12 }
 0x2f6   : > { %3549 = vrot.lane.b32.xlu0 %v5635_v8, %s4389_s13 }
 0x2fa   : > { %3603 = vrot.lane.b32.xlu0 %v5635_v8, %s4390_s14 }
 0x2fe   : > { %3074 = vrot.lane.b32.xlu0 %v5626_v52, %s4389_s13 }
 0x301   : > { %v2099_v42 = vpop.f32.mrf.mxu1 }
 0x302   : > { %v2112_v26 = vmax.f32 %v2099_v42, 0.0  ;;  %3321 = vrot.lane.b32.xlu0 %v5664_v63, %s4392_s16 }
 0x303   : > { %v2101_v55 = vpop.f32.mrf.mxu1 }
 0x304   : > { %v2113_v58 = vmax.f32 %v2101_v55, 0.0  ;;  %v2168_v13 = vmul.f32 %v2149_v49, %v2112_v26 }
 0x305   : > { %v2103_v56 = vpop.f32.mrf.mxu1 }
 0x306   : > { %v2169_v38 = vmul.f32 %v2153_v1, %v2113_v58  ;;  %3434 = vrot.lane.b32.xlu0 %v5664_v63, %s4394_s18 }
 0x307   : > { %v2104_v2 = vpop.f32.mrf.mxu1 }
 0x308   : > { %v2181_v20 = vcombine.low %v2168_v13, %v2169_v38 }
 0x30a   : > { %2188 = vrot.lane.b32.xlu1 %v2181_v20, %s4398_s24  ;;  %3131 = vrot.lane.b32.xlu0 %v5631_v17, %s4390_s14 }
 0x30e   : > { %3129 = vrot.lane.b32.xlu1 %v5604_v21, %s4390_s14 }
 0x312   : > { %3070 = vrot.lane.b32.xlu1 %v5604_v21, %s4389_s13 }
 0x316   : > { %3323 = vrot.lane.b32.xlu1 %v5635_v8, %s4392_s16 }
 0x31a   : > { %3436 = vrot.lane.b32.xlu1 %v5635_v8, %s4394_s18 }
 0x31e   : > { %3264 = vrot.lane.b32.xlu1 %v5635_v8, %s4391_s15 }
 0x322   : > { %3377 = vrot.lane.b32.xlu1 %v5635_v8, %s4393_s17 }
 0x326   : > { %3210 = vrot.lane.b32.xlu1 %v5635_v8, %s4395_s19 }
 0x32a   : > { %3072 = vrot.lane.b32.xlu1 %v5695_v28, %s4389_s13 }
 0x32e   : > { %3492 = vrot.lane.b32.xlu1 %v5639_v40, %s4388_s12 }
 0x332   : > { %3547 = vrot.lane.b32.xlu1 %v5664_v63, %s4389_s13 }
 0x336   : > { %3605 = vrot.lane.b32.xlu1 %v5639_v40, %s4390_s14 }
 0x33a   : > { %3266 = vrot.lane.b32.xlu1 %v5639_v40, %s4391_s15 }
 0x33e   : > { %3379 = vrot.lane.b32.xlu1 %v5639_v40, %s4393_s17 }
 0x360   : > { %v2187_v39 = vpop.permute.xlu0 %2186 }
 0x361   : > { %v2192_v6 = vrot.slane %v2187_v39, 4 }
 0x363   : > { %v2199_v9 = vsel %vm2196_vm13, %v2191_v37, %v2192_v6 }
 0x364   : > { %v5715_v51 = vsel %vm2194_vm11, %v2199_v9, %v2187_v39  ;;  %v5717_v32 = vpop.permute.xlu0 %3490 }
 0x365   : > { %2213 = vst [vmem:[#allocation3 + $0x14] sm:$0xff] %v5715_v51  ;;  %v5722_v24 = vcombine.low %v5715_v51, %v5715_v51  ;;  %2714 = vst [vmem:[#allocation2 + $0xa0] sm:$0xf0] %v5715_v51 }
 0x367   : > { %2713 = vst [vmem:[#allocation2 + $0x98] sm:$0xf0] %v5722_v24 }
 0x368   : > { %v5726_v4 = vpop.permute.xlu0 %3549 }
 0x36c   : > { %v5728_v41 = vld [vmem:[#allocation3 + $0x10] sm:$0xff]  ;;  %v5730_v12 = vpop.permute.xlu0 %3603 }
 0x36d   : > { %3553 = vrot.lane.b32.xlu1 %v5728_v41, %s4389_s13  ;;  %v5736_v10 = vcombine.high %v5728_v41, %v5728_v41  ;;  %2237 = vst [vmem:[#allocation2 + $0x360] sm:$0xf] %v5728_v41  ;;  %3187 = vst [vmem:[#allocation2 + $0x1e0] sm:$0xf] %v5728_v41  ;;  %3494 = vrot.lane.b32.xlu0 %v5728_v41, %s4388_s12  ;;  %v5756_v7 = vcombine.low %v5728_v41, %v5728_v41 }
 0x36f   : > { %2238 = vst [vmem:[#allocation2 + $0x328] sm:$0xf] %v5736_v10  ;;  %3188 = vst [vmem:[#allocation2 + $0x50] sm:$0xf] %v5736_v10 }
 0x370   : > { %v5744_v50 = vpop.permute.xlu0 %3074 }
 0x371   : > { %3607 = vrot.lane.b32.xlu0 %v5728_v41, %s4390_s14  ;;  %3327 = vrot.lane.b32.xlu1 %v5728_v41, %s4392_s16 }
 0x374   : > { %v3322_v30 = vpop.permute.xlu0 %3321 }
 0x375   : > { %3440 = vrot.lane.b32.xlu1 %v5728_v41, %s4394_s18  ;;  %3268 = vrot.lane.b32.xlu0 %v5728_v41, %s4391_s15 }
 0x378   : > { %v3435_v31 = vpop.permute.xlu0 %3434 }
 0x379   : > { %3551 = vrot.lane.b32.xlu1 %v5756_v7, %s4389_s13  ;;  %3381 = vrot.lane.b32.xlu0 %v5728_v41, %s4393_s17 }
 0x37c   : > { %v2189_v62 = vpop.permute.xlu1 %2188  ;;  %v5764_v19 = vpop.permute.xlu0 %3131 }
 0x37d   : > { %v2193_v33 = vrot.slane %v2189_v62, 4  ;;  %3496 = vrot.lane.b32.xlu1 %v5736_v10, %s4388_s12 }
 0x37f   : > { %v2201_v35 = vsel %vm2196_vm13, %v2192_v6, %v2193_v33  ;;  %2216 = vst.msk [vmem:[#allocation3 + $0x24] sm:$0xf] %vm2215_vm14, %v2193_v33 }
 0x380   : > { %v5768_v5 = vsel %vm2194_vm11, %v2201_v35, %v2189_v62  ;;  %v5770_v36 = vpop.permute.xlu1 %3129 }
 0x381   : > { %2214 = vst [vmem:[#allocation3 + $0x1c] sm:$0xff] %v5768_v5  ;;  %v5775_v37 = vcombine.low %v5768_v5, %v5768_v5  ;;  %2716 = vst [vmem:[#allocation2 + $0xf0] sm:$0xf0] %v5768_v5  ;;  %3609 = vrot.lane.b32.xlu1 %v5736_v10, %s4390_s14  ;;  %v3146_v25 = vsel %vm768_vm2, %v5770_v36, %v5764_v19 }
 0x382   : > { %3162 = vst [vmem:[#allocation2 + $0x370] sm:$0xf0] %v3146_v25 }
 0x383   : > { %2715 = vst [vmem:[#allocation2 + $0x320] sm:$0xf0] %v5775_v37 }
 0x384   : > { %v3071_v15 = vpop.permute.xlu1 %3070 }
 0x385   : > { %3270 = vrot.lane.b32.xlu1 %v5736_v10, %s4391_s15 }
 0x388   : > { %v5786_v61 = vld [vmem:[#allocation3 + $0x20] sm:$0xff]  ;;  %v5788_v16 = vld [vmem:[#allocation3 + $0x18] sm:$0xff]  ;;  %v5790_v43 = vpop.permute.xlu1 %3323 }
 0x389   : > { %v5794_v18 = vcombine.high %v5786_v61, %v5786_v61  ;;  %3191 = vst [vmem:[#allocation2 + $0x160] sm:$0xf] %v5786_v61  ;;  %v5799_v54 = vcombine.high %v5788_v16, %v5788_v16  ;;  %2239 = vst [vmem:[#allocation2 + $0x40] sm:$0xf] %v5788_v16  ;;  %3498 = vrot.lane.b32.xlu0 %v5788_v16, %s4388_s12  ;;  %3383 = vrot.lane.b32.xlu1 %v5736_v10, %s4393_s17 }
 0x38a   : > { %3189 = vst [vmem:[#allocation2 + $0x80] sm:$0xf] %v5788_v16  ;;  %v3339_v34 = vsel %vm481_vm4, %v3322_v30, %v5790_v43  ;;  %v3544_v55 = vcombine.low %v5788_v16, %v5788_v16 }
 0x38b   : > { %3192 = vst [vmem:[#allocation2 + $0x60] sm:$0xf] %v5794_v18  ;;  %2240 = vst [vmem:[#allocation2 + $0x378] sm:$0xf] %v5799_v54 }
 0x38c   : > { %3190 = vst [vmem:[#allocation2 + $0x1f0] sm:$0xf] %v5799_v54  ;;  %3355 = vst [vmem:[#allocation2 + $0x140] sm:$0xf0] %v3339_v34  ;;  %v5812_v46 = vpop.permute.xlu1 %3436 }
 0x38d   : > { %3611 = vrot.lane.b32.xlu0 %v5788_v16, %s4390_s14  ;;  %3208 = vrot.lane.b32.xlu1 %v5664_v63, %s4395_s19  ;;  %v3452_v29 = vsel %vm596_vm7, %v3435_v31, %v5812_v46 }
 0x38e   : > { %3468 = vst [vmem:[#allocation2 + $0x348] sm:$0xf0] %v3452_v29 }
 0x390   : > { %v3265_v22 = vpop.permute.xlu1 %3264 }
 0x391   : > { %3272 = vrot.lane.b32.xlu0 %v5788_v16, %s4391_s15  ;;  %2848 = vrot.lane.b32.xlu1 %v5626_v52, %s4392_s16 }
 0x394   : > { %v3378_v14 = vpop.permute.xlu1 %3377 }
 0x395   : > { %3385 = vrot.lane.b32.xlu0 %v5788_v16, %s4393_s17  ;;  %2905 = vrot.lane.b32.xlu1 %v5631_v17, %s4393_s17 }
 0x398   : > { %v5828_v42 = vpop.permute.xlu1 %3210 }
 0x399   : > { %3325 = vrot.lane.b32.xlu0 %v5756_v7, %s4392_s16  ;;  %2961 = vrot.lane.b32.xlu1 %v5626_v52, %s4394_s18 }
 0x39c   : > { %v3073_v26 = vpop.permute.xlu1 %3072 }
 0x39d   : > { %3438 = vrot.lane.b32.xlu0 %v5756_v7, %s4394_s18  ;;  %3018 = vrot.lane.b32.xlu1 %v5631_v17, %s4388_s12  ;;  %v3088_v49 = vsel %vm711_vm0, %v3071_v15, %v3073_v26  ;;  %v3089_v1 = vsel %vm711_vm0, %v3073_v26, %v5744_v50 }
 0x39e   : > { %3104 = vst [vmem:[#allocation2 + $0x218] sm:$0xf] %v3088_v49  ;;  %3105 = vst [vmem:[#allocation2 + $0x370] sm:$0xf] %v3089_v1 }
 0x3a0   : > { %v3493_v58 = vpop.permute.xlu1 %3492 }
 0x3a1   : > { %3555 = vrot.lane.b32.xlu0 %v3544_v55, %s4389_s13  ;;  %3078 = vrot.lane.b32.xlu1 %v5715_v51, %s4389_s13  ;;  %v3508_v56 = vsel %vm653_vm1, %v5717_v32, %v3493_v58 }
 0x3a2   : > { %3524 = vst [vmem:[#allocation2 + $0x240] sm:$0xf] %v3508_v56 }
 0x3a4   : > { %v3548_v13 = vpop.permute.xlu1 %3547 }
 0x3a5   : > { %3212 = vrot.lane.b32.xlu0 %v5756_v7, %s4395_s19  ;;  %3135 = vrot.lane.b32.xlu1 %v5722_v24, %s4390_s14  ;;  %v3565_v38 = vsel %vm711_vm0, %v3548_v13, %v5726_v4 }
 0x3a6   : > { %3581 = vst [vmem:[#allocation2 + $0x240] sm:$0xf0] %v3565_v38 }
 0x3a8   : > { %v3606_v2 = vpop.permute.xlu1 %3605 }
 0x3a9   : > { %3329 = vrot.lane.b32.xlu0 %v3544_v55, %s4392_s16  ;;  %3216 = vrot.lane.b32.xlu1 %v3544_v55, %s4395_s19  ;;  %v3621_v20 = vsel %vm768_vm2, %v5730_v12, %v3606_v2  ;;  %v3067_v12 = vcombine.high %v5626_v52, %v5626_v52 }
 0x3aa   : > { %3637 = vst [vmem:[#allocation2 + $0x190] sm:$0xf] %v3621_v20 }
 0x3ac   : > { %v3267_v39 = vpop.permute.xlu1 %3266 }
 0x3ad   : > { %3442 = vrot.lane.b32.xlu0 %v3544_v55, %s4394_s18  ;;  %2901 = vrot.lane.b32.xlu1 %v5613_v27, %s4393_s17  ;;  %v3282_v6 = vsel %vm423_vm3, %v3265_v22, %v3267_v39  ;;  %v3742_v1 = vld [vmem:[#allocation2 + $0x240] sm:$0xff] }
 0x3ae   : > { %3298 = vst [vmem:[#allocation2 + $0x140] sm:$0xf] %v3282_v6 }
 0x3b0   : > { %v3380_v9 = vpop.permute.xlu1 %3379 }
 0x3b1   : > { %3127 = vrot.lane.b32.xlu0 %v5613_v27, %s4390_s14  ;;  %3014 = vrot.lane.b32.xlu1 %v5613_v27, %s4388_s12  ;;  %v3395_v32 = vsel %vm538_vm6, %v3378_v14, %v3380_v9  ;;  %v3750_v55 = vld [vmem:[#allocation2 + $0x190] sm:$0xf] }
 0x3b2   : > { %3411 = vst [vmem:[#allocation2 + $0x348] sm:$0xf] %v3395_v32 }
 0x3b5   : > { %2846 = vrot.lane.b32.xlu0 %v5695_v28, %s4392_s16  ;;  %2655 = vrot.lane.b32.xlu1 %v5635_v8, %s4390_s14 }
 0x3b9   : > { %2903 = vrot.lane.b32.xlu0 %v5604_v21, %s4393_s17  ;;  %2735 = vrot.lane.b32.xlu1 %v5626_v52, %s4395_s19 }
 0x3bd   : > { %2959 = vrot.lane.b32.xlu0 %v5695_v28, %s4394_s18  ;;  %2792 = vrot.lane.b32.xlu1 %v5631_v17, %s4391_s15 }
 0x3c1   : > { %3016 = vrot.lane.b32.xlu0 %v5604_v21, %s4388_s12  ;;  %2852 = vrot.lane.b32.xlu1 %v5715_v51, %s4392_s16 }
 0x3c5   : > { %3076 = vrot.lane.b32.xlu0 %v3067_v12, %s4389_s13  ;;  %2909 = vrot.lane.b32.xlu1 %v5722_v24, %s4393_s17 }
 0x3c9   : > { %3133 = vrot.lane.b32.xlu0 %v5626_v52, %s4390_s14  ;;  %2965 = vrot.lane.b32.xlu1 %v5715_v51, %s4394_s18 }
 0x3cd   : > { %3214 = vrot.lane.b32.xlu0 %v5728_v41, %s4395_s19  ;;  %3022 = vrot.lane.b32.xlu1 %v5722_v24, %s4388_s12 }
 0x3d1   : > { %2844 = vrot.lane.b32.xlu0 %v5604_v21, %s4392_s16  ;;  %2731 = vrot.lane.b32.xlu1 %v5604_v21, %s4395_s19 }
 0x3d5   : > { %2957 = vrot.lane.b32.xlu0 %v5604_v21, %s4394_s18  ;;  %2427 = vrot.lane.b32.xlu1 %v5608_v23, %s4393_s17 }
 0x3d9   : > { %2653 = vrot.lane.b32.xlu0 %v5608_v23, %s4390_s14  ;;  %2484 = vrot.lane.b32.xlu1 %v5602_v45, %s4394_s18 }
 0x3dd   : > { %2733 = vrot.lane.b32.xlu0 %v5695_v28, %s4395_s19  ;;  %2540 = vrot.lane.b32.xlu1 %v5608_v23, %s4388_s12 }
 0x3df   : > { %v5912_v17 = vpop.permute.xlu1 %3553  ;;  %v3495_v30 = vpop.permute.xlu0 %3494 }
 0x3e0   : > { %v3509_v31 = vsel %vm653_vm1, %v3493_v58, %v3495_v30  ;;  %v3806_v58 = vpack.c.bf16 %v3750_v55, %v3742_v1 }
 0x3e1   : > { %3525 = vst [vmem:[#allocation2 + $0x258] sm:$0xf] %v3509_v31  ;;  %2790 = vrot.lane.b32.xlu0 %v5604_v21, %s4391_s15  ;;  %2597 = vrot.lane.b32.xlu1 %v5602_v45, %s4389_s13 }
 0x3e3   : > { %v5919_v62 = vpop.permute.xlu1 %3327  ;;  %v3608_v33 = vpop.permute.xlu0 %3607 }
 0x3e4   : > { %v3622_v28 = vsel %vm768_vm2, %v3606_v2, %v3608_v33 }
 0x3e5   : > { %3638 = vst [vmem:[#allocation2 + $0x220] sm:$0xf] %v3622_v28  ;;  %2850 = vrot.lane.b32.xlu0 %v3067_v12, %s4392_s16  ;;  %2657 = vrot.lane.b32.xlu1 %v5639_v40, %s4390_s14 }
 0x3e7   : > { %v5925_v35 = vpop.permute.xlu1 %3440  ;;  %v3269_v25 = vpop.permute.xlu0 %3268 }
 0x3e8   : > { %v3283_v15 = vsel %vm423_vm3, %v3267_v39, %v3269_v25 }
 0x3e9   : > { %3299 = vst [vmem:[#allocation2 + $0x20] sm:$0xf] %v3283_v15  ;;  %2907 = vrot.lane.b32.xlu0 %v5626_v52, %s4393_s17  ;;  %2737 = vrot.lane.b32.xlu1 %v3067_v12, %s4395_s19 }
 0x3eb   : > { %v3552_v21 = vpop.permute.xlu1 %3551  ;;  %v3382_v34 = vpop.permute.xlu0 %3381 }
 0x3ec   : > { %v3566_v29 = vsel %vm711_vm0, %v5726_v4, %v3552_v21  ;;  %v3567_v22 = vsel %vm711_vm0, %v3552_v21, %v5912_v17  ;;  %v3396_v14 = vsel %vm538_vm6, %v3380_v9, %v3382_v34  ;;  %v3751_v38 = vld [vmem:[#allocation2 + $0x220] sm:$0xf] }
 0x3ed   : > { %3582 = vst [vmem:[#allocation2 + $0x258] sm:$0xf0] %v3566_v29  ;;  %3583 = vst [vmem:[#allocation2 + $0x1b8] sm:$0xf0] %v3567_v22  ;;  %2963 = vrot.lane.b32.xlu0 %v3067_v12, %s4394_s18  ;;  %2794 = vrot.lane.b32.xlu1 %v5626_v52, %s4391_s15 }
 0x3ee   : > { %3412 = vst [vmem:[#allocation2 + $0x168] sm:$0xf] %v3396_v14 }
 0x3ef   : > { %v3497_v26 = vpop.permute.xlu1 %3496 }
 0x3f0   : > { %v3510_v49 = vsel %vm653_vm1, %v3495_v30, %v3497_v26 }
 0x3f1   : > { %3526 = vst [vmem:[#allocation2 + $0x1b8] sm:$0xf] %v3510_v49  ;;  %3020 = vrot.lane.b32.xlu0 %v5626_v52, %s4388_s12  ;;  %2425 = vrot.lane.b32.xlu1 %v5602_v45, %s4393_s17  ;;  %v3818_v52 = vsel %vm1917_vm5, %v3806_v58, 0 }
 0x3f3   : > { %v3610_v4 = vpop.permute.xlu1 %3609 }
 0x3f4   : > { %v3623_v56 = vsel %vm768_vm2, %v3608_v33, %v3610_v4  ;;  %v3743_v13 = vld [vmem:[#allocation2 + $0x258] sm:$0xff] }
 0x3f5   : > { %3639 = vst [vmem:[#allocation2 + $0x8] sm:$0xf] %v3623_v56  ;;  %2651 = vrot.lane.b32.xlu0 %v5602_v45, %s4390_s14  ;;  %2538 = vrot.lane.b32.xlu1 %v5602_v45, %s4388_s12  ;;  %v3807_v2 = vpack.c.bf16 %v3751_v38, %v3743_v13 }
 0x3f7   : > { %v3271_v20 = vpop.permute.xlu1 %3270  ;;  %4269 = vmatprep.subr.msk.bf16.mxu0 %vm1917_vm5, %v3807_v2  ;;  %v3726_v2 = vld [vmem:[#allocation2 + $0x140] sm:$0xff] }
 0x3f8   : > { %v3284_v39 = vsel %vm423_vm3, %v3269_v25, %v3271_v20  ;;  %3844 = vmatpush1.bf16.msra.mxu0 %v3818_v52 }
 0x3f9   : > { %3300 = vst [vmem:[#allocation2 + $0x68] sm:$0xf] %v3284_v39  ;;  %2788 = vrot.lane.b32.xlu0 %v5613_v27, %s4391_s15  ;;  %2258 = vrot.lane.b32.xlu1 %v5602_v45, %s4395_s19 }
 0x3fb   : > { %v3384_v6 = vpop.permute.xlu1 %3383  ;;  %v5956_v9 = vpop.permute.xlu0 %3498 }
 0x3fc   : > { %v3397_v32 = vsel %vm538_vm6, %v3382_v34, %v3384_v6  ;;  %v3511_v12 = vsel %vm653_vm1, %v3497_v26, %v5956_v9 }
 0x3fd   : > { %3413 = vst [vmem:[#allocation2 + $0x288] sm:$0xf] %v3397_v32  ;;  %3527 = vst [vmem:[#allocation2 + $0x118] sm:$0xf] %v3511_v12  ;;  %2429 = vrot.lane.b32.xlu0 %v5635_v8, %s4393_s17  ;;  %2314 = vrot.lane.b32.xlu1 %v5608_v23, %s4391_s15  ;;  %v3752_v32 = vld [vmem:[#allocation2 + $0x8] sm:$0xf] }
 0x3fe   : > { %v3744_v12 = vld [vmem:[#allocation2 + $0x1b8] sm:$0xff] }
 0x3ff   : > { %v3209_v27 = vpop.permute.xlu1 %3208  ;;  %v5965_v30 = vpop.permute.xlu0 %3611 }
 0x400   : > { %v3226_v31 = vsel %vm366_vm8, %v3209_v27, %v5828_v42  ;;  %v3624_v33 = vsel %vm768_vm2, %v3610_v4, %v5965_v30  ;;  %v2477_v4 = vcombine.low %v5602_v45, %v5602_v45 }
 0x401   : > { %3242 = vst [vmem:[#allocation2 + $0x30] sm:$0xf0] %v3226_v31  ;;  %3640 = vst [vmem:[#allocation2 + $0x18] sm:$0xf] %v3624_v33  ;;  %2486 = vrot.lane.b32.xlu0 %v5664_v63, %s4394_s18  ;;  %2371 = vrot.lane.b32.xlu1 %v5602_v45, %s4392_s16  ;;  %v3808_v33 = vpack.c.bf16 %v3752_v32, %v3744_v12 }
 0x403   : > { %v5975_v28 = vpop.permute.xlu1 %2848  ;;  %v5977_v23 = vpop.permute.xlu0 %3272 }
 0x404   : > { %v3285_v25 = vsel %vm423_vm3, %v3271_v20, %v5977_v23  ;;  %v3734_v20 = vld [vmem:[#allocation2 + $0x348] sm:$0xff] }
 0x405   : > { %3301 = vst [vmem:[#allocation2 + $0x78] sm:$0xf] %v3285_v25  ;;  %2542 = vrot.lane.b32.xlu0 %v5635_v8, %s4388_s12  ;;  %2431 = vrot.lane.b32.xlu1 %v5639_v40, %s4393_s17 }
 0x407   : > { %v5985_v15 = vpop.permute.xlu1 %2905  ;;  %v5987_v21 = vpop.permute.xlu0 %3385 }
 0x408   : > { %v3398_v34 = vsel %vm538_vm6, %v3384_v6, %v5987_v21 }
 0x409   : > { %3414 = vst [vmem:[#allocation2 + $0x1d0] sm:$0xf] %v3398_v34  ;;  %2599 = vrot.lane.b32.xlu0 %v5664_v63, %s4389_s13  ;;  %2488 = vrot.lane.b32.xlu1 %v5635_v8, %s4394_s18  ;;  %v3753_v34 = vld [vmem:[#allocation2 + $0x18] sm:$0xf] }
 0x40b   : > { %v5995_v29 = vpop.permute.xlu1 %2961  ;;  %v3326_v22 = vpop.permute.xlu0 %3325 }
 0x40c   : > { %v3340_v14 = vsel %vm481_vm4, %v5790_v43, %v3326_v22  ;;  %v3341_v26 = vsel %vm481_vm4, %v3326_v22, %v5919_v62 }
 0x40d   : > { %3356 = vst [vmem:[#allocation2 + $0x20] sm:$0xf0] %v3340_v14  ;;  %3357 = vst [vmem:[#allocation2 + $0x68] sm:$0xf0] %v3341_v26  ;;  %2544 = vrot.lane.b32.xlu1 %v5639_v40, %s4388_s12  ;;  %2659 = vrot.lane.b32.xlu0 %v5728_v41, %s4390_s14 }
 0x40f   : > { %v6005_v49 = vpop.permute.xlu1 %3018  ;;  %v3439_v1 = vpop.permute.xlu0 %3438 }
 0x410   : > { %v3453_v55 = vsel %vm596_vm7, %v5812_v46, %v3439_v1  ;;  %v3454_v43 = vsel %vm596_vm7, %v3439_v1, %v5925_v35  ;;  %v3824_v1 = vsel %vm1917_vm5, %v3808_v33, 0 }
 0x411   : > { %3469 = vst [vmem:[#allocation2 + $0x168] sm:$0xf0] %v3453_v55  ;;  %3470 = vst [vmem:[#allocation2 + $0x288] sm:$0xf0] %v3454_v43  ;;  %2601 = vrot.lane.b32.xlu1 %v5635_v8, %s4389_s13  ;;  %2739 = vrot.lane.b32.xlu0 %v5715_v51, %s4395_s19  ;;  %v3711_v55 = vld [vmem:[#allocation2 + $0x370] sm:$0xff] }
 0x413   : > { %v6017_v58 = vpop.permute.xlu1 %3078  ;;  %v6019_v56 = vpop.permute.xlu0 %3555 }
 0x414   : > { %v3568_v46 = vsel %vm711_vm0, %v5912_v17, %v6019_v56  ;;  %v3727_v39 = vld [vmem:[#allocation2 + $0x20] sm:$0xff] }
 0x415   : > { %3584 = vst [vmem:[#allocation2 + $0x118] sm:$0xf0] %v3568_v46  ;;  %2256 = vrot.lane.b32.xlu1 %v2477_v4, %s4395_s19  ;;  %2796 = vrot.lane.b32.xlu0 %v5722_v24, %s4391_s15  ;;  %v3798_v24 = vpack.c.bf16 %v3734_v20, %v3726_v2 }
 0x417   : > { %v6027_v13 = vpop.permute.xlu1 %3135  ;;  %v6029_v38 = vpop.permute.xlu0 %3212 }
 0x418   : > { %v3227_v52 = vsel %vm366_vm8, %v5828_v42, %v6029_v38  ;;  %v3735_v6 = vld [vmem:[#allocation2 + $0x168] sm:$0xff] }
 0x419   : > { %3243 = vst [vmem:[#allocation2 + $0x210] sm:$0xf0] %v3227_v52  ;;  %2369 = vrot.lane.b32.xlu1 %v2477_v4, %s4392_s16  ;;  %2482 = vrot.lane.b32.xlu0 %v2477_v4, %s4394_s18  ;;  %v3799_v17 = vpack.c.bf16 %v3735_v6, %v3727_v39  ;;  %v3736_v39 = vld [vmem:[#allocation2 + $0x288] sm:$0xff] }
 0x41b   : > { %v6036_v27 = vpop.permute.xlu1 %3216  ;;  %3845 = vmatprep.subr.bf16.mxu0 %v3799_v17  ;;  %v6038_v31 = vpop.permute.xlu0 %3329 }
 0x41c   : > { %v3342_v42 = vsel %vm481_vm4, %v5919_v62, %v6038_v31  ;;  %3846 = vmatpush1.bf16.msra.mxu0 %v3798_v24  ;;  %v3745_v25 = vld [vmem:[#allocation2 + $0x118] sm:$0xff]  ;;  %v3728_v24 = vld [vmem:[#allocation2 + $0x68] sm:$0xff] }
 0x41d   : > { %3358 = vst [vmem:[#allocation2 + $0x78] sm:$0xf0] %v3342_v42  ;;  %2595 = vrot.lane.b32.xlu0 %v2477_v4, %s4389_s13  ;;  %2264 = vrot.lane.b32.xlu1 %v5756_v7, %s4395_s19  ;;  %v3809_v22 = vpack.c.bf16 %v3753_v34, %v3745_v25  ;;  %v3800_v12 = vpack.c.bf16 %v3736_v39, %v3728_v24 }
 0x41e   : > { %v6078_v25 = vcombine.low %v5786_v61, %v5786_v61 }
 0x41f   : > { %v2902_v14 = vpop.permute.xlu1 %2901  ;;  %4271 = vmatprep.subr.msk.bf16.mxu1 %vm1917_vm5, %v3809_v22  ;;  %v6047_v26 = vpop.permute.xlu0 %3442 }
 0x420   : > { %v3455_v62 = vsel %vm596_vm7, %v5925_v35, %v6047_v26  ;;  %3885 = vmatpush1.bf16.msra.mxu1 %v3824_v1  ;;  %v3719_v43 = vld [vmem:[#allocation2 + $0x210] sm:$0xff] }
 0x421   : > { %3471 = vst [vmem:[#allocation2 + $0x1d0] sm:$0xf0] %v3455_v62  ;;  %2320 = vrot.lane.b32.xlu1 %v5728_v41, %s4391_s15  ;;  %2260 = vrot.lane.b32.xlu0 %v5664_v63, %s4395_s19  ;;  %v3791_v4 = vpack.c.bf16 %v3719_v43, %v3711_v55  ;;  %v3718_v62 = vld [vmem:[#allocation2 + $0x30] sm:$0xff] }
 0x423   : > { %v3015_v46 = vpop.permute.xlu1 %3014  ;;  %3847 = vmatprep.subr.bf16.mxu0 %v3791_v4  ;;  %v3128_v2 = vpop.permute.xlu0 %3127 }
 0x424   : > { %v3145_v20 = vsel %vm768_vm2, %v3128_v2, %v5770_v36  ;;  %v3729_v32 = vld [vmem:[#allocation2 + $0x78] sm:$0xff] }
 0x425   : > { %3161 = vst [vmem:[#allocation2 + $0x218] sm:$0xf0] %v3145_v20  ;;  %2377 = vrot.lane.b32.xlu1 %v5756_v7, %s4392_s16  ;;  %2316 = vrot.lane.b32.xlu0 %v5635_v8, %s4391_s15 }
 0x427   : > { %v6063_v35 = vpop.permute.xlu1 %2655  ;;  %v6065_v52 = vpop.permute.xlu0 %2846 }
 0x428   : > { %v2863_v6 = vsel %vm481_vm4, %v6065_v52, %v5975_v28  ;;  %v3737_v17 = vld [vmem:[#allocation2 + $0x1d0] sm:$0xff] }
 0x429   : > { %2879 = vst [vmem:[#allocation2 + $0x228] sm:$0xf] %v2863_v6  ;;  %3502 = vrot.lane.b32.xlu1 %v5786_v61, %s4388_s12  ;;  %2373 = vrot.lane.b32.xlu0 %v5664_v63, %s4392_s16  ;;  %v3801_v36 = vpack.c.bf16 %v3737_v17, %v3729_v32 }
 0x42b   : > { %v6074_v33 = vpop.permute.xlu1 %2735  ;;  %3886 = vmatprep.subr.bf16.mxu1 %v3801_v36  ;;  %v2904_v42 = vpop.permute.xlu0 %2903 }
 0x42c   : > { %v2919_v34 = vsel %vm538_vm6, %v2902_v14, %v2904_v42  ;;  %v2920_v22 = vsel %vm538_vm6, %v2904_v42, %v5985_v15  ;;  %3887 = vmatpush1.bf16.msra.mxu1 %v3800_v12  ;;  %v3710_v1 = vld [vmem:[#allocation2 + $0x218] sm:$0xff] }
 0x42d   : > { %2935 = vst [vmem:[#allocation2 + $0x2b8] sm:$0xf0] %v2919_v34  ;;  %2936 = vst [vmem:[#allocation2 + $0x228] sm:$0xf0] %v2920_v22  ;;  %3559 = vrot.lane.b32.xlu1 %v6078_v25, %s4389_s13  ;;  %2433 = vrot.lane.b32.xlu0 %v5728_v41, %s4393_s17  ;;  %v3790_v63 = vpack.c.bf16 %v3718_v62, %v3710_v1 }
 0x42f   : > { %v6087_v55 = vpop.permute.xlu1 %2792  ;;  %3848 = vmatpush1.bf16.msra.mxu0 %v3790_v63  ;;  %v2960_v43 = vpop.permute.xlu0 %2959 }
 0x430   : > { %v2976_v14 = vsel %vm596_vm7, %v2960_v43, %v5995_v29 }
 0x431   : > { %2992 = vst [vmem:[#allocation2 + $0xf8] sm:$0xf] %v2976_v14  ;;  %3615 = vrot.lane.b32.xlu1 %v5786_v61, %s4390_s14  ;;  %2490 = vrot.lane.b32.xlu0 %v5756_v7, %s4394_s18 }
 0x433   : > { %v6095_v4 = vpop.permute.xlu1 %2852  ;;  %v3017_v2 = vpop.permute.xlu0 %3016 }
 0x434   : > { %v3032_v20 = vsel %vm653_vm1, %v3015_v46, %v3017_v2  ;;  %v3033_v39 = vsel %vm653_vm1, %v3017_v2, %v6005_v49  ;;  %v3695_v42 = vld [vmem:[#allocation2 + $0x228] sm:$0xff] }
 0x435   : > { %3048 = vst [vmem:[#allocation2 + $0x270] sm:$0xf0] %v3032_v20  ;;  %3049 = vst [vmem:[#allocation2 + $0xf8] sm:$0xf0] %v3033_v39  ;;  %3276 = vrot.lane.b32.xlu1 %v5786_v61, %s4391_s15  ;;  %2546 = vrot.lane.b32.xlu0 %v5728_v41, %s4388_s12 }
 0x437   : > { %v6104_v6 = vpop.permute.xlu1 %2909  ;;  %v3077_v32 = vpop.permute.xlu0 %3076 }
 0x438   : > { %v3090_v17 = vsel %vm711_vm0, %v5744_v50, %v3077_v32  ;;  %v3091_v46 = vsel %vm711_vm0, %v3077_v32, %v6017_v58 }
 0x439   : > { %3106 = vst [vmem:[#allocation2 + $0xa8] sm:$0xf] %v3090_v17  ;;  %3107 = vst [vmem:[#allocation2 + $0xc8] sm:$0xf] %v3091_v46  ;;  %3333 = vrot.lane.b32.xlu1 %v6078_v25, %s4392_s16  ;;  %2603 = vrot.lane.b32.xlu0 %v5756_v7, %s4389_s13 }
 0x43b   : > { %v6114_v36 = vpop.permute.xlu1 %2965  ;;  %v3134_v24 = vpop.permute.xlu0 %3133 }
 0x43c   : > { %v3147_v12 = vsel %vm768_vm2, %v5764_v19, %v3134_v24  ;;  %v3148_v50 = vsel %vm768_vm2, %v3134_v24, %v6027_v13  ;;  %v3703_v34 = vld [vmem:[#allocation2 + $0xf8] sm:$0xff] }
 0x43d   : > { %3163 = vst [vmem:[#allocation2 + $0xa8] sm:$0xf0] %v3147_v12  ;;  %3164 = vst [vmem:[#allocation2 + $0xc8] sm:$0xf0] %v3148_v50  ;;  %3389 = vrot.lane.b32.xlu1 %v5786_v61, %s4393_s17  ;;  %2312 = vrot.lane.b32.xlu0 %v5602_v45, %s4391_s15  ;;  %v3783_v7 = vpack.c.bf16 %v3703_v34, %v3695_v42  ;;  %v3480_v45 = vld [vmem:[#allocation3 + $0x28] sm:$0xf] }
 0x43e   : > { %v3593_v42 = vld [vmem:[#allocation3 + $0x28] sm:$0xf] }
 0x43f   : > { %v6124_v22 = vpop.permute.xlu1 %3022  ;;  %3849 = vmatprep.subr.bf16.mxu0 %v3783_v7  ;;  %v3215_v1 = vpop.permute.xlu0 %3214 }
 0x440   : > { %v3228_v19 = vsel %vm366_vm8, %v6029_v38, %v3215_v1  ;;  %v3229_v62 = vsel %vm366_vm8, %v3215_v1, %v6036_v27  ;;  %v4353_v38 = vld [vmem:[#allocation3 + $0x28] ss:$0 sps:$4 sm:$0xff]  }
 0x441   : > { %3244 = vst [vmem:[#allocation2 + $0x1e0] sm:$0xf0] %v3228_v19  ;;  %3245 = vst [vmem:[#allocation2 + $0x50] sm:$0xf0] %v3229_v62  ;;  %3446 = vrot.lane.b32.xlu1 %v6078_v25, %s4394_s18  ;;  %2262 = vrot.lane.b32.xlu0 %v5635_v8, %s4395_s19 }
 0x443   : > { %v2732_v63 = vpop.permute.xlu1 %2731  ;;  %v2845_v14 = vpop.permute.xlu0 %2844 }
 0x444   : > { %v2862_v2 = vsel %vm481_vm4, %v2845_v14, %v6065_v52  ;;  %v3713_v32 = vld [vmem:[#allocation2 + $0xc8] sm:$0xff] }
 0x445   : > { %2878 = vst [vmem:[#allocation2 + $0x2b8] sm:$0xf] %v2862_v2  ;;  %3506 = vrot.lane.b32.xlu1 %v3480_v45, %s4388_s12  ;;  %2318 = vrot.lane.b32.xlu0 %v5639_v40, %s4391_s15  ;;  %v3712_v24 = vld [vmem:[#allocation2 + $0xa8] sm:$0xff] }
 0x447   : > { %v6139_v20 = vpop.permute.xlu1 %2427  ;;  %v2958_v39 = vpop.permute.xlu0 %2957 }
 0x448   : > { %v2975_v17 = vsel %vm596_vm7, %v2958_v39, %v2960_v43  ;;  %v3721_v46 = vld [vmem:[#allocation2 + $0x50] sm:$0xff]  ;;  %v3720_v12 = vld [vmem:[#allocation2 + $0x1e0] sm:$0xff] }
 0x449   : > { %2991 = vst [vmem:[#allocation2 + $0x270] sm:$0xf] %v2975_v17  ;;  %3563 = vrot.lane.b32.xlu1 %v4353_v38, %s4389_s13  ;;  %2375 = vrot.lane.b32.xlu0 %v5635_v8, %s4392_s16  ;;  %v3793_v52 = vpack.c.bf16 %v3721_v46, %v3713_v32  ;;  %v3792_v50 = vpack.c.bf16 %v3720_v12, %v3712_v24 }
 0x44b   : > { %v6145_v40 = vpop.permute.xlu1 %2484  ;;  %3888 = vmatprep.subr.bf16.mxu1 %v3793_v52  ;;  %v6147_v34 = vpop.permute.xlu0 %2653 }
 0x44c   : > { %v2670_v43 = vsel %vm768_vm2, %v6147_v34, %v6063_v35  ;;  %3889 = vmatpush1.bf16.msra.mxu1 %v3792_v50  ;;  %v3694_v62 = vld [vmem:[#allocation2 + $0x2b8] sm:$0xff] }
 0x44d   : > { %2686 = vst [vmem:[#allocation2 + $0x298] sm:$0xf] %v2670_v43  ;;  %3619 = vrot.lane.b32.xlu1 %v3593_v42, %s4390_s14  ;;  %3500 = vrot.lane.b32.xlu0 %v5799_v54, %s4388_s12  ;;  %v4354_v43 = vld [vmem:[#allocation3 + $0x28] ss:$0 sps:$4 sm:$0xff]  }
 0x44f   : > { %v6155_v8 = vpop.permute.xlu1 %2540  ;;  %v2734_v7 = vpop.permute.xlu0 %2733 }
 0x450   : > { %v2749_v1 = vsel %vm366_vm8, %v2732_v63, %v2734_v7  ;;  %v2750_v19 = vsel %vm366_vm8, %v2734_v7, %v6074_v33  ;;  %v3702_v45 = vld [vmem:[#allocation2 + $0x270] sm:$0xff] }
 0x451   : > { %2765 = vst [vmem:[#allocation2 + $0x1f8] sm:$0xf] %v2749_v1  ;;  %2766 = vst [vmem:[#allocation2 + $0x2f0] sm:$0xf] %v2750_v19  ;;  %3082 = vrot.lane.b32.xlu1 %v5768_v5, %s4389_s13  ;;  %3557 = vrot.lane.b32.xlu0 %v5788_v16, %s4389_s13  ;;  %v3782_v14 = vpack.c.bf16 %v3702_v45, %v3694_v62  ;;  %v3367_v62 = vld [vmem:[#allocation3 + $0x28] sm:$0xf] }
 0x453   : > { %v6164_v2 = vpop.permute.xlu1 %2597  ;;  %3850 = vmatpush1.bf16.msra.mxu0 %v3782_v14  ;;  %v6166_v38 = vpop.permute.xlu0 %2790 }
 0x454   : > { %v2807_v63 = vsel %vm423_vm3, %v6166_v38, %v6087_v55  ;;  %v3679_v50 = vld [vmem:[#allocation2 + $0x298] sm:$0xff] }
 0x455   : > { %2823 = vst [vmem:[#allocation2 + $0x2f0] sm:$0xf0] %v2807_v63  ;;  %3139 = vrot.lane.b32.xlu1 %v5775_v37, %s4390_s14  ;;  %3613 = vrot.lane.b32.xlu0 %v5799_v54, %s4390_s14  ;;  %v3254_v37 = vld [vmem:[#allocation3 + $0x28] sm:$0xf] }
 0x457   : > { %v6175_v5 = vpop.permute.xlu1 %2657  ;;  %v2851_v39 = vpop.permute.xlu0 %2850 }
 0x458   : > { %v2671_v32 = vsel %vm768_vm2, %v6063_v35, %v6175_v5  ;;  %v2864_v17 = vsel %vm481_vm4, %v5975_v28, %v2851_v39  ;;  %v2865_v46 = vsel %vm481_vm4, %v2851_v39, %v6095_v4 }
 0x459   : > { %2687 = vst [vmem:[#allocation2 + $0xb8] sm:$0xf] %v2671_v32  ;;  %2880 = vst [vmem:[#allocation2 + $0x178] sm:$0xf] %v2864_v17  ;;  %3220 = vrot.lane.b32.xlu1 %v6078_v25, %s4395_s19  ;;  %3274 = vrot.lane.b32.xlu0 %v5799_v54, %s4391_s15 }
 0x45a   : > { %2881 = vst [vmem:[#allocation2 + $0x200] sm:$0xf] %v2865_v46 }
 0x45b   : > { %v6188_v24 = vpop.permute.xlu1 %2737  ;;  %v2908_v12 = vpop.permute.xlu0 %2907 }
 0x45c   : > { %v2751_v28 = vsel %vm366_vm8, %v6074_v33, %v6188_v24  ;;  %v2921_v35 = vsel %vm538_vm6, %v5985_v15, %v2908_v12  ;;  %v2922_v52 = vsel %vm538_vm6, %v2908_v12, %v6104_v6  ;;  %v3687_v42 = vld [vmem:[#allocation2 + $0x2f0] sm:$0xff]  ;;  %v6230_v12 = vld [vmem:[#allocation3 + $0x1c] sm:$0xff] }
 0x45d   : > { %2767 = vst [vmem:[#allocation2 + $0x358] sm:$0xf] %v2751_v28  ;;  %2937 = vst [vmem:[#allocation2 + $0x178] sm:$0xf0] %v2921_v35  ;;  %3280 = vrot.lane.b32.xlu1 %v3254_v37, %s4391_s15  ;;  %3331 = vrot.lane.b32.xlu0 %v5788_v16, %s4392_s16  ;;  %v3775_v25 = vpack.c.bf16 %v3687_v42, %v3679_v50 }
 0x45e   : > { %2938 = vst [vmem:[#allocation2 + $0x200] sm:$0xf0] %v2922_v52 }
 0x45f   : > { %v6200_v7 = vpop.permute.xlu1 %2794  ;;  %3851 = vmatprep.subr.bf16.mxu0 %v3775_v25  ;;  %v2964_v33 = vpop.permute.xlu0 %2963 }
 0x460   : > { %v2808_v15 = vsel %vm423_vm3, %v6087_v55, %v6200_v7  ;;  %v2977_v1 = vsel %vm596_vm7, %v5995_v29, %v2964_v33  ;;  %v2978_v19 = vsel %vm596_vm7, %v2964_v33, %v6114_v36 }
 0x461   : > { %2824 = vst [vmem:[#allocation2 + $0x358] sm:$0xf0] %v2808_v15  ;;  %2993 = vst [vmem:[#allocation2 + $0x1c8] sm:$0xf] %v2977_v1  ;;  %3337 = vrot.lane.b32.xlu1 %v4354_v43, %s4392_s16  ;;  %3387 = vrot.lane.b32.xlu0 %v5799_v54, %s4393_s17  ;;  %v4355_v54 = vld [vmem:[#allocation3 + $0x28] ss:$0 sps:$4 sm:$0xff]   ;;  %v6242_v15 = vcombine.low %v6230_v12, %v6230_v12  ;;  %v6252_v1 = vcombine.high %v5715_v51, %v5715_v51 }
 0x462   : > { %2994 = vst [vmem:[#allocation2 + $0xb0] sm:$0xf] %v2978_v19 }
 0x463   : > { %v2426_v45 = vpop.permute.xlu1 %2425  ;;  %v3021_v14 = vpop.permute.xlu0 %3020 }
 0x464   : > { %v2443_v55 = vsel %vm538_vm6, %v2426_v45, %v6139_v20  ;;  %v3034_v29 = vsel %vm653_vm1, %v6005_v49, %v3021_v14  ;;  %v3035_v63 = vsel %vm653_vm1, %v3021_v14, %v6124_v22  ;;  %v3696_v50 = vld [vmem:[#allocation2 + $0x178] sm:$0xff] }
 0x465   : > { %2459 = vst [vmem:[#allocation2 + $0x28] sm:$0xf] %v2443_v55  ;;  %3050 = vst [vmem:[#allocation2 + $0x1c8] sm:$0xf0] %v3034_v29  ;;  %3393 = vrot.lane.b32.xlu1 %v3367_v62, %s4393_s17  ;;  %3444 = vrot.lane.b32.xlu0 %v5788_v16, %s4394_s18  ;;  %v3697_v28 = vld [vmem:[#allocation2 + $0x200] sm:$0xff] }
 0x466   : > { %3051 = vst [vmem:[#allocation2 + $0xb0] sm:$0xf0] %v3035_v63 }
 0x467   : > { %v2539_v39 = vpop.permute.xlu1 %2538  ;;  %v2652_v32 = vpop.permute.xlu0 %2651 }
 0x468   : > { %v2556_v17 = vsel %vm653_vm1, %v2539_v39, %v6155_v8  ;;  %v2669_v49 = vsel %vm768_vm2, %v2652_v32, %v6147_v34 }
 0x469   : > { %2572 = vst [vmem:[#allocation2 + $0x350] sm:$0xf] %v2556_v17  ;;  %2685 = vst [vmem:[#allocation2 + $0xd8] sm:$0xf] %v2669_v49  ;;  %3450 = vrot.lane.b32.xlu1 %v4355_v54, %s4394_s18  ;;  %3504 = vrot.lane.b32.xlu0 %v5794_v18, %s4388_s12 }
 0x46b   : > { %v6228_v46 = vpop.permute.xlu1 %2258  ;;  %v2789_v37 = vpop.permute.xlu0 %2788 }
 0x46c   : > { %v2806_v35 = vsel %vm423_vm3, %v2789_v37, %v6166_v38  ;;  %v3704_v42 = vld [vmem:[#allocation2 + $0x1c8] sm:$0xff] }
 0x46d   : > { %v3705_v52 = vld [vmem:[#allocation2 + $0xb0] sm:$0xff]  ;;  %2822 = vst [vmem:[#allocation2 + $0x1f8] sm:$0xf0] %v2806_v35  ;;  %2856 = vrot.lane.b32.xlu1 %v6230_v12, %s4392_s16  ;;  %3561 = vrot.lane.b32.xlu0 %v5786_v61, %s4389_s13  ;;  %v3784_v25 = vpack.c.bf16 %v3704_v42, %v3696_v50  ;;  %v4358_v35 = vld [vmem:[#allocation3 + $0x24] ss:$0 sps:$4 sm:$0xff]  }
 0x46e   : > { %v3785_v34 = vpack.c.bf16 %v3705_v52, %v3697_v28  ;;  %v3060_v28 = vld [vmem:[#allocation3 + $0x24] sm:$0xf] }
 0x46f   : > { %v6238_v43 = vpop.permute.xlu1 %2314  ;;  %v2430_v33 = vpop.permute.xlu0 %2429 }
 0x470   : > { %3890 = vmatprep.subr.bf16.mxu1 %v3785_v34  ;;  %v2444_v38 = vsel %vm538_vm6, %v6139_v20, %v2430_v33  ;;  %v3678_v14 = vld [vmem:[#allocation2 + $0xd8] sm:$0xff] }
 0x471   : > { %3891 = vmatpush1.bf16.msra.mxu1 %v3784_v25  ;;  %2460 = vst [vmem:[#allocation2 + $0x330] sm:$0xf] %v2444_v38  ;;  %2913 = vrot.lane.b32.xlu1 %v6242_v15, %s4393_s17 }
 0x472   : > { %3617 = vrot.lane.b32.xlu0 %v5794_v18, %s4390_s14 }
 0x473   : > { %v6254_v19 = vpop.permute.xlu1 %2371  ;;  %v2487_v62 = vpop.permute.xlu0 %2486 }
 0x474   : > { %v2501_v45 = vsel %vm596_vm7, %v6145_v40, %v2487_v62  ;;  %v3686_v20 = vld [vmem:[#allocation2 + $0x1f8] sm:$0xff] }
 0x475   : > { %2517 = vst [vmem:[#allocation2 + $0x330] sm:$0xf0] %v2501_v45  ;;  %2969 = vrot.lane.b32.xlu1 %v6230_v12, %s4394_s18  ;;  %v3774_v55 = vpack.c.bf16 %v3686_v20, %v3678_v14 }
 0x476   : > { %3080 = vrot.lane.b32.xlu0 %v6252_v1, %s4389_s13 }
 0x477   : > { %v6262_v29 = vpop.permute.xlu1 %2431  ;;  %3852 = vmatpush1.bf16.msra.mxu0 %v3774_v55  ;;  %v2543_v63 = vpop.permute.xlu0 %2542  ;;  %v6312_v55 = vld [vmem:[#allocation3 + $0x18] sm:$0xff] }
 0x478   : > { %v2445_v54 = vsel %vm538_vm6, %v2430_v33, %v6262_v29  ;;  %v2557_v39 = vsel %vm653_vm1, %v6155_v8, %v2543_v63 }
 0x479   : > { %2461 = vst [vmem:[#allocation2 + $0x2d0] sm:$0xf] %v2445_v54  ;;  %2573 = vst [vmem:[#allocation2 + $0x120] sm:$0xf] %v2557_v39  ;;  %3026 = vrot.lane.b32.xlu1 %v6242_v15, %s4388_s12 }
 0x47a   : > { %3137 = vrot.lane.b32.xlu0 %v5715_v51, %s4390_s14 }
 0x47b   : > { %v6272_v32 = vpop.permute.xlu1 %2488  ;;  %v2600_v17 = vpop.permute.xlu0 %2599 }
 0x47c   : > { %v2502_v49 = vsel %vm596_vm7, %v2487_v62, %v6272_v32  ;;  %v2614_v37 = vsel %vm711_vm0, %v6164_v2, %v2600_v17 }
 0x47d   : > { %2518 = vst [vmem:[#allocation2 + $0x2d0] sm:$0xf0] %v2502_v49  ;;  %2630 = vst [vmem:[#allocation2 + $0x120] sm:$0xf0] %v2614_v37  ;;  %3086 = vrot.lane.b32.xlu1 %v3060_v28, %s4389_s13 }
 0x47e   : > { %3218 = vrot.lane.b32.xlu0 %v5788_v16, %s4395_s19  ;;  %v4359_v16 = vld [vmem:[#allocation3 + $0x28] ss:$0 sps:$4 sm:$0xff]  }
 0x47f   : > { %v6281_v8 = vpop.permute.xlu1 %2544  ;;  %v6283_v51 = vpop.permute.xlu0 %2659 }
 0x480   : > { %v2558_v52 = vsel %vm653_vm1, %v2543_v63, %v6281_v8  ;;  %v2672_v50 = vsel %vm768_vm2, %v6175_v5, %v6283_v51  ;;  %v3663_v5 = vld [vmem:[#allocation2 + $0x330] sm:$0xff] }
 0x481   : > { %2574 = vst [vmem:[#allocation2 + $0x1a0] sm:$0xf] %v2558_v52  ;;  %2688 = vst [vmem:[#allocation2 + $0x170] sm:$0xf] %v2672_v50  ;;  %3143 = vrot.lane.b32.xlu1 %v4358_v35, %s4390_s14  ;;  %v3680_v52 = vld [vmem:[#allocation2 + $0xb8] sm:$0xff] }
 0x482   : > { %3278 = vrot.lane.b32.xlu0 %v5794_v18, %s4391_s15 }
 0x483   : > { %v6293_v42 = vpop.permute.xlu1 %2601  ;;  %v6295_v34 = vpop.permute.xlu0 %2739 }
 0x484   : > { %v2615_v25 = vsel %vm711_vm0, %v2600_v17, %v6293_v42  ;;  %v2752_v33 = vsel %vm366_vm8, %v6188_v24, %v6295_v34  ;;  %v3671_v38 = vld [vmem:[#allocation2 + $0x120] sm:$0xff] }
 0x485   : > { %2631 = vst [vmem:[#allocation2 + $0x1a0] sm:$0xf0] %v2615_v25  ;;  %2768 = vst [vmem:[#allocation2 + $0x1c0] sm:$0xf] %v2752_v33  ;;  %3224 = vrot.lane.b32.xlu1 %v4359_v16, %s4395_s19  ;;  %v3767_v62 = vpack.c.bf16 %v3671_v38, %v3663_v5  ;;  %v2834_v33 = vld [vmem:[#allocation3 + $0x24] sm:$0xf] }
 0x486   : > { %3335 = vrot.lane.b32.xlu0 %v5786_v61, %s4392_s16 }
 0x487   : > { %v2257_v45 = vpop.permute.xlu1 %2256  ;;  %3853 = vmatprep.subr.bf16.mxu0 %v3767_v62  ;;  %v6305_v14 = vpop.permute.xlu0 %2796  ;;  %v4361_v62 = vld [vmem:[#allocation3 + $0x24] ss:$0 sps:$4 sm:$0xff]  }
 0x488   : > { %v2274_v20 = vsel %vm366_vm8, %v2257_v45, %v6228_v46  ;;  %v2809_v24 = vsel %vm423_vm3, %v6200_v7, %v6305_v14  ;;  %v3681_v28 = vld [vmem:[#allocation2 + $0x170] sm:$0xff] }
 0x489   : > { %2290 = vst [vmem:[#allocation2 + $0x2b0] sm:$0xf0] %v2274_v20  ;;  %2825 = vst [vmem:[#allocation2 + $0x1c0] sm:$0xf0] %v2809_v24  ;;  %2663 = vrot.lane.b32.xlu1 %v6312_v55, %s4390_s14 }
 0x48a   : > { %3391 = vrot.lane.b32.xlu0 %v5794_v18, %s4393_s17  ;;  %v3688_v18 = vld [vmem:[#allocation2 + $0x358] sm:$0xff] }
 0x48b   : > { %v2370_v63 = vpop.permute.xlu1 %2369  ;;  %v2483_v54 = vpop.permute.xlu0 %2482  ;;  %v3776_v50 = vpack.c.bf16 %v3688_v18, %v3680_v52 }
 0x48c   : > { %v2387_v39 = vsel %vm481_vm4, %v2370_v63, %v6254_v19  ;;  %v2500_v17 = vsel %vm596_vm7, %v2483_v54, %v6145_v40 }
 0x48d   : > { %2403 = vst [vmem:[#allocation2 + $0x108] sm:$0xf0] %v2387_v39  ;;  %2516 = vst [vmem:[#allocation2 + $0x28] sm:$0xf0] %v2500_v17  ;;  %2743 = vrot.lane.b32.xlu1 %v6230_v12, %s4395_s19  ;;  %v2947_v17 = vld [vmem:[#allocation3 + $0x24] sm:$0xf] }
 0x48e   : > { %3448 = vrot.lane.b32.xlu0 %v5786_v61, %s4394_s18 }
 0x48f   : > { %v6326_v7 = vpop.permute.xlu1 %2264  ;;  %v2596_v49 = vpop.permute.xlu0 %2595 }
 0x490   : > { %v2613_v37 = vsel %vm711_vm0, %v2596_v49, %v6164_v2  ;;  %v3689_v35 = vld [vmem:[#allocation2 + $0x1c0] sm:$0xff] }
 0x491   : > { %2629 = vst [vmem:[#allocation2 + $0x350] sm:$0xf0] %v2613_v37  ;;  %2800 = vrot.lane.b32.xlu1 %v6242_v15, %s4391_s15  ;;  %v3777_v40 = vpack.c.bf16 %v3689_v35, %v3681_v28  ;;  %v6342_v15 = vld [vmem:[#allocation3 + $0x14] sm:$0xff]  ;;  %v4379_v49 = vld [vmem:[#allocation3 + $0x1c] sm:$0xff]  ;;  %v4362_v35 = vld [vmem:[#allocation3 + $0x24] ss:$0 sps:$4 sm:$0xff]  }
 0x492   : > { %2854 = vrot.lane.b32.xlu0 %v6252_v1, %s4392_s16  ;;  %v3069_v18 = vcombine.high %v4379_v49, %v4379_v49 }
 0x493   : > { %v6334_v16 = vpop.permute.xlu1 %2320  ;;  %3892 = vmatprep.subr.bf16.mxu1 %v3777_v40  ;;  %v6336_v25 = vpop.permute.xlu0 %2260 }
 0x494   : > { %v2275_v2 = vsel %vm366_vm8, %v6228_v46, %v6336_v25  ;;  %3893 = vmatpush1.bf16.msra.mxu1 %v3776_v50  ;;  %v3662_v46 = vld [vmem:[#allocation2 + $0x28] sm:$0xff] }
 0x495   : > { %2291 = vst [vmem:[#allocation2 + $0xd0] sm:$0xf0] %v2275_v2  ;;  %2860 = vrot.lane.b32.xlu1 %v2834_v33, %s4392_s16 }
 0x496   : > { %2911 = vrot.lane.b32.xlu0 %v6342_v15, %s4393_s17 }
 0x497   : > { %v6346_v5 = vpop.permute.xlu1 %2377  ;;  %v6348_v38 = vpop.permute.xlu0 %2316 }
 0x498   : > { %v2331_v45 = vsel %vm423_vm3, %v6238_v43, %v6348_v38  ;;  %v3670_v20 = vld [vmem:[#allocation2 + $0x350] sm:$0xff] }
 0x499   : > { %2347 = vst [vmem:[#allocation2 + $0x110] sm:$0xf] %v2331_v45  ;;  %2917 = vrot.lane.b32.xlu1 %v4361_v62, %s4393_s17  ;;  %v3766_v24 = vpack.c.bf16 %v3670_v20, %v3662_v46  ;;  %v6391_v46 = vcombine.low %v6312_v55, %v6312_v55 }
 0x49a   : > { %2967 = vrot.lane.b32.xlu0 %v6252_v1, %s4394_s18 }
 0x49b   : > { %v6356_v63 = vpop.permute.xlu1 %3502  ;;  %3854 = vmatpush1.bf16.msra.mxu0 %v3766_v24  ;;  %v6358_v54 = vpop.permute.xlu0 %2373 }
 0x49c   : > { %v2388_v39 = vsel %vm481_vm4, %v6254_v19, %v6358_v54  ;;  %v3647_v2 = vld [vmem:[#allocation2 + $0xd0] sm:$0xff] }
 0x49d   : > { %2404 = vst [vmem:[#allocation2 + $0x110] sm:$0xf0] %v2388_v39  ;;  %2973 = vrot.lane.b32.xlu1 %v2947_v17, %s4394_s18 }
 0x49e   : > { %3024 = vrot.lane.b32.xlu0 %v6342_v15, %s4388_s12 }
 0x49f   : > { %v6366_v37 = vpop.permute.xlu1 %3559  ;;  %v6368_v28 = vpop.permute.xlu0 %2433 }
 0x4a0   : > { %v2446_v40 = vsel %vm538_vm6, %v6262_v29, %v6368_v28 }
 0x4a1   : > { %2462 = vst [vmem:[#allocation2 + $0x198] sm:$0xf] %v2446_v40  ;;  %3030 = vrot.lane.b32.xlu1 %v4362_v35, %s4388_s12 }
 0x4a2   : > { %3084 = vrot.lane.b32.xlu0 %v3069_v18, %s4389_s13  ;;  %v3672_v18 = vld [vmem:[#allocation2 + $0x1a0] sm:$0xff] }
 0x4a3   : > { %v6375_v19 = vpop.permute.xlu1 %3615  ;;  %v6377_v52 = vpop.permute.xlu0 %2490 }
 0x4a4   : > { %v2503_v50 = vsel %vm596_vm7, %v6272_v32, %v6377_v52  ;;  %v3655_v33 = vld [vmem:[#allocation2 + $0x110] sm:$0xff] }
 0x4a5   : > { %2519 = vst [vmem:[#allocation2 + $0x198] sm:$0xf0] %v2503_v50  ;;  %2437 = vrot.lane.b32.xlu1 %v6312_v55, %s4393_s17  ;;  %v3759_v29 = vpack.c.bf16 %v3655_v33, %v3647_v2  ;;  %v2641_v50 = vld [vmem:[#allocation3 + $0x20] sm:$0xf]  ;;  %v3664_v33 = vld [vmem:[#allocation2 + $0x2d0] sm:$0xff] }
 0x4a6   : > { %3141 = vrot.lane.b32.xlu0 %v4379_v49, %s4390_s14 }
 0x4a7   : > { %v6385_v62 = vpop.permute.xlu1 %3276  ;;  %3855 = vmatprep.subr.bf16.mxu0 %v3759_v29  ;;  %v6387_v45 = vpop.permute.xlu0 %2546  ;;  %v3768_v29 = vpack.c.bf16 %v3672_v18, %v3664_v33 }
 0x4a8   : > { %v2559_v32 = vsel %vm653_vm1, %v6281_v8, %v6387_v45 }
 0x4a9   : > { %2575 = vst [vmem:[#allocation2 + $0x260] sm:$0xf] %v2559_v32  ;;  %2494 = vrot.lane.b32.xlu1 %v6391_v46, %s4394_s18  ;;  %v6430_v32 = vcombine.high %v6230_v12, %v6230_v12 }
 0x4aa   : > { %3222 = vrot.lane.b32.xlu0 %v5786_v61, %s4395_s19 }
 0x4ab   : > { %v6400_v20 = vpop.permute.xlu1 %3333  ;;  %v6402_v24 = vpop.permute.xlu0 %2603 }
 0x4ac   : > { %v2616_v39 = vsel %vm711_vm0, %v6293_v42, %v6402_v24  ;;  %v3665_v2 = vld [vmem:[#allocation2 + $0x198] sm:$0xff] }
 0x4ad   : > { %2632 = vst [vmem:[#allocation2 + $0x260] sm:$0xf0] %v2616_v39  ;;  %2550 = vrot.lane.b32.xlu1 %v6312_v55, %s4388_s12 }
 0x4ae   : > { %2661 = vrot.lane.b32.xlu0 %v5736_v10, %s4390_s14 }
 0x4af   : > { %v6411_v8 = vpop.permute.xlu1 %3389  ;;  %v2313_v17 = vpop.permute.xlu0 %2312 }
 0x4b0   : > { %v2330_v61 = vsel %vm423_vm3, %v2313_v17, %v6238_v43 }
 0x4b1   : > { %2346 = vst [vmem:[#allocation2 + $0x108] sm:$0xf] %v2330_v61  ;;  %2607 = vrot.lane.b32.xlu1 %v6391_v46, %s4389_s13 }
 0x4b2   : > { %2741 = vrot.lane.b32.xlu0 %v6252_v1, %s4395_s19 }
 0x4b3   : > { %v6419_v42 = vpop.permute.xlu1 %3446  ;;  %v2263_v49 = vpop.permute.xlu0 %2262 }
 0x4b4   : > { %v2276_v35 = vsel %vm366_vm8, %v6336_v25, %v2263_v49  ;;  %v2277_v40 = vsel %vm366_vm8, %v2263_v49, %v6326_v7  ;;  %v3673_v43 = vld [vmem:[#allocation2 + $0x260] sm:$0xff] }
 0x4b5   : > { %2292 = vst [vmem:[#allocation2 + $0x10] sm:$0xf0] %v2276_v35  ;;  %2293 = vst [vmem:[#allocation2 + $0x48] sm:$0xf0] %v2277_v40  ;;  %2667 = vrot.lane.b32.xlu1 %v2641_v50, %s4390_s14  ;;  %v3769_v1 = vpack.c.bf16 %v3673_v43, %v3665_v2  ;;  %v2721_v49 = vld [vmem:[#allocation3 + $0x24] sm:$0xf] }
 0x4b6   : > { %2798 = vrot.lane.b32.xlu0 %v6342_v15, %s4391_s15  ;;  %v3646_v15 = vld [vmem:[#allocation2 + $0x2b0] sm:$0xff]  ;;  %v6446_v2 = vld [vmem:[%s6863_s2] sm:$0x3] }
 0x4b7   : > { %v6432_v25 = vpop.permute.xlu1 %3506  ;;  %3894 = vmatprep.subr.bf16.mxu1 %v3769_v1  ;;  %v2319_v39 = vpop.permute.xlu0 %2318 }
 0x4b8   : > { %v2332_v17 = vsel %vm423_vm3, %v6348_v38, %v2319_v39  ;;  %v2333_v61 = vsel %vm423_vm3, %v2319_v39, %v6334_v16  ;;  %3895 = vmatpush1.bf16.msra.mxu1 %v3768_v29  ;;  %v3654_v35 = vld [vmem:[#allocation2 + $0x108] sm:$0xff]  ;;  %v4364_v38 = vld [vmem:[#allocation3 + $0x24] ss:$0 sps:$4 sm:$0xff]  }
 0x4b9   : > { %2348 = vst [vmem:[#allocation2 + $0x90] sm:$0xf] %v2332_v17  ;;  %2349 = vst [vmem:[#allocation2 + $0x318] sm:$0xf] %v2333_v61  ;;  %2747 = vrot.lane.b32.xlu1 %v2721_v49, %s4395_s19  ;;  %v3758_v18 = vpack.c.bf16 %v3654_v35, %v3646_v15 }
 0x4ba   : > { %2858 = vrot.lane.b32.xlu0 %v6430_v32, %s4392_s16 }
 0x4bb   : > { %v6441_v40 = vpop.permute.xlu1 %3563  ;;  %3856 = vmatpush1.bf16.msra.mxu0 %v3758_v18  ;;  %v2376_v50 = vpop.permute.xlu0 %2375 }
 0x4bc   : > { %v2389_v43 = vsel %vm481_vm4, %v6358_v54, %v2376_v50  ;;  %v2390_v1 = vsel %vm481_vm4, %v2376_v50, %v6346_v5  ;;  %v3649_v49 = vld [vmem:[#allocation2 + $0x48] sm:$0xff]  ;;  %v3648_v18 = vld [vmem:[#allocation2 + $0x10] sm:$0xff] }
 0x4bd   : > { %2405 = vst [vmem:[#allocation2 + $0x90] sm:$0xf0] %v2389_v43  ;;  %2406 = vst [vmem:[#allocation2 + $0x318] sm:$0xf0] %v2390_v1  ;;  %2804 = vrot.lane.b32.xlu1 %v4364_v38, %s4391_s15 }
 0x4be   : > { %2915 = vrot.lane.b32.xlu0 %v6230_v12, %s4393_s17  ;;  %4270 = vmatmul.mubr.msk.bf16.vlgmr.msra.gmra.mxu0 %vm653_vm1, %v6446_v2 }
 0x4bf   : > { %v6457_v33 = vpop.permute.xlu1 %3619  ;;  %v3501_v29 = vpop.permute.xlu0 %3500  ;;  %3955 = vmatprep.mubr.bf16.mxu0 %v4397_v44 }
 0x4c0   : > { %v3512_v54 = vsel %vm653_vm1, %v5956_v9, %v3501_v29  ;;  %v3513_v39 = vsel %vm653_vm1, %v3501_v29, %v6356_v63 }
 0x4c1   : > { %3528 = vst [vmem:[#allocation2 + $0x88] sm:$0xf] %v3512_v54  ;;  %3529 = vst [vmem:[#allocation2 + $0x368] sm:$0xf] %v3513_v39  ;;  %2268 = vrot.lane.b32.xlu1 %v6391_v46, %s4395_s19 }
 0x4c2   : > { %2971 = vrot.lane.b32.xlu0 %v6430_v32, %s4394_s18 }
 0x4c3   : > { %v6468_v17 = vpop.permute.xlu1 %3082  ;;  %v3558_v61 = vpop.permute.xlu0 %3557 }
 0x4c4   : > { %v3569_v15 = vsel %vm711_vm0, %v6019_v56, %v3558_v61  ;;  %v3570_v9 = vsel %vm711_vm0, %v3558_v61, %v6366_v37  ;;  %v3657_v35 = vld [vmem:[#allocation2 + $0x318] sm:$0xff]  ;;  %v3656_v50 = vld [vmem:[#allocation2 + $0x90] sm:$0xff] }
 0x4c5   : > { %3585 = vst [vmem:[#allocation2 + $0x88] sm:$0xf0] %v3569_v15  ;;  %3586 = vst [vmem:[#allocation2 + $0x368] sm:$0xf0] %v3570_v9  ;;  %2324 = vrot.lane.b32.xlu1 %v6312_v55, %s4391_s15  ;;  %v3761_v38 = vpack.c.bf16 %v3657_v35, %v3649_v49  ;;  %v3760_v43 = vpack.c.bf16 %v3656_v50, %v3648_v18  ;;  %v2415_v15 = vld [vmem:[#allocation3 + $0x20] sm:$0xf] }
 0x4c6   : > { %3028 = vrot.lane.b32.xlu0 %v6230_v12, %s4388_s12  ;;  %v4365_v35 = vld [vmem:[#allocation3 + $0x20] ss:$0 sps:$4 sm:$0xff]  }
 0x4c7   : > { %v6478_v1 = vpop.permute.xlu1 %3139  ;;  %3896 = vmatprep.subr.bf16.mxu1 %v3761_v38  ;;  %v3614_v56 = vpop.permute.xlu0 %3613 }
 0x4c8   : > { %v3625_v29 = vsel %vm768_vm2, %v5965_v30, %v3614_v56  ;;  %v3626_v54 = vsel %vm768_vm2, %v3614_v56, %v6375_v19  ;;  %3897 = vmatpush1.bf16.msra.mxu1 %v3760_v43 }
 0x4c9   : > { %3641 = vst [vmem:[#allocation2] sm:$0xf] %v3625_v29  ;;  %3642 = vst [vmem:[#allocation2 + $0x2a0] sm:$0xf] %v3626_v54  ;;  %2381 = vrot.lane.b32.xlu1 %v6391_v46, %s4392_s16 }
 0x4ca   : > { %2435 = vrot.lane.b32.xlu0 %v5736_v10, %s4393_s17 }
 0x4cb   : > { %v6488_v39 = vpop.permute.xlu1 %3220  ;;  %v3275_v61 = vpop.permute.xlu0 %3274  ;;  %4272 = vmatmul.mubr.msk.bf16.vlgmr.msra.gmra.mxu1 %vm653_vm1, %v6446_v2 }
 0x4cc   : > { %v3286_v30 = vsel %vm423_vm3, %v5977_v23, %v3275_v61  ;;  %v3287_v49 = vsel %vm423_vm3, %v3275_v61, %v6385_v62  ;;  %3996 = vmatprep.mubr.bf16.mxu1 %v4397_v44  ;;  %v3747_v18 = vld [vmem:[#allocation2 + $0x368] sm:$0xff] }
 0x4cd   : > { %3302 = vst [vmem:[#allocation2 + $0x188] sm:$0xf] %v3286_v30  ;;  %3303 = vst [vmem:[#allocation2 + $0x238] sm:$0xf] %v3287_v49  ;;  %2441 = vrot.lane.b32.xlu1 %v2415_v15, %s4393_s17  ;;  %v3746_v44 = vld [vmem:[#allocation2 + $0x88] sm:$0xff] }
 0x4ce   : > { %2492 = vrot.lane.b32.xlu0 %v5728_v41, %s4394_s18  ;;  %v2528_v15 = vld [vmem:[#allocation3 + $0x20] sm:$0xf] }
 0x4cf   : > { %v6500_v46 = vpop.permute.xlu1 %3280  ;;  %v3332_v9 = vpop.permute.xlu0 %3331 }
 0x4d0   : > { %v3343_v23 = vsel %vm481_vm4, %v6038_v31, %v3332_v9  ;;  %v3344_v50 = vsel %vm481_vm4, %v3332_v9, %v6400_v20  ;;  %v3755_v38 = vld [vmem:[#allocation2 + $0x2a0] sm:$0xf]  ;;  %v6522_v9 = vcombine.high %v6312_v55, %v6312_v55 }
 0x4d1   : > { %v3754_v43 = vld [vmem:[#allocation2] sm:$0xf]  ;;  %3359 = vst [vmem:[#allocation2 + $0x188] sm:$0xf0] %v3343_v23  ;;  %3360 = vst [vmem:[#allocation2 + $0x238] sm:$0xf0] %v3344_v50  ;;  %2498 = vrot.lane.b32.xlu1 %v4365_v35, %s4394_s18  ;;  %v3811_v56 = vpack.c.bf16 %v3755_v38, %v3747_v18 }
 0x4d2   : > { %2548 = vrot.lane.b32.xlu0 %v5736_v10, %s4388_s12  ;;  %v3810_v29 = vpack.c.bf16 %v3754_v43, %v3746_v44  ;;  %v4367_v43 = vld [vmem:[#allocation3 + $0x20] ss:$0 sps:$4 sm:$0xff]  }
 0x4d3   : > { %v6509_v54 = vpop.permute.xlu1 %3337  ;;  %4273 = vmatprep.subr.msk.bf16.mxu0 %vm1917_vm5, %v3811_v56  ;;  %v3388_v31 = vpop.permute.xlu0 %3387 }
 0x4d4   : > { %v3830_v61 = vsel %vm1917_vm5, %v3810_v29, 0  ;;  %v3399_v30 = vsel %vm538_vm6, %v5987_v21, %v3388_v31  ;;  %v3400_v49 = vsel %vm538_vm6, %v3388_v31, %v6411_v8  ;;  %v4366_v21 = vld [vmem:[#allocation3 + $0x20] ss:$0 sps:$4 sm:$0xff]  }
 0x4d5   : > { %3926 = vmatpush1.bf16.msra.mxu0 %v3830_v61  ;;  %3415 = vst [vmem:[#allocation2 + $0x280] sm:$0xf] %v3399_v30  ;;  %3416 = vst [vmem:[#allocation2 + $0x300] sm:$0xf] %v3400_v49  ;;  %2554 = vrot.lane.b32.xlu1 %v2528_v15, %s4388_s12  ;;  %v2302_v61 = vld [vmem:[#allocation3 + $0x20] sm:$0xf] }
 0x4d6   : > { %2605 = vrot.lane.b32.xlu0 %v5728_v41, %s4389_s13 }
 0x4d7   : > { %v6524_v35 = vpop.permute.xlu1 %3393  ;;  %v3445_v18 = vpop.permute.xlu0 %3444 }
 0x4d8   : > { %v3456_v23 = vsel %vm596_vm7, %v6047_v26, %v3445_v18  ;;  %v3457_v50 = vsel %vm596_vm7, %v3445_v18, %v6419_v42  ;;  %v3731_v30 = vld [vmem:[#allocation2 + $0x238] sm:$0xff] }
 0x4d9   : > { %3472 = vst [vmem:[#allocation2 + $0x280] sm:$0xf0] %v3456_v23  ;;  %3473 = vst [vmem:[#allocation2 + $0x300] sm:$0xf0] %v3457_v50  ;;  %2611 = vrot.lane.b32.xlu1 %v4366_v21, %s4389_s13 }
 0x4da   : > { %2665 = vrot.lane.b32.xlu0 %v6522_v9, %s4390_s14 }
 0x4db   : > { %v6533_v38 = vpop.permute.xlu1 %3450  ;;  %v3505_v44 = vpop.permute.xlu0 %3504 }
 0x4dc   : > { %v3514_v56 = vsel %vm653_vm1, %v6356_v63, %v3505_v44  ;;  %v3515_v26 = vsel %vm653_vm1, %v3505_v44, %v6432_v25  ;;  %v3730_v25 = vld [vmem:[#allocation2 + $0x188] sm:$0xff] }
 0x4dd   : > { %3530 = vst [vmem:[#allocation2 + $0x180] sm:$0xf] %v3514_v56  ;;  %3531 = vst [vmem:[#allocation2 + $0x250] sm:$0xf] %v3515_v26  ;;  %2272 = vrot.lane.b32.xlu1 %v4367_v43, %s4395_s19 }
 0x4de   : > { %2745 = vrot.lane.b32.xlu0 %v6430_v32, %s4395_s19 }
 0x4df   : > { %v6542_v29 = vpop.permute.xlu1 %2856  ;;  %v3562_v31 = vpop.permute.xlu0 %3561 }
 0x4e0   : > { %v3571_v49 = vsel %vm711_vm0, %v6366_v37, %v3562_v31  ;;  %v3572_v63 = vsel %vm711_vm0, %v3562_v31, %v6441_v40  ;;  %v3739_v15 = vld [vmem:[#allocation2 + $0x300] sm:$0xff] }
 0x4e1   : > { %v3738_v18 = vld [vmem:[#allocation2 + $0x280] sm:$0xff]  ;;  %3587 = vst [vmem:[#allocation2 + $0x180] sm:$0xf0] %v3571_v49  ;;  %3588 = vst [vmem:[#allocation2 + $0x250] sm:$0xf0] %v3572_v63  ;;  %2328 = vrot.lane.b32.xlu1 %v2302_v61, %s4391_s15  ;;  %v3803_v32 = vpack.c.bf16 %v3739_v15, %v3731_v30 }
 0x4e2   : > { %2802 = vrot.lane.b32.xlu0 %v6230_v12, %s4391_s15  ;;  %v3802_v21 = vpack.c.bf16 %v3738_v18, %v3730_v25  ;;  %v4368_v37 = vld [vmem:[#allocation3 + $0x20] ss:$0 sps:$4 sm:$0xff]  }
 0x4e3   : > { %v6551_v23 = vpop.permute.xlu1 %2913  ;;  %3927 = vmatprep.subr.bf16.mxu0 %v3803_v32 }
 0x4e4   : > { %v3618_v50 = vpop.permute.xlu0 %3617  ;;  %3928 = vmatpush1.bf16.msra.mxu0 %v3802_v21 }
 0x4e5   : > { %v3627_v40 = vsel %vm768_vm2, %v6375_v19, %v3618_v50  ;;  %v3628_v44 = vsel %vm768_vm2, %v3618_v50, %v6457_v33  ;;  %2385 = vrot.lane.b32.xlu1 %v4368_v37, %s4392_s16 }
 0x4e6   : > { %3643 = vst [vmem:[#allocation2 + $0x1b0] sm:$0xf] %v3627_v40  ;;  %3644 = vst [vmem:[#allocation2 + $0x150] sm:$0xf] %v3628_v44  ;;  %2266 = vrot.lane.b32.xlu0 %v5728_v41, %s4395_s19 }
 0x4e7   : > { %v6560_v12 = vpop.permute.xlu1 %2969 }
 0x4e8   : > { %v3081_v43 = vpop.permute.xlu0 %3080  ;;  %v3749_v31 = vld [vmem:[#allocation2 + $0x250] sm:$0xff] }
 0x4e9   : > { %v3092_v56 = vsel %vm711_vm0, %v6017_v58, %v3081_v43  ;;  %v3093_v19 = vsel %vm711_vm0, %v3081_v43, %v6468_v17  ;;  %v3748_v58 = vld [vmem:[#allocation2 + $0x180] sm:$0xff] }
 0x4ea   : > { %3108 = vst [vmem:[#allocation2 + $0x338] sm:$0xf] %v3092_v56  ;;  %3109 = vst [vmem:[#allocation2 + $0x230] sm:$0xf] %v3093_v19  ;;  %2322 = vrot.lane.b32.xlu0 %v5736_v10, %s4391_s15 }
 0x4eb   : > { %v6568_v33 = vpop.permute.xlu1 %3026 }
 0x4ec   : > { %v3138_v26 = vpop.permute.xlu0 %3137 }
 0x4ed   : > { %v3149_v61 = vsel %vm768_vm2, %v6027_v13, %v3138_v26  ;;  %v3150_v30 = vsel %vm768_vm2, %v3138_v26, %v6478_v1  ;;  %v3757_v49 = vld [vmem:[#allocation2 + $0x150] sm:$0xf] }
 0x4ee   : > { %v3756_v63 = vld [vmem:[#allocation2 + $0x1b0] sm:$0xf]  ;;  %3165 = vst [vmem:[#allocation2 + $0x338] sm:$0xf0] %v3149_v61  ;;  %3166 = vst [vmem:[#allocation2 + $0x230] sm:$0xf0] %v3150_v30  ;;  %2379 = vrot.lane.b32.xlu0 %v5728_v41, %s4392_s16  ;;  %v3813_v15 = vpack.c.bf16 %v3757_v49, %v3749_v31 }
 0x4ef   : > { %v3812_v10 = vpack.c.bf16 %v3756_v63, %v3748_v58  ;;  %v6576_v25 = vpop.permute.xlu1 %3086 }
 0x4f0   : > { %4275 = vmatprep.subr.msk.bf16.mxu1 %vm1917_vm5, %v3813_v15  ;;  %v3219_v18 = vpop.permute.xlu0 %3218 }
 0x4f1   : > { %v3836_v13 = vsel %vm1917_vm5, %v3812_v10, 0  ;;  %v3230_v32 = vsel %vm366_vm8, %v6036_v27, %v3219_v18  ;;  %v3231_v21 = vsel %vm366_vm8, %v3219_v18, %v6488_v39 }
 0x4f2   : > { %3967 = vmatpush1.bf16.msra.mxu1 %v3836_v13  ;;  %3246 = vst [vmem:[#allocation2 + $0x80] sm:$0xf0] %v3230_v32  ;;  %3247 = vst [vmem:[#allocation2 + $0x1f0] sm:$0xf0] %v3231_v21  ;;  %2439 = vrot.lane.b32.xlu0 %v6522_v9, %s4393_s17 }
 0x4f3   : > { %v6586_v41 = vpop.permute.xlu1 %3143 }
 0x4f4   : > { %v3279_v50 = vpop.permute.xlu0 %3278 }
 0x4f5   : > { %v3288_v37 = vsel %vm423_vm3, %v6385_v62, %v3279_v50  ;;  %v3289_v40 = vsel %vm423_vm3, %v3279_v50, %v6500_v46  ;;  %v3715_v43 = vld [vmem:[#allocation2 + $0x230] sm:$0xff]  ;;  %v3714_v62 = vld [vmem:[#allocation2 + $0x338] sm:$0xff] }
 0x4f6   : > { %3304 = vst [vmem:[#allocation2 + $0x2c8] sm:$0xf] %v3288_v37  ;;  %3305 = vst [vmem:[#allocation2 + $0x70] sm:$0xf] %v3289_v40  ;;  %2496 = vrot.lane.b32.xlu0 %v6312_v55, %s4394_s18 }
 0x4f7   : > { %v6594_v27 = vpop.permute.xlu1 %3224 }
 0x4f8   : > { %v3336_v44 = vpop.permute.xlu0 %3335 }
 0x4f9   : > { %v3345_v56 = vsel %vm481_vm4, %v6400_v20, %v3336_v44  ;;  %v3346_v19 = vsel %vm481_vm4, %v3336_v44, %v6509_v54  ;;  %v3723_v26 = vld [vmem:[#allocation2 + $0x1f0] sm:$0xff]  ;;  %v3722_v31 = vld [vmem:[#allocation2 + $0x80] sm:$0xff] }
 0x4fa   : > { %3361 = vst [vmem:[#allocation2 + $0x2c8] sm:$0xf0] %v3345_v56  ;;  %3362 = vst [vmem:[#allocation2 + $0x70] sm:$0xf0] %v3346_v19  ;;  %2552 = vrot.lane.b32.xlu0 %v6522_v9, %s4388_s12  ;;  %v3795_v46 = vpack.c.bf16 %v3723_v26, %v3715_v43  ;;  %v3794_v61 = vpack.c.bf16 %v3722_v31, %v3714_v62 }
 0x4fb   : > { %v6602_v30 = vpop.permute.xlu1 %2663 }
 0x4fc   : > { %3929 = vmatprep.subr.bf16.mxu0 %v3795_v46  ;;  %v3392_v49 = vpop.permute.xlu0 %3391 }
 0x4fd   : > { %v3401_v20 = vsel %vm538_vm6, %v6411_v8, %v3392_v49  ;;  %v3402_v54 = vsel %vm538_vm6, %v3392_v49, %v6524_v35  ;;  %3930 = vmatpush1.bf16.msra.mxu0 %v3794_v61 }
 0x4fe   : > { %3417 = vst [vmem:[#allocation2 + $0x308] sm:$0xf] %v3401_v20  ;;  %3418 = vst [vmem:[#allocation2 + $0x290] sm:$0xf] %v3402_v54  ;;  %2609 = vrot.lane.b32.xlu0 %v6312_v55, %s4389_s13 }
 0x4ff   : > { %v6610_v58 = vpop.permute.xlu1 %2743 }
 0x500   : > { %v3449_v63 = vpop.permute.xlu0 %3448 }
 0x501   : > { %v3458_v15 = vsel %vm596_vm7, %v6419_v42, %v3449_v63  ;;  %v3459_v10 = vsel %vm596_vm7, %v3449_v63, %v6533_v38  ;;  %v3733_v32 = vld [vmem:[#allocation2 + $0x70] sm:$0xff] }
 0x502   : > { %3474 = vst [vmem:[#allocation2 + $0x308] sm:$0xf0] %v3458_v15  ;;  %3475 = vst [vmem:[#allocation2 + $0x290] sm:$0xf0] %v3459_v10  ;;  %2270 = vrot.lane.b32.xlu0 %v6312_v55, %s4395_s19 }
 0x503   : > { %v6618_v8 = vpop.permute.xlu1 %2800 }
 0x504   : > { %v2855_v35 = vpop.permute.xlu0 %2854 }
 0x505   : > { %v2866_v18 = vsel %vm481_vm4, %v6095_v4, %v2855_v35  ;;  %v2867_v13 = vsel %vm481_vm4, %v2855_v35, %v6542_v29  ;;  %v3732_v4 = vld [vmem:[#allocation2 + $0x2c8] sm:$0xff] }
 0x506   : > { %2882 = vst [vmem:[#allocation2 + $0x2e8] sm:$0xf] %v2866_v18  ;;  %2883 = vst [vmem:[#allocation2 + $0x208] sm:$0xf] %v2867_v13  ;;  %2326 = vrot.lane.b32.xlu0 %v6522_v9, %s4391_s15 }
 0x507   : > { %v6626_v42 = vpop.permute.xlu1 %2860 }
 0x508   : > { %v2912_v38 = vpop.permute.xlu0 %2911 }
 0x509   : > { %v2923_v21 = vsel %vm538_vm6, %v6104_v6, %v2912_v38  ;;  %v2924_v50 = vsel %vm538_vm6, %v2912_v38, %v6551_v23  ;;  %v3741_v37 = vld [vmem:[#allocation2 + $0x290] sm:$0xff]  ;;  %v3740_v40 = vld [vmem:[#allocation2 + $0x308] sm:$0xff] }
 0x50a   : > { %2939 = vst [vmem:[#allocation2 + $0x2e8] sm:$0xf0] %v2923_v21  ;;  %2940 = vst [vmem:[#allocation2 + $0x208] sm:$0xf0] %v2924_v50  ;;  %2383 = vrot.lane.b32.xlu0 %v6312_v55, %s4392_s16  ;;  %v3805_v44 = vpack.c.bf16 %v3741_v37, %v3733_v32  ;;  %v3804_v9 = vpack.c.bf16 %v3740_v40, %v3732_v4 }
 0x50b   : > { %v6634_v43 = vpop.permute.xlu1 %2917 }
 0x50c   : > { %3968 = vmatprep.subr.bf16.mxu1 %v3805_v44  ;;  %v2968_v56 = vpop.permute.xlu0 %2967 }
 0x50d   : > { %v2979_v6 = vsel %vm596_vm7, %v6114_v36, %v2968_v56  ;;  %v2980_v19 = vsel %vm596_vm7, %v2968_v56, %v6560_v12  ;;  %3969 = vmatpush1.bf16.msra.mxu1 %v3804_v9 }
 0x50e   : > { %2995 = vst [vmem:[#allocation2 + $0x138] sm:$0xf] %v2979_v6  ;;  %2996 = vst [vmem:[#allocation2 + $0x2c0] sm:$0xf] %v2980_v19 }
 0x50f   : > { %v6640_v26 = vpop.permute.xlu1 %2973 }
 0x510   : > { %v3025_v62 = vpop.permute.xlu0 %3024 }
 0x511   : > { %v3036_v55 = vsel %vm653_vm1, %v6124_v22, %v3025_v62  ;;  %v3037_v31 = vsel %vm653_vm1, %v3025_v62, %v6568_v33  ;;  %v3699_v54 = vld [vmem:[#allocation2 + $0x208] sm:$0xff] }
 0x512   : > { %3052 = vst [vmem:[#allocation2 + $0x138] sm:$0xf0] %v3036_v55  ;;  %3053 = vst [vmem:[#allocation2 + $0x2c0] sm:$0xf0] %v3037_v31  ;;  %v3698_v10 = vld [vmem:[#allocation2 + $0x2e8] sm:$0xff] }
 0x513   : > { %v6650_v49 = vpop.permute.xlu1 %3030 }
 0x514   : > { %v3085_v46 = vpop.permute.xlu0 %3084 }
 0x515   : > { %v3094_v36 = vsel %vm711_vm0, %v6468_v17, %v3085_v46  ;;  %v3095_v61 = vsel %vm711_vm0, %v3085_v46, %v6576_v25 }
 0x516   : > { %3110 = vst [vmem:[#allocation2 + $0xc0] sm:$0xf] %v3094_v36  ;;  %3111 = vst [vmem:[#allocation2 + $0x128] sm:$0xf] %v3095_v61 }
 0x517   : > { %v6656_v25 = vpop.permute.xlu1 %2437 }
 0x518   : > { %v3142_v20 = vpop.permute.xlu0 %3141 }
 0x519   : > { %v3151_v22 = vsel %vm768_vm2, %v6478_v1, %v3142_v20  ;;  %v3152_v63 = vsel %vm768_vm2, %v3142_v20, %v6586_v41  ;;  %v3707_v15 = vld [vmem:[#allocation2 + $0x2c0] sm:$0xff]  ;;  %v3706_v35 = vld [vmem:[#allocation2 + $0x138] sm:$0xff] }
 0x51a   : > { %3167 = vst [vmem:[#allocation2 + $0xc0] sm:$0xf0] %v3151_v22  ;;  %3168 = vst [vmem:[#allocation2 + $0x128] sm:$0xf0] %v3152_v63  ;;  %v3787_v17 = vpack.c.bf16 %v3707_v15, %v3699_v54  ;;  %v3786_v18 = vpack.c.bf16 %v3706_v35, %v3698_v10 }
 0x51b   : > { %v6666_v50 = vpop.permute.xlu1 %2494 }
 0x51c   : > { %3931 = vmatprep.subr.bf16.mxu0 %v3787_v17  ;;  %v3223_v13 = vpop.permute.xlu0 %3222 }
 0x51d   : > { %v3232_v38 = vsel %vm366_vm8, %v6488_v39, %v3223_v13  ;;  %v3233_v1 = vsel %vm366_vm8, %v3223_v13, %v6594_v27  ;;  %3932 = vmatpush1.bf16.msra.mxu0 %v3786_v18 }
 0x51e   : > { %3248 = vst [vmem:[#allocation2 + $0x160] sm:$0xf0] %v3232_v38  ;;  %3249 = vst [vmem:[#allocation2 + $0x60] sm:$0xf0] %v3233_v1 }
 0x51f   : > { %v6672_v6 = vpop.permute.xlu1 %2550 }
 0x520   : > { %v2662_v41 = vpop.permute.xlu0 %2661 }
 0x521   : > { %v2673_v32 = vsel %vm768_vm2, %v6283_v51, %v2662_v41  ;;  %v2674_v21 = vsel %vm768_vm2, %v2662_v41, %v6602_v30  ;;  %v3717_v4 = vld [vmem:[#allocation2 + $0x128] sm:$0xff]  ;;  %v3716_v44 = vld [vmem:[#allocation2 + $0xc0] sm:$0xff] }
 0x522   : > { %2689 = vst [vmem:[#allocation2 + $0x98] sm:$0xf] %v2673_v32  ;;  %2690 = vst [vmem:[#allocation2 + $0xa0] sm:$0xf] %v2674_v21 }
 0x523   : > { %v6682_v36 = vpop.permute.xlu1 %2607 }
 0x524   : > { %v2742_v37 = vpop.permute.xlu0 %2741 }
 0x525   : > { %v2753_v39 = vsel %vm366_vm8, %v6295_v34, %v2742_v37  ;;  %v2754_v27 = vsel %vm366_vm8, %v2742_v37, %v6610_v58  ;;  %v3725_v40 = vld [vmem:[#allocation2 + $0x60] sm:$0xff] }
 0x526   : > { %v3724_v9 = vld [vmem:[#allocation2 + $0x160] sm:$0xff]  ;;  %2769 = vst [vmem:[#allocation2 + $0x248] sm:$0xf] %v2753_v39  ;;  %2770 = vst [vmem:[#allocation2 + $0x340] sm:$0xf] %v2754_v27  ;;  %v3797_v51 = vpack.c.bf16 %v3725_v40, %v3717_v4 }
 0x527   : > { %v3796_v56 = vpack.c.bf16 %v3724_v9, %v3716_v44 }
 0x528   : > { %3970 = vmatprep.subr.bf16.mxu1 %v3797_v51  ;;  %v2799_v19 = vpop.permute.xlu0 %2798 }
 0x529   : > { %v2810_v62 = vsel %vm423_vm3, %v6305_v14, %v2799_v19  ;;  %v2811_v34 = vsel %vm423_vm3, %v2799_v19, %v6618_v8  ;;  %3971 = vmatpush1.bf16.msra.mxu1 %v3796_v56  ;;  %v3683_v20 = vld [vmem:[#allocation2 + $0xa0] sm:$0xff]  ;;  %v3682_v63 = vld [vmem:[#allocation2 + $0x98] sm:$0xff] }
 0x52a   : > { %2826 = vst [vmem:[#allocation2 + $0x248] sm:$0xf0] %v2810_v62  ;;  %2827 = vst [vmem:[#allocation2 + $0x340] sm:$0xf0] %v2811_v34 }
 0x52c   : > { %v2859_v55 = vpop.permute.xlu0 %2858 }
 0x52d   : > { %v2868_v31 = vsel %vm481_vm4, %v6542_v29, %v2859_v55  ;;  %v2869_v46 = vsel %vm481_vm4, %v2859_v55, %v6626_v42  ;;  %v2668_v42 = vpop.permute.xlu1 %2667 }
 0x52e   : > { %2884 = vst [vmem:[#allocation2 + $0x2f8] sm:$0xf] %v2868_v31  ;;  %2885 = vst [vmem:[#allocation2 + $0x268] sm:$0xf] %v2869_v46 }
 0x530   : > { %v2916_v61 = vpop.permute.xlu0 %2915 }
 0x531   : > { %v2925_v14 = vsel %vm538_vm6, %v6551_v23, %v2916_v61  ;;  %v2926_v54 = vsel %vm538_vm6, %v2916_v61, %v6634_v43  ;;  %v3691_v22 = vld [vmem:[#allocation2 + $0x340] sm:$0xff]  ;;  %v3690_v15 = vld [vmem:[#allocation2 + $0x248] sm:$0xff]  ;;  %v2748_v38 = vpop.permute.xlu1 %2747 }
 0x532   : > { %2941 = vst [vmem:[#allocation2 + $0x2f8] sm:$0xf0] %v2925_v14  ;;  %2942 = vst [vmem:[#allocation2 + $0x268] sm:$0xf0] %v2926_v54  ;;  %v3779_v29 = vpack.c.bf16 %v3691_v22, %v3683_v20  ;;  %v3778_v10 = vpack.c.bf16 %v3690_v15, %v3682_v63 }
 0x534   : > { %3933 = vmatprep.subr.bf16.mxu0 %v3779_v29  ;;  %v2972_v35 = vpop.permute.xlu0 %2971 }
 0x535   : > { %v2981_v17 = vsel %vm596_vm7, %v6560_v12, %v2972_v35  ;;  %v2982_v18 = vsel %vm596_vm7, %v2972_v35, %v6640_v26  ;;  %3934 = vmatpush1.bf16.msra.mxu0 %v3778_v10  ;;  %v2805_v41 = vpop.permute.xlu1 %2804 }
 0x536   : > { %2997 = vst [vmem:[#allocation2 + $0xe8] sm:$0xf] %v2981_v17  ;;  %2998 = vst [vmem:[#allocation2 + $0x1d8] sm:$0xf] %v2982_v18 }
 0x538   : > { %v3029_v23 = vpop.permute.xlu0 %3028 }
 0x539   : > { %v3038_v43 = vsel %vm653_vm1, %v6568_v33, %v3029_v23  ;;  %v3039_v13 = vsel %vm653_vm1, %v3029_v23, %v6650_v49  ;;  %v3701_v21 = vld [vmem:[#allocation2 + $0x268] sm:$0xff]  ;;  %v3700_v4 = vld [vmem:[#allocation2 + $0x2f8] sm:$0xff] }
 0x53a   : > { %3054 = vst [vmem:[#allocation2 + $0xe8] sm:$0xf0] %v3038_v43  ;;  %3055 = vst [vmem:[#allocation2 + $0x1d8] sm:$0xf0] %v3039_v13 }
 0x53c   : > { %v2436_v1 = vpop.permute.xlu0 %2435 }
 0x53d   : > { %v2447_v12 = vsel %vm538_vm6, %v6368_v28, %v2436_v1  ;;  %v2448_v26 = vsel %vm538_vm6, %v2436_v1, %v6656_v25 }
 0x53e   : > { %2463 = vst [vmem:[#allocation2 + $0x1a8] sm:$0xf] %v2447_v12  ;;  %2464 = vst [vmem:[#allocation2 + $0x158] sm:$0xf] %v2448_v26 }
 0x540   : > { %v2493_v32 = vpop.permute.xlu0 %2492 }
 0x541   : > { %v2504_v33 = vsel %vm596_vm7, %v6377_v52, %v2493_v32  ;;  %v2505_v49 = vsel %vm596_vm7, %v2493_v32, %v6666_v50  ;;  %v3709_v37 = vld [vmem:[#allocation2 + $0x1d8] sm:$0xff]  ;;  %v3708_v39 = vld [vmem:[#allocation2 + $0xe8] sm:$0xff]  ;;  %v6708_v52 = vpop.permute.xlu1 %2268 }
 0x542   : > { %2520 = vst [vmem:[#allocation2 + $0x1a8] sm:$0xf0] %v2504_v33  ;;  %2521 = vst [vmem:[#allocation2 + $0x158] sm:$0xf0] %v2505_v49  ;;  %v3789_v28 = vpack.c.bf16 %v3709_v37, %v3701_v21  ;;  %v3788_v27 = vpack.c.bf16 %v3708_v39, %v3700_v4 }
 0x544   : > { %3972 = vmatprep.subr.bf16.mxu1 %v3789_v28  ;;  %v2549_v40 = vpop.permute.xlu0 %2548 }
 0x545   : > { %v2560_v44 = vsel %vm653_vm1, %v6387_v45, %v2549_v40  ;;  %v2561_v9 = vsel %vm653_vm1, %v2549_v40, %v6672_v6  ;;  %3973 = vmatpush1.bf16.msra.mxu1 %v3788_v27  ;;  %v6714_v62 = vpop.permute.xlu1 %2324 }
 0x546   : > { %2576 = vst [vmem:[#allocation2 + $0xe0] sm:$0xf] %v2560_v44  ;;  %2577 = vst [vmem:[#allocation2 + $0x130] sm:$0xf] %v2561_v9 }
 0x548   : > { %v2606_v51 = vpop.permute.xlu0 %2605 }
 0x549   : > { %v2617_v56 = vsel %vm711_vm0, %v6402_v24, %v2606_v51  ;;  %v2618_v19 = vsel %vm711_vm0, %v2606_v51, %v6682_v36  ;;  %v3667_v46 = vld [vmem:[#allocation2 + $0x158] sm:$0xff]  ;;  %v3666_v14 = vld [vmem:[#allocation2 + $0x1a8] sm:$0xff]  ;;  %v6722_v22 = vpop.permute.xlu1 %2381 }
 0x54a   : > { %2633 = vst [vmem:[#allocation2 + $0xe0] sm:$0xf0] %v2617_v56  ;;  %2634 = vst [vmem:[#allocation2 + $0x130] sm:$0xf0] %v2618_v19 }
 0x54c   : > { %v2666_v45 = vpop.permute.xlu0 %2665 }
 0x54d   : > { %v2675_v34 = vsel %vm768_vm2, %v6602_v30, %v2666_v45  ;;  %v2676_v55 = vsel %vm768_vm2, %v2666_v45, %v2668_v42 }
 0x54e   : > { %2691 = vst [vmem:[#allocation2 + $0x320] sm:$0xf] %v2675_v34  ;;  %2692 = vst [vmem:[#allocation2 + $0xf0] sm:$0xf] %v2676_v55 }
 0x550   : > { %v2746_v31 = vpop.permute.xlu0 %2745 }
 0x551   : > { %v2755_v24 = vsel %vm366_vm8, %v6610_v58, %v2746_v31  ;;  %v2756_v61 = vsel %vm366_vm8, %v2746_v31, %v2748_v38  ;;  %v3675_v20 = vld [vmem:[#allocation2 + $0x130] sm:$0xff]  ;;  %v3674_v54 = vld [vmem:[#allocation2 + $0xe0] sm:$0xff]  ;;  %v2442_v58 = vpop.permute.xlu1 %2441 }
 0x552   : > { %2771 = vst [vmem:[#allocation2 + $0x2a8] sm:$0xf] %v2755_v24  ;;  %2772 = vst [vmem:[#allocation2 + $0x310] sm:$0xf] %v2756_v61  ;;  %v3771_v63 = vpack.c.bf16 %v3675_v20, %v3667_v46  ;;  %v3770_v30 = vpack.c.bf16 %v3674_v54, %v3666_v14 }
 0x554   : > { %3935 = vmatprep.subr.bf16.mxu0 %v3771_v63  ;;  %v2803_v15 = vpop.permute.xlu0 %2802 }
 0x555   : > { %v2812_v29 = vsel %vm423_vm3, %v6618_v8, %v2803_v15  ;;  %v2813_v10 = vsel %vm423_vm3, %v2803_v15, %v2805_v41  ;;  %3936 = vmatpush1.bf16.msra.mxu0 %v3770_v30  ;;  %v3685_v23 = vld [vmem:[#allocation2 + $0xf0] sm:$0xff]  ;;  %v3684_v38 = vld [vmem:[#allocation2 + $0x320] sm:$0xff]  ;;  %v2499_v12 = vpop.permute.xlu1 %2498 }
 0x556   : > { %2828 = vst [vmem:[#allocation2 + $0x2a8] sm:$0xf0] %v2812_v29  ;;  %2829 = vst [vmem:[#allocation2 + $0x310] sm:$0xf0] %v2813_v10 }
 0x558   : > { %v2267_v42 = vpop.permute.xlu0 %2266 }
 0x559   : > { %v2278_v35 = vsel %vm366_vm8, %v6326_v7, %v2267_v42  ;;  %v2279_v17 = vsel %vm366_vm8, %v2267_v42, %v6708_v52 }
 0x55a   : > { %2294 = vst [vmem:[#allocation2 + $0x360] sm:$0xf0] %v2278_v35  ;;  %2295 = vst [vmem:[#allocation2 + $0x328] sm:$0xf0] %v2279_v17 }
 0x55c   : > { %v2323_v18 = vpop.permute.xlu0 %2322 }
 0x55d   : > { %v2334_v8 = vsel %vm423_vm3, %v6334_v16, %v2323_v18  ;;  %v2335_v43 = vsel %vm423_vm3, %v2323_v18, %v6714_v62  ;;  %v3693_v13 = vld [vmem:[#allocation2 + $0x310] sm:$0xff]  ;;  %v3692_v1 = vld [vmem:[#allocation2 + $0x2a8] sm:$0xff]  ;;  %v2555_v16 = vpop.permute.xlu1 %2554 }
 0x55e   : > { %2350 = vst [vmem:[#allocation2 + $0x148] sm:$0xf] %v2334_v8  ;;  %2351 = vst [vmem:[#allocation2 + $0x100] sm:$0xf] %v2335_v43  ;;  %v3781_v7 = vpack.c.bf16 %v3693_v13, %v3685_v23  ;;  %v3780_v26 = vpack.c.bf16 %v3692_v1, %v3684_v38 }
 0x560   : > { %3974 = vmatprep.subr.bf16.mxu1 %v3781_v7  ;;  %v2380_v41 = vpop.permute.xlu0 %2379 }
 0x561   : > { %v2391_v32 = vsel %vm481_vm4, %v6346_v5, %v2380_v41  ;;  %v2392_v21 = vsel %vm481_vm4, %v2380_v41, %v6722_v22  ;;  %3975 = vmatpush1.bf16.msra.mxu1 %v3780_v26  ;;  %v3651_v39 = vld [vmem:[#allocation2 + $0x328] sm:$0xff]  ;;  %v3650_v40 = vld [vmem:[#allocation2 + $0x360] sm:$0xff]  ;;  %v2612_v9 = vpop.permute.xlu1 %2611 }
 0x562   : > { %2407 = vst [vmem:[#allocation2 + $0x148] sm:$0xf0] %v2391_v32  ;;  %2408 = vst [vmem:[#allocation2 + $0x100] sm:$0xf0] %v2392_v21  ;;  %v4005_v32 = vld [vmem:[%s6868_s7] sm:$0xff] }
 0x564   : > { %v2440_v33 = vpop.permute.xlu0 %2439 }
 0x565   : > { %v2449_v49 = vsel %vm538_vm6, %v6656_v25, %v2440_v33  ;;  %v2450_v37 = vsel %vm538_vm6, %v2440_v33, %v2442_v58  ;;  %v4010_v33 = vrot.slane %v4005_v32, %v5572_v3 }
 0x566   : > { %2465 = vst [vmem:[#allocation2 + $0x2e0] sm:$0xf] %v2449_v49  ;;  %2466 = vst [vmem:[#allocation2 + $0x278] sm:$0xf] %v2450_v37  ;;  %v4014_v49 = vrot.slane %v4005_v32, %v2128_v47 }
 0x568   : > { %v2497_v4 = vpop.permute.xlu0 %2496 }
 0x569   : > { %v2506_v5 = vsel %vm596_vm7, %v6666_v50, %v2497_v4  ;;  %v2507_v28 = vsel %vm596_vm7, %v2497_v4, %v2499_v12  ;;  %v3659_v27 = vld [vmem:[#allocation2 + $0x100] sm:$0xff]  ;;  %v3658_v44 = vld [vmem:[#allocation2 + $0x148] sm:$0xff]  ;;  %v2273_v50 = vpop.permute.xlu1 %2272 }
 0x56a   : > { %2522 = vst [vmem:[#allocation2 + $0x2e0] sm:$0xf0] %v2506_v5  ;;  %2523 = vst [vmem:[#allocation2 + $0x278] sm:$0xf0] %v2507_v28  ;;  %v3763_v51 = vpack.c.bf16 %v3659_v27, %v3651_v39  ;;  %v3762_v56 = vpack.c.bf16 %v3658_v44, %v3650_v40  ;;  %v4018_v5 = vrot.slane %v4005_v32, %v2132_v0 }
 0x56b   : > { %v4022_v44 = vrot.slane %v4005_v32, %v2136_v59 }
 0x56c   : > { %3937 = vmatprep.subr.bf16.mxu0 %v3763_v51  ;;  %v2553_v25 = vpop.permute.xlu0 %2552 }
 0x56d   : > { %v2562_v19 = vsel %vm653_vm1, %v6672_v6, %v2553_v25  ;;  %v2563_v45 = vsel %vm653_vm1, %v2553_v25, %v2555_v16  ;;  %3938 = vmatpush1.bf16.msra.mxu0 %v3762_v56  ;;  %v2329_v61 = vpop.permute.xlu1 %2328  ;;  %v4026_v56 = vrot.slane %v4005_v32, %v2140_v57 }
 0x56e   : > { %2578 = vst [vmem:[#allocation2 + $0x1e8] sm:$0xf] %v2562_v19  ;;  %2579 = vst [vmem:[#allocation2 + $0x38] sm:$0xf] %v2563_v45  ;;  %v4030_v45 = vrot.slane %v4005_v32, %v2144_v11 }
 0x570   : > { %v2610_v34 = vpop.permute.xlu0 %2609  ;;  %4274 = vmatmul.mubr.msk.bf16.vlgmr.msra.gmra.mxu0 %vm653_vm1, %v6446_v2 }
 0x571   : > { %v2619_v55 = vsel %vm711_vm0, %v6682_v36, %v2610_v34  ;;  %v2620_v31 = vsel %vm711_vm0, %v2610_v34, %v2612_v9  ;;  %v3669_v14 = vld [vmem:[#allocation2 + $0x278] sm:$0xff]  ;;  %v3668_v30 = vld [vmem:[#allocation2 + $0x2e0] sm:$0xff] }
 0x572   : > { %2635 = vst [vmem:[#allocation2 + $0x1e8] sm:$0xf0] %v2619_v55  ;;  %2636 = vst [vmem:[#allocation2 + $0x38] sm:$0xf0] %v2620_v31  ;;  %v4034_v55 = vrot.slane %v4005_v32, %v2148_v60 }
 0x574   : > { %v2271_v46 = vpop.permute.xlu0 %2270 }
 0x575   : > { %v2280_v6 = vsel %vm366_vm8, %v6708_v52, %v2271_v46  ;;  %v2281_v24 = vsel %vm366_vm8, %v2271_v46, %v2273_v50  ;;  %v2386_v52 = vpop.permute.xlu1 %2385  ;;  %v4038_v46 = vrot.slane %v4005_v32, %v2152_v48 }
 0x576   : > { %2296 = vst [vmem:[#allocation2 + $0x40] sm:$0xf0] %v2280_v6  ;;  %2297 = vst [vmem:[#allocation2 + $0x378] sm:$0xf0] %v2281_v24 }
 0x578   : > { %v2327_v20 = vpop.permute.xlu0 %2326 }
 0x579   : > { %v2336_v54 = vsel %vm423_vm3, %v6714_v62, %v2327_v20  ;;  %v2337_v36 = vsel %vm423_vm3, %v2327_v20, %v2329_v61  ;;  %v3677_v63 = vld [vmem:[#allocation2 + $0x38] sm:$0xff]  ;;  %v3676_v15 = vld [vmem:[#allocation2 + $0x1e8] sm:$0xff] }
 0x57a   : > { %2352 = vst [vmem:[#allocation2 + $0x58] sm:$0xf] %v2336_v54  ;;  %2353 = vst [vmem:[#allocation2 + $0x2d8] sm:$0xf] %v2337_v36  ;;  %v3773_v29 = vpack.c.bf16 %v3677_v63, %v3669_v14  ;;  %v3772_v10 = vpack.c.bf16 %v3676_v15, %v3668_v30  ;;  %v4101_v63 = vld [vmem:[%s4461_s11 + $0x4] sm:$0xff]  ;;  %v4102_v15 = vld [vmem:[%s4461_s11 + $0xc] sm:$0xff] }
 0x57b   : > { %4128 = vrot.lane.b32.xlu1 %v4101_v63, %s4393_s17  ;;  %v4124_v30 = vcombine.high %v4101_v63, %v4101_v63 }
 0x57c   : > { %3976 = vmatprep.subr.bf16.mxu1 %v3773_v29  ;;  %v2384_v58 = vpop.permute.xlu0 %2383  ;;  %v4125_v29 = vcombine.high %v4102_v15, %v4102_v15 }
 0x57d   : > { %v2393_v42 = vsel %vm481_vm4, %v6722_v22, %v2384_v58  ;;  %v2394_v35 = vsel %vm481_vm4, %v2384_v58, %v2386_v52  ;;  %3977 = vmatpush1.bf16.msra.mxu1 %v3772_v10  ;;  %v3653_v23 = vld [vmem:[#allocation2 + $0x378] sm:$0xff]  ;;  %v3652_v43 = vld [vmem:[#allocation2 + $0x40] sm:$0xff] }
 0x57e   : > { %2409 = vst [vmem:[#allocation2 + $0x58] sm:$0xf0] %v2393_v42  ;;  %2410 = vst [vmem:[#allocation2 + $0x2d8] sm:$0xf0] %v2394_v35  ;;  %v6762_v62 = vpop.f32.mrf.mxu0  ;;  %v4103_v10 = vld [vmem:[%s4461_s11 + $0x14] sm:$0xff]  ;;  %v4104_v58 = vld [vmem:[%s4461_s11 + $0x1c] sm:$0xff] }
 0x57f   : > { %v4047_v4 = vmul.f32 %v4010_v33, %v6762_v62  ;;  %4130 = vrot.lane.b32.xlu1 %v4124_v30, %s4393_s17  ;;  %v4126_v52 = vcombine.high %v4103_v10, %v4103_v10  ;;  %v4127_v42 = vcombine.high %v4104_v58, %v4104_v58  ;;  %v4073_v35 = vld [vmem:[%s6864_s3] sm:$0xf] }
 0x580   : > { %v6764_v17 = vpop.f32.mrf.mxu0 }
 0x581   : > { %v4048_v39 = vmul.f32 %v4014_v49, %v6764_v17  ;;  %v4055_v28 = vsel %vm2196_vm13, %v4047_v4, 0.0  ;;  %v4093_v4 = vld [vmem:[%s6867_s6] sm:$0xf] }
 0x582   : > { %v3879_v18 = vpop.f32.mrf.mxu0 }
 0x583   : > { %v4056_v27 = vsel %vm2196_vm13, %v4048_v39, 0.0  ;;  %4132 = vrot.lane.b32.xlu1 %v4102_v15, %s4393_s17 }
 0x584   : > { %v3880_v38 = vpop.f32.mrf.mxu0  ;;  %v4057_v9 = vadd.f32 %v4056_v27, %v4055_v28 }
 0x585   : > { %v3661_v8 = vld [vmem:[#allocation2 + $0x2d8] sm:$0xff] }
 0x586   : > { %v3660_v13 = vld [vmem:[#allocation2 + $0x58] sm:$0xff]  ;;  %v3765_v1 = vpack.c.bf16 %v3661_v8, %v3653_v23 }
 0x587   : > { %v3764_v12 = vpack.c.bf16 %v3660_v13, %v3652_v43  ;;  %4134 = vrot.lane.b32.xlu1 %v4125_v29, %s4393_s17 }
 0x588   : > { %3978 = vmatprep.subr.bf16.mxu1 %v3765_v1 }
 0x589   : > { %3979 = vmatpush1.bf16.msra.mxu1 %v3764_v12 }
 0x58b   : > { %v6768_v22 = vpop.f32.mrf.mxu1  ;;  %4136 = vrot.lane.b32.xlu1 %v4103_v10, %s4393_s17 }
 0x58c   : > { %4276 = vmatmul.mubr.msk.bf16.vlgmr.msra.gmra.mxu1 %vm653_vm1, %v6446_v2  ;;  %v4049_v40 = vmul.f32 %v4018_v5, %v6768_v22 }
 0x58d   : > { %v6770_v7 = vpop.f32.mrf.mxu1 }
 0x58e   : > { %v4058_v47 = vsel %vm2196_vm13, %v4049_v40, 0.0  ;;  %v4050_v51 = vmul.f32 %v4022_v44, %v6770_v7 }
 0x58f   : > { %v3920_v26 = vpop.f32.mrf.mxu1  ;;  %v4059_v25 = vadd.f32 %v4058_v47, %v4057_v9  ;;  %4138 = vrot.lane.b32.xlu1 %v4126_v52, %s4393_s17  ;;  %v4105_v9 = vld [vmem:[%s4461_s11 + $0x24] sm:$0xf]  ;;  %s4280_s11 = sshll.u32 %s6871_s30, 5 }
 0x590   : > { %v4060_v0 = vsel %vm2196_vm13, %v4050_v51, 0.0 }
 0x591   : > { %v3921_v41 = vpop.f32.mrf.mxu1  ;;  %v4061_v50 = vadd.f32 %v4060_v0, %v4059_v25 }
 0x592   : > { %v4083_v41 = vld [vmem:[#allocation4] sm:$0x1] }
 0x5ed   : > { %v4129_v47 = vpop.permute.xlu1 %4128 }
 0x630   : > { %v6775_v21 = vpop.f32.mrf.mxu0 }
 0x631   : > { %v4051_v19 = vmul.f32 %v4026_v56, %v6775_v21 }
 0x632   : > { %v6777_v16 = vpop.f32.mrf.mxu0 }
 0x633   : > { %v4062_v34 = vsel %vm2196_vm13, %v4051_v19, 0.0  ;;  %v4052_v59 = vmul.f32 %v4030_v45, %v6777_v16 }
 0x634   : > { %v3961_v2 = vpop.f32.mrf.mxu0  ;;  %v4063_v31 = vadd.f32 %v4062_v34, %v4061_v50 }
 0x635   : > { %v4064_v57 = vsel %vm2196_vm13, %v4052_v59, 0.0  ;;  %v4086_v2 = vld [vmem:[%s6866_s5] sm:$0xf] }
 0x636   : > { %v3962_v37 = vpop.f32.mrf.mxu0  ;;  %v4065_v24 = vadd.f32 %v4064_v57, %v4063_v31 }
 0x64c   : > { %v6806_v6 = vpop.f32.mrf.mxu1 }
 0x64d   : > { %v4053_v11 = vmul.f32 %v4034_v55, %v6806_v6 }
 0x64e   : > { %v6809_v61 = vpop.f32.mrf.mxu1 }
 0x64f   : > { %v4066_v20 = vsel %vm2196_vm13, %v4053_v11, 0.0  ;;  %v4054_v60 = vmul.f32 %v4038_v46, %v6809_v61 }
 0x650   : > { %v4067_v14 = vadd.f32 %v4066_v20, %v4065_v24  ;;  %v4002_v54 = vpop.f32.mrf.mxu1 }
 0x651   : > { %v4068_v36 = vsel %vm2196_vm13, %v4054_v60, 0.0 }
 0x652   : > { %v4003_v53 = vpop.f32.mrf.mxu1  ;;  %v4069_v48 = vadd.f32 %v4068_v36, %v4067_v14 }
 0x654   : > { %4070 = vadd.xlane.f32.xlu0 %v4069_v48 }
 0x66a   : > { %4142 = vrot.lane.b32.xlu0 %v4127_v42, %s4393_s17 }
 0x6dd   : > { %v4071_v18 = vpop.xlane.xlu0 %4070 }
 0x6de   : > { %v4072_v23 = vmul.f32 0.001953125, %v4071_v18 }
 0x6e0   : > { %v4074_v8 = vmul.f32 %v4073_v35, %v4072_v23 }
 0x6e2   : > { %v4076_v43 = vsel %vm4075_vm15, %v4074_v8, 0.0 }
 0x6e3   : > { %v4077_v13 = vrot.slane %v4076_v43, 4 }
 0x6e5   : > { %v4078_v38 = vadd.f32 %v4077_v13, %v4076_v43 }
 0x6e7   : > { %v4079_v1 = vrot.slane %v4078_v38, 2 }
 0x6e9   : > { %v4080_v12 = vadd.f32 %v4079_v1, %v4078_v38 }
 0x6eb   : > { %v4081_v26 = vrot.slane %v4080_v12, 1 }
 0x6ed   : > { %v4082_v32 = vadd.f32 %v4081_v26, %v4080_v12 }
 0x6ef   : > { %v4084_v33 = vadd.f32 %v4083_v41, %v4082_v32 }
 0x6f1   : > { %v4085_v49 = vmax.f32 %v4084_v33, 0.0 }
 0x6f3   : > { %v4090_v37 = vrot.slane %v4085_v49, %v5572_v3  ;;  %v4131_v3 = vpop.permute.xlu1 %4130 }
 0x6f4   : > { %v4146_v19 = vsel %vm538_vm6, %v4129_v47, %v4131_v3 }
 0x6f5   : > { %v4091_v39 = vmul.f32 %v4090_v37, %v4086_v2 }
 0x6f7   : > { %v4094_v5 = vadd.f32 %v4093_v4, %v4091_v39  ;;  %v4133_v51 = vpop.permute.xlu1 %4132 }
 0x6f8   : > { %v4147_v45 = vsel %vm538_vm6, %v4131_v3, %v4133_v51 }
 0x6f9   : > { %v4277_v28 = vmul.f32 -1.442695, %v4094_v5 }
 0x6fb   : > { %4373 = vpow2.f32 %v4277_v28  ;;  %v4135_v56 = vpop.permute.xlu1 %4134 }
 0x6fc   : > { %v4148_v57 = vsel %vm538_vm6, %v4133_v51, %v4135_v56 }
 0x6ff   : > { %v4137_v25 = vpop.permute.xlu1 %4136 }
 0x700   : > { %v4149_v46 = vsel %vm538_vm6, %v4135_v56, %v4137_v25 }
 0x703   : > { %v4139_v0 = vpop.permute.xlu1 %4138 }
 0x704   : > { %v4150_v11 = vsel %vm538_vm6, %v4137_v25, %v4139_v0 }
 0x708   : > { %v4374_v27 = vpop.eup %4373 }
 0x709   : > { %v4098_v40 = vadd.f32 1.0, %v4374_v27 }
 0x70b   : > { %4375 = vrcp.f32 %v4098_v40 }
 0x718   : > { %v4376_v44 = vpop.eup %4375 }
 0x719   : > { %4108 = vperm.xlu1 %4301, %v4376_v44  }
 0x71d   : > { %4140 = vrot.lane.b32.xlu1 %v4104_v58, %s4393_s17 }
 0x721   : > { %4144 = vrot.lane.b32.xlu1 %v4105_v9, %s4393_s17  ;;  %s307_s17 = scalar_lea.vmem %s6869_s8, %s4280_s11 }
 0x794   : > { %v4109_v50 = vpop.permute.xlu1 %4108 }
 0x795   : > { %v4111_v34 = vmul.f32 %v4109_v50, %v6762_v62  ;;  %v4112_v59 = vmul.f32 %v4109_v50, %v6764_v17  ;;  %v4113_v55 = vmul.f32 %v4109_v50, %v6768_v22  ;;  %v4114_v31 = vmul.f32 %v4109_v50, %v6770_v7  ;;  %v4143_v62 = vpop.permute.xlu0 %4142 }
 0x796   : > { %v4115_v24 = vmul.f32 %v4109_v50, %v6775_v21  ;;  %v4116_v17 = vmul.f32 %v4109_v50, %v6777_v16  ;;  %v4117_v30 = vmul.f32 %v4109_v50, %v6806_v6  ;;  %v4118_v58 = vmul.f32 %v4109_v50, %v6809_v61 }
 0x797   : > { %v4162_v20 = vadd.f32 %v4146_v19, %v4111_v34  ;;  %v4163_v60 = vadd.f32 %v4147_v45, %v4112_v59  ;;  %v4164_v14 = vadd.f32 %v4148_v57, %v4113_v55  ;;  %v4165_v54 = vadd.f32 %v4149_v46, %v4114_v31 }
 0x798   : > { %v4166_v36 = vadd.f32 %v4150_v11, %v4115_v24  ;;  %v4141_v22 = vpop.permute.xlu1 %4140 }
 0x799   : > { %v4170_v53 = vmax.f32 %v4162_v20, 0.0  ;;  %v4171_v7 = vmax.f32 %v4163_v60, 0.0  ;;  %v4172_v48 = vmax.f32 %v4164_v14, 0.0  ;;  %v4173_v63 = vmax.f32 %v4165_v54, 0.0 }
 0x79a   : > { %v4151_v21 = vsel %vm538_vm6, %v4139_v0, %v4141_v22  ;;  %v4152_v15 = vsel %vm538_vm6, %v4141_v22, %v4143_v62  ;;  %v4174_v35 = vmax.f32 %v4166_v36, 0.0 }
 0x79b   : > { %v4186_v29 = vcombine.low %v4170_v53, %v4171_v7  ;;  %v4187_v10 = vcombine.low %v4172_v48, %v4173_v63  ;;  %v4167_v52 = vadd.f32 %v4151_v21, %v4116_v17  ;;  %v4168_v16 = vadd.f32 %v4152_v15, %v4117_v30 }
 0x79c   : > { %v4145_v42 = vpop.permute.xlu1 %4144 }
 0x79d   : > { %4194 = vst [vmem:[%s307_s17] sm:$0xff] %v4186_v29  ;;  %4195 = vst [vmem:[%s307_s17 + $0x8] sm:$0xff] %v4187_v10  ;;  %v4175_v18 = vmax.f32 %v4167_v52, 0.0  ;;  %v4153_v23 = vsel %vm538_vm6, %v4143_v62, %v4145_v42  ;;  %v4176_v13 = vmax.f32 %v4168_v16, 0.0 }
 0x79e   : > { %v4169_v8 = vadd.f32 %v4153_v23, %v4118_v58 }
 0x79f   : > { %v4188_v43 = vcombine.low %v4174_v35, %v4175_v18 }
 0x7a0   : > { %v4177_v38 = vmax.f32 %v4169_v8, 0.0 }
 0x7a1   : > { %4196 = vst [vmem:[%s307_s17 + $0x10] sm:$0xff] %v4188_v43 }
 0x7a2   : > { %v4189_v6 = vcombine.low %v4176_v13, %v4177_v38 }
 0x7a4   : > { %4197 = vst [vmem:[%s307_s17 + $0x18] sm:$0xff] %v4189_v6 }
 0x7a5 PF: > { %s20_s29 = sadd.s32 1, %s4386_s29  }
 0x7a6   : > { %p17_p4 = scmp.ge.s32.totalorder %s20_s29, 4  }
 0x7a8   :  { %19 = sbr.rel (!%p17_p4) target bundleno = 3 (0x3), region = 82 }

</bundles_post_ra>
